<compile_context>
chip_gen: v7x
topology: tpu7x:2x2x1
jax: 0.10.0
libtpu: 0.0.40
codegen_flags: <defaults>
</compile_context>

<pallas_src>
import math

import jax
import jax.numpy as jnp
import numpy as np
from jax.experimental import pallas as pl
from jax.experimental.pallas import tpu as pltpu


# ----------------------------------------------------------------------------
# Host-side weight / selection-matrix preparation (done once, cached).
# ----------------------------------------------------------------------------
def _flatten_conv(w):
    """Conv1d weight (C_out, C_in, K) -> im2col weight (C_out, K*C_in), bf16.
    Column ordering is tap-major / channel-minor, matching the in-kernel im2col."""
    c_out, c_in, k = w.shape
    return jnp.transpose(w, (0, 2, 1)).reshape(c_out, k * c_in).astype(jnp.bfloat16)


def _flatten_deconv(w_t):
    """ConvTranspose1d weight (C_in, C_out, K) -> equivalent forward-conv im2col
    weight (C_out, K*C_in), bf16 (acts on the zero-stuffed, padded input)."""
    w_eff = jnp.transpose(jnp.flip(w_t, axis=-1), (1, 0, 2))   # (C_out, C_in, K)
    return _flatten_conv(w_eff)


def _gather_matrix(l_full, l_out, stride):
    """(l_full, l_out) 0/1 matrix G with G[m*stride, m] = 1 (stride decimation)."""
    rows = np.arange(l_full)[:, None]
    cols = np.arange(l_out)[None, :]
    return jnp.asarray(rows == cols * stride, jnp.bfloat16)


def _dilate_matrix(l_in, stride, lo, hi):
    """(l_in, l_dil) 0/1 matrix P with P[i, i*stride + lo] = 1 (zero-stuffing +
    asymmetric padding of the transposed convolution)."""
    l_dil = (l_in - 1) * stride + 1 + lo + hi
    rows = np.arange(l_in)[:, None]
    cols = np.arange(l_dil)[None, :]
    return jnp.asarray(cols == rows * stride + lo, jnp.bfloat16)


# ----------------------------------------------------------------------------
# Fused PhaseNet kernel (one batch element per grid step).
# ----------------------------------------------------------------------------
def _make_phasenet_kernel(arch):
    k1, k2, k3 = arch['k_conv1'], arch['k_conv2'], arch['k_conv3']
    ds_k, ds_p = arch['ds_kernel'], arch['ds_padding']
    us_k = arch['us_kernel']
    n_out = arch['out_channels']

    def mxu(a, b):
        # bf16 x bf16 MXU matmul, f32 accumulation.
        return jnp.dot(a, b, preferred_element_type=jnp.float32)

    def kernel(x_ref,
               w1, w2,
               d1a, d1b, d2a, d2b, d3a, d3b, d4a, d4b,
               u1d, u1c, u2d, u2c, u3d, u3c, u4d, u4c,
               w3,
               g1, g2, g3, g4,
               p1, p2, p3, p4,
               out_ref, slab):

        def im2col(parts, K, pad):
            # Stack K shifted windows of the (zero-padded) channel-stacked input
            # into one (K*C, L_out) bf16 patch matrix: a single deep-contraction
            # matmul per conv instead of K shallow ones; padding is done with
            # static-slice stores into the scratch slab, not a sel-matrix matmul.
            L = parts[0].shape[1]
            assert all(q.shape[1] == L for q in parts), "length mismatch"
            C = sum(q.shape[0] for q in parts)
            Lp = L + 2 * pad
            L_out = Lp - K + 1
            if pad:
                slab[:C, :Lp] = jnp.zeros((C, Lp), jnp.float32)
            r = 0
            for q in parts:
                slab[r:r + q.shape[0], pad:pad + L] = q
                r += q.shape[0]
            taps = [slab[:C, k:k + L_out] for k in range(K)]
            return jnp.concatenate(taps, axis=0).astype(jnp.bfloat16)

        def conv(parts, w_ref, K, pad, relu):
            y = mxu(w_ref[...], im2col(parts, K, pad))
            return jnp.maximum(y, 0.0) if relu else y

        def downsample(x, wa_ref, wb_ref, g_ref, K, pad):
            h = conv([x], wa_ref, K, K // 2, relu=True)        # 'same' conv + ReLU
            y = conv([h], wb_ref, K, pad, relu=True)           # full-length conv + ReLU
            # stride decimation: one small resident 0/1 matmul (exact in bf16;
            # ReLU commutes with column selection, next layer consumes bf16 anyway)
            return mxu(y.astype(jnp.bfloat16), g_ref[...])

        def upsample(x, skip, wd_ref, wc_ref, p_ref, K):
            # zero-stuffing + asymmetric padding of the transposed conv is a
            # resident 0/1 scatter matmul (exact value copy in bf16)
            x_pd = mxu(x.astype(jnp.bfloat16), p_ref[...])
            h = conv([x_pd], wd_ref, K, 0, relu=True)          # deconv + ReLU
            # skip concatenation folded into the conv via the shared im2col slab
            return conv([h, skip], wc_ref, K, K // 2, relu=True)

        x = x_ref[0]                                      # (C_sub, L) f32, lane-dense L
        xx = conv([x], w1, k1, k1 // 2, relu=False)       # conv1 (no activation)
        skip4 = conv([xx], w2, k2, k2 // 2, relu=False)   # conv2 (no activation)
        skip3 = downsample(skip4, d1a, d1b, g1, ds_k[0], ds_p[0])
        skip2 = downsample(skip3, d2a, d2b, g2, ds_k[1], ds_p[1])
        skip1 = downsample(skip2, d3a, d3b, g3, ds_k[2], ds_p[2])
        before_up = downsample(skip1, d4a, d4b, g4, ds_k[3], ds_p[3])
        up1 = upsample(before_up, skip1, u1d, u1c, p1, us_k[0])
        up2 = upsample(up1, skip2, u2d, u2c, p2, us_k[1])
        up3 = upsample(up2, skip3, u3d, u3c, p3, us_k[2])
        up4 = upsample(up3, skip4, u4d, u4c, p4, us_k[3])
        logits = conv([up4], w3, k3, k3 // 2, relu=False)  # conv3 (out rows padded)

        # softmax over the channel (sublane) axis; padded output rows masked out
        row = jax.lax.broadcasted_iota(jnp.int32, logits.shape, 0)
        masked = jnp.where(row < n_out, logits, -1e30)
        m = jnp.max(masked, axis=0, keepdims=True)
        e = jnp.exp(masked - m)
        out_ref[0] = (e / jnp.sum(e, axis=0, keepdims=True)).astype(out_ref.dtype)

    return kernel


def phasenet_pallas(x, flat_params, arch, slab_rows, slab_cols):
    N, c_in, L = x.shape
    c_sub = arch['in_sublanes']
    c_out_sub = arch['out_sublanes']
    # pad the 3-channel input to 8 sublanes on the host (aligned I/O blocks)
    x_p = jnp.zeros((N, c_sub, L), jnp.float32).at[:, :c_in, :].set(
        x.astype(jnp.float32))

    in_specs = [pl.BlockSpec((1, c_sub, L), lambda b: (b, 0, 0))]
    for a in flat_params:   # weights / sel matrices: full-array blocks, VMEM-resident
        in_specs.append(pl.BlockSpec(a.shape, lambda b, _n=a.ndim: (0,) * _n))

    out = pl.pallas_call(
        _make_phasenet_kernel(arch),
        out_shape=jax.ShapeDtypeStruct((N, c_out_sub, L), jnp.float32),
        grid=(N,),
        in_specs=in_specs,
        out_specs=pl.BlockSpec((1, c_out_sub, L), lambda b: (b, 0, 0)),
        scratch_shapes=[pltpu.VMEM((slab_rows, slab_cols), jnp.float32)],
        compiler_params=pltpu.CompilerParams(
            dimension_semantics=("parallel",),        # batch grid shards across TCs
            vmem_limit_bytes=32 * 1024 * 1024),
    )(x_p, *flat_params)
    return out[:, :arch['out_channels'], :]


# ----------------------------------------------------------------------------
# Model wrapper (parameter init mirrors PyTorch defaults; bias=False everywhere)
# ----------------------------------------------------------------------------
class PallasPhaseNet:
    """JAX/Pallas port of the PyTorch PhaseNet module (inference path)."""

    def __init__(self, config, key):
        self.config = config

        def conv_w(k, c_out, c_in, ks):
            bound = 1.0 / math.sqrt(c_in * ks)
            return jax.random.uniform(k, (c_out, c_in, ks), jnp.float32, -bound, bound)

        def deconv_w(k, c_in, c_out, ks):
            bound = 1.0 / math.sqrt(c_out * ks)
            return jax.random.uniform(k, (c_in, c_out, ks), jnp.float32, -bound, bound)

        c = config
        keys = iter(jax.random.split(key, 32))
        self.weights = [
            conv_w(next(keys), c['conv1_out_channel'], c['conv1_in_channel'],
                   c['conv1_kernel_size']),
            conv_w(next(keys), c['conv2_out_channel'], c['conv2_in_channel'],
                   c['conv2_kernel_size']),
        ]
        for i in range(1, 5):
            cin = c[f'downsample{i}_in_channel']
            cout = c[f'downsample{i}_out_channel']
            ks = c[f'downsample{i}_kernal_size']
            assert ks % 2 == 1, "odd kernel sizes required for padding='same'"
            self.weights.append(conv_w(next(keys), cin, cin, ks))      # conv1 (same)
            self.weights.append(conv_w(next(keys), cout, cin, ks))     # conv2 (strided)
        for i in range(1, 5):
            cin = c[f'upsample{i}_in_channel']
            cout = c[f'upsample{i}_out_channel']
            hid = c[f'upsample{i}_hidden_channel']
            cc = c[f'upsample{i}_concat_channel']
            ks = c[f'upsample{i}_kernel_size']
            assert ks % 2 == 1
            self.weights.append(deconv_w(next(keys), cin, hid, ks))        # deconv
            self.weights.append(conv_w(next(keys), cout, hid + cc, ks))    # conv (same)
        self.weights.append(conv_w(next(keys), c['conv3_out_channel'],
                                   c['conv3_in_channel'], c['conv3_kernel_size']))

        self.arch = {
            'k_conv1': c['conv1_kernel_size'], 'k_conv2': c['conv2_kernel_size'],
            'k_conv3': c['conv3_kernel_size'],
            'ds_kernel': tuple(c[f'downsample{i}_kernal_size'] for i in range(1, 5)),
            'ds_stride': tuple(c[f'downsample{i}_stride'] for i in range(1, 5)),
            'ds_padding': tuple(c[f'downsample{i}_padding'] for i in range(1, 5)),
            'ds_in_channel': tuple(c[f'downsample{i}_in_channel'] for i in range(1, 5)),
            'us_kernel': tuple(c[f'upsample{i}_kernel_size'] for i in range(1, 5)),
            'us_stride': tuple(c[f'upsample{i}_stride'] for i in range(1, 5)),
            'us_padding': tuple(c[f'upsample{i}_padding'] for i in range(1, 5)),
            'us_output_padding': tuple(c[f'upsample{i}_output_padding'] for i in range(1, 5)),
            'us_in_channel': tuple(c[f'upsample{i}_in_channel'] for i in range(1, 5)),
            'us_hidden': tuple(c[f'upsample{i}_hidden_channel'] for i in range(1, 5)),
            'us_concat': tuple(c[f'upsample{i}_concat_channel'] for i in range(1, 5)),
            'conv2_in': c['conv2_in_channel'], 'conv3_in': c['conv3_in_channel'],
            'out_channels': c['conv3_out_channel'],
            'in_channels': c['conv1_in_channel'],
            'in_sublanes': -(-c['conv1_in_channel'] // 8) * 8,
            'out_sublanes': -(-c['conv3_out_channel'] // 8) * 8,
        }

        # host-side re-layout cached once (review: no per-call preprocessing)
        self._flat_weights = self._prepare_weights()
        self._plan_cache = {}

    def _prepare_weights(self):
        a, w = self.arch, self.weights
        # conv1: pad input channels up to 8 sublanes with zero columns
        w1 = w[0]
        w1p = jnp.zeros((w1.shape[0], a['in_sublanes'], w1.shape[2]),
                        w1.dtype).at[:, :w1.shape[1], :].set(w1)
        flats = [_flatten_conv(w1p), _flatten_conv(w[1])]
        for i in range(4):                       # downsample blocks
            flats.append(_flatten_conv(w[2 + 2 * i]))
            flats.append(_flatten_conv(w[3 + 2 * i]))
        for i in range(4):                       # upsample blocks
            flats.append(_flatten_deconv(w[10 + 2 * i]))
            flats.append(_flatten_conv(w[11 + 2 * i]))
        # conv3: pad output channels up to 8 sublanes with zero rows
        w3 = w[18]
        w3p = jnp.zeros((a['out_sublanes'], w3.shape[1], w3.shape[2]),
                        w3.dtype).at[:w3.shape[0], :, :].set(w3)
        flats.append(_flatten_conv(w3p))
        return flats

    def _plan(self, L):
        """Length-dependent decimation / dilation matrices + scratch-slab dims."""
        if L in self._plan_cache:
            return self._plan_cache[L]
        a = self.arch
        rows = [a['in_sublanes'], a['conv2_in'], a['conv3_in'], a['out_sublanes']]
        cols = [L + 2 * (a['k_conv1'] // 2), L + 2 * (a['k_conv2'] // 2),
                L + 2 * (a['k_conv3'] // 2)]
        gathers, dilations = [], []
        down_lens = [L]
        cur = L
        for i in range(4):
            K, s, p = a['ds_kernel'][i], a['ds_stride'][i], a['ds_padding'][i]
            rows.append(a['ds_in_channel'][i])
            cols += [cur + 2 * (K // 2), cur + 2 * p]
            l_full = cur + 2 * p - K + 1
            l_out = (cur + 2 * p - K) // s + 1
            gathers.append(_gather_matrix(l_full, l_out, s))
            cur = l_out
            down_lens.append(cur)
        for i in range(4):
            K, s = a['us_kernel'][i], a['us_stride'][i]
            p, op = a['us_padding'][i], a['us_output_padding'][i]
            lo, hi = K - 1 - p, K - 1 - p + op
            l_dil = (cur - 1) * s + 1 + lo + hi
            dilations.append(_dilate_matrix(cur, s, lo, hi))
            l_out = l_dil - K + 1
            assert l_out == down_lens[3 - i], "upsample/skip length mismatch"
            rows += [a['us_in_channel'][i], a['us_hidden'][i] + a['us_concat'][i]]
            cols += [l_dil, l_out + 2 * (K // 2)]
            cur = l_out
        assert cur == L, "down/up-sampling path must return to the input length"
        plan = dict(gathers=gathers, dilations=dilations,
                    slab_rows=-(-max(rows) // 8) * 8, slab_cols=max(cols))
        self._plan_cache[L] = plan
        return plan

    def __call__(self, x, labels=None):
        # TODO(synk): the `labels is not None` branch of PhaseNet.forward calls an
        # external `_loss` not defined in the spec; only the inference path is ported.
        plan = self._plan(x.shape[-1])
        flat = self._flat_weights + plan['gathers'] + plan['dilations']
        return phasenet_pallas(x, flat, self.arch,
                               plan['slab_rows'], plan['slab_cols'])


# ----------------------------------------------------------------------------
# Pure-JAX reference (lax convolutions, mirroring the bf16 compute path).
# ----------------------------------------------------------------------------
def phasenet_reference(x, weights, arch):
    bf = jnp.bfloat16

    def conv(v, w, stride=1, padding=None):
        k = w.shape[-1]
        if padding is None:
            padding = k // 2
        return jax.lax.conv_general_dilated(
            v.astype(bf), w.astype(bf), window_strides=(stride,),
            padding=[(padding, padding)], dimension_numbers=("NCH", "OIH", "NCH"),
            preferred_element_type=jnp.float32)

    def conv_transpose(v, w_t, stride, padding, output_padding):
        k = w_t.shape[-1]
        w_eff = jnp.transpose(jnp.flip(w_t, -1), (1, 0, 2))   # (C_out, C_in, K)
        lo = k - 1 - padding
        hi = k - 1 - padding + output_padding
        return jax.lax.conv_general_dilated(
            v.astype(bf), w_eff.astype(bf), window_strides=(1,),
            padding=[(lo, hi)], lhs_dilation=(stride,),
            dimension_numbers=("NCH", "OIH", "NCH"),
            preferred_element_type=jnp.float32)

    relu = lambda t: jnp.maximum(t, 0.0)
    (wc1, wc2, d1a, d1b, d2a, d2b, d3a, d3b, d4a, d4b,
     u1d, u1c, u2d, u2c, u3d, u3c, u4d, u4c, wc3) = weights

    def down(v, wa, wb, stride, padding):
        h = relu(conv(v, wa))
        return relu(conv(h, wb, stride=stride, padding=padding))

    def up(v, skip, wd, wc, stride, padding, op):
        h = relu(conv_transpose(v, wd, stride, padding, op))
        cat = jnp.concatenate([h, skip], axis=1)
        return relu(conv(cat, wc))

    xx = conv(x, wc1)
    skip4 = conv(xx, wc2)
    skip3 = down(skip4, d1a, d1b, arch['ds_stride'][0], arch['ds_padding'][0])
    skip2 = down(skip3, d2a, d2b, arch['ds_stride'][1], arch['ds_padding'][1])
    skip1 = down(skip2, d3a, d3b, arch['ds_stride'][2], arch['ds_padding'][2])
    before_up = down(skip1, d4a, d4b, arch['ds_stride'][3], arch['ds_padding'][3])
    a1 = up(before_up, skip1, u1d, u1c, arch['us_stride'][0], arch['us_padding'][0],
            arch['us_output_padding'][0])
    a2 = up(a1, skip2, u2d, u2c, arch['us_stride'][1], arch['us_padding'][1],
            arch['us_output_padding'][1])
    a3 = up(a2, skip3, u3d, u3c, arch['us_stride'][2], arch['us_padding'][2],
            arch['us_output_padding'][2])
    a4 = up(a3, skip4, u4d, u4c, arch['us_stride'][3], arch['us_padding'][3],
            arch['us_output_padding'][3])
    logits = conv(a4, wc3)
    return jax.nn.softmax(logits, axis=1)


if __name__ == "__main__":
    root = jax.random.PRNGKey(0)
    xkey, wkey = jax.random.split(root)

    L = 128                       # trace length: one full lane tile (lane-dense)
    config = {
        'conv1_in_channel': 3, 'conv1_out_channel': 8, 'conv1_kernel_size': 7,
        'conv2_in_channel': 8, 'conv2_out_channel': 8, 'conv2_kernel_size': 7,
        'conv3_in_channel': 8, 'conv3_out_channel': 3, 'conv3_kernel_size': 7,
    }
    for i, (cin, cout, clen) in enumerate([(8, 16, 128), (16, 16, 64),
                                           (16, 32, 32), (32, 32, 16)], start=1):
        config.update({
            f'downsample{i}_in_channel': cin, f'downsample{i}_out_channel': cout,
            f'downsample{i}_in_length': clen, f'downsample{i}_stride': 2,
            f'downsample{i}_kernal_size': 7, f'downsample{i}_padding': 3,
        })
    for i, (cin, cout, cc, hid, clen) in enumerate([(32, 32, 32, 32, 8),
                                                    (32, 16, 16, 16, 16),
                                                    (16, 16, 16, 16, 32),
                                                    (16, 8, 8, 8, 64)], start=1):
        config.update({
            f'upsample{i}_in_channel': cin, f'upsample{i}_out_channel': cout,
            f'upsample{i}_concat_channel': cc, f'upsample{i}_hidden_channel': hid,
            f'upsample{i}_in_length': clen, f'upsample{i}_kernel_size': 7,
            f'upsample{i}_stride': 2, f'upsample{i}_padding': 3,
            f'upsample{i}_output_padding': 1,
        })

    x = jax.random.normal(xkey, (2, config['conv1_in_channel'], L), jnp.float32)

    model = PallasPhaseNet(config, wkey)
    pred = model(x)
    jax.block_until_ready(pred)
    assert pred.shape == (2, config['conv3_out_channel'], L), pred.shape

    # bf16-matmul / f32-accumulation reference; tolerance set for bf16 compute.
    pred_ref = phasenet_reference(x, model.weights, model.arch)
    np.testing.assert_allclose(np.asarray(pred), np.asarray(pred_ref),
                               rtol=1e-2, atol=1e-2)
    np.testing.assert_allclose(np.asarray(jnp.sum(pred, axis=1)), 1.0,
                               rtol=1e-4, atol=1e-4)

    print("KERNEL_OK")
</pallas_src>

<mosaic_0001>
module attributes {stable_mosaic.version = 11 : i64} {
  func.func @kernel(%arg0: i32, %arg1: memref<1x8x128xf32, #tpu.memory_space<vmem>>, %arg2: memref<8x56xbf16, #tpu.memory_space<vmem>>, %arg3: memref<8x56xbf16, #tpu.memory_space<vmem>>, %arg4: memref<8x56xbf16, #tpu.memory_space<vmem>>, %arg5: memref<16x56xbf16, #tpu.memory_space<vmem>>, %arg6: memref<16x112xbf16, #tpu.memory_space<vmem>>, %arg7: memref<16x112xbf16, #tpu.memory_space<vmem>>, %arg8: memref<16x112xbf16, #tpu.memory_space<vmem>>, %arg9: memref<32x112xbf16, #tpu.memory_space<vmem>>, %arg10: memref<32x224xbf16, #tpu.memory_space<vmem>>, %arg11: memref<32x224xbf16, #tpu.memory_space<vmem>>, %arg12: memref<32x224xbf16, #tpu.memory_space<vmem>>, %arg13: memref<32x448xbf16, #tpu.memory_space<vmem>>, %arg14: memref<16x224xbf16, #tpu.memory_space<vmem>>, %arg15: memref<16x224xbf16, #tpu.memory_space<vmem>>, %arg16: memref<16x112xbf16, #tpu.memory_space<vmem>>, %arg17: memref<16x224xbf16, #tpu.memory_space<vmem>>, %arg18: memref<8x112xbf16, #tpu.memory_space<vmem>>, %arg19: memref<8x112xbf16, #tpu.memory_space<vmem>>, %arg20: memref<8x56xbf16, #tpu.memory_space<vmem>>, %arg21: memref<128x64xbf16, #tpu.memory_space<vmem>>, %arg22: memref<64x32xbf16, #tpu.memory_space<vmem>>, %arg23: memref<32x16xbf16, #tpu.memory_space<vmem>>, %arg24: memref<16x8xbf16, #tpu.memory_space<vmem>>, %arg25: memref<8x22xbf16, #tpu.memory_space<vmem>>, %arg26: memref<16x38xbf16, #tpu.memory_space<vmem>>, %arg27: memref<32x70xbf16, #tpu.memory_space<vmem>>, %arg28: memref<64x134xbf16, #tpu.memory_space<vmem>>, %arg29: memref<1x8x128xf32, #tpu.memory_space<vmem>>, %arg30: memref<64x134xf32, #tpu.memory_space<vmem>>) attributes {dimension_semantics = [#tpu.dimension_semantics<parallel>], iteration_bounds = array<i64: 2>, scalar_prefetch = 0 : i64, scratch_operands = 1 : i64, tpu.core_type = #tpu.core_type<tc>, window_params = [{transform_indices = @transform_0, window_bounds = array<i64: 1, 8, 128>}, {pipeline_mode = #tpu.pipeline_mode<synchronous>, transform_indices = @transform_1, window_bounds = array<i64: 8, 56>}, {pipeline_mode = #tpu.pipeline_mode<synchronous>, transform_indices = @transform_2, window_bounds = array<i64: 8, 56>}, {pipeline_mode = #tpu.pipeline_mode<synchronous>, transform_indices = @transform_3, window_bounds = array<i64: 8, 56>}, {pipeline_mode = #tpu.pipeline_mode<synchronous>, transform_indices = @transform_4, window_bounds = array<i64: 16, 56>}, {pipeline_mode = #tpu.pipeline_mode<synchronous>, transform_indices = @transform_5, window_bounds = array<i64: 16, 112>}, {pipeline_mode = #tpu.pipeline_mode<synchronous>, transform_indices = @transform_6, window_bounds = array<i64: 16, 112>}, {pipeline_mode = #tpu.pipeline_mode<synchronous>, transform_indices = @transform_7, window_bounds = array<i64: 16, 112>}, {pipeline_mode = #tpu.pipeline_mode<synchronous>, transform_indices = @transform_8, window_bounds = array<i64: 32, 112>}, {pipeline_mode = #tpu.pipeline_mode<synchronous>, transform_indices = @transform_9, window_bounds = array<i64: 32, 224>}, {pipeline_mode = #tpu.pipeline_mode<synchronous>, transform_indices = @transform_10, window_bounds = array<i64: 32, 224>}, {pipeline_mode = #tpu.pipeline_mode<synchronous>, transform_indices = @transform_11, window_bounds = array<i64: 32, 224>}, {pipeline_mode = #tpu.pipeline_mode<synchronous>, transform_indices = @transform_12, window_bounds = array<i64: 32, 448>}, {pipeline_mode = #tpu.pipeline_mode<synchronous>, transform_indices = @transform_13, window_bounds = array<i64: 16, 224>}, {pipeline_mode = #tpu.pipeline_mode<synchronous>, transform_indices = @transform_14, window_bounds = array<i64: 16, 224>}, {pipeline_mode = #tpu.pipeline_mode<synchronous>, transform_indices = @transform_15, window_bounds = array<i64: 16, 112>}, {pipeline_mode = #tpu.pipeline_mode<synchronous>, transform_indices = @transform_16, window_bounds = array<i64: 16, 224>}, {pipeline_mode = #tpu.pipeline_mode<synchronous>, transform_indices = @transform_17, window_bounds = array<i64: 8, 112>}, {pipeline_mode = #tpu.pipeline_mode<synchronous>, transform_indices = @transform_18, window_bounds = array<i64: 8, 112>}, {pipeline_mode = #tpu.pipeline_mode<synchronous>, transform_indices = @transform_19, window_bounds = array<i64: 8, 56>}, {pipeline_mode = #tpu.pipeline_mode<synchronous>, transform_indices = @transform_20, window_bounds = array<i64: 128, 64>}, {pipeline_mode = #tpu.pipeline_mode<synchronous>, transform_indices = @transform_21, window_bounds = array<i64: 64, 32>}, {pipeline_mode = #tpu.pipeline_mode<synchronous>, transform_indices = @transform_22, window_bounds = array<i64: 32, 16>}, {pipeline_mode = #tpu.pipeline_mode<synchronous>, transform_indices = @transform_23, window_bounds = array<i64: 16, 8>}, {pipeline_mode = #tpu.pipeline_mode<synchronous>, transform_indices = @transform_24, window_bounds = array<i64: 8, 22>}, {pipeline_mode = #tpu.pipeline_mode<synchronous>, transform_indices = @transform_25, window_bounds = array<i64: 16, 38>}, {pipeline_mode = #tpu.pipeline_mode<synchronous>, transform_indices = @transform_26, window_bounds = array<i64: 32, 70>}, {pipeline_mode = #tpu.pipeline_mode<synchronous>, transform_indices = @transform_27, window_bounds = array<i64: 64, 134>}, {transform_indices = @transform_28, window_bounds = array<i64: 1, 8, 128>}]} {
    %c0 = arith.constant 0 : index
    %c0_0 = arith.constant 0 : index
    %c0_1 = arith.constant 0 : index
    %0 = vector.load %arg1[%c0, %c0_0, %c0_1] : memref<1x8x128xf32, #tpu.memory_space<vmem>>, vector<1x8x128xf32>
    %1 = vector.shape_cast %0 : vector<1x8x128xf32> to vector<8x128xf32>
    %c0_2 = arith.constant 0 : index
    %c0_3 = arith.constant 0 : index
    %2 = vector.load %arg2[%c0_2, %c0_3] : memref<8x56xbf16, #tpu.memory_space<vmem>>, vector<8x56xbf16>
    %cst = arith.constant 0.000000e+00 : f32
    %3 = vector.broadcast %cst : f32 to vector<8x134xf32>
    %c0_4 = arith.constant 0 : index
    %c0_5 = arith.constant 0 : index
    %4 = vector.load %arg30[%c0_4, %c0_5] : memref<64x134xf32, #tpu.memory_space<vmem>>, vector<8x134xf32>
    tpu.vector_store %arg30[%c0_4, %c0_5], %3 {strides = array<i32>} : memref<64x134xf32, #tpu.memory_space<vmem>>, vector<8x134xf32>,
    %c0_6 = arith.constant 0 : index
    %c3 = arith.constant 3 : index
    %5 = vector.load %arg30[%c0_6, %c3] : memref<64x134xf32, #tpu.memory_space<vmem>>, vector<8x128xf32>
    tpu.vector_store %arg30[%c0_6, %c3], %1 {strides = array<i32>} : memref<64x134xf32, #tpu.memory_space<vmem>>, vector<8x128xf32>,
    %c0_7 = arith.constant 0 : index
    %c0_8 = arith.constant 0 : index
    %6 = vector.load %arg30[%c0_7, %c0_8] : memref<64x134xf32, #tpu.memory_space<vmem>>, vector<8x128xf32>
    %c0_9 = arith.constant 0 : index
    %c1 = arith.constant 1 : index
    %7 = vector.load %arg30[%c0_9, %c1] : memref<64x134xf32, #tpu.memory_space<vmem>>, vector<8x128xf32>
    %c0_10 = arith.constant 0 : index
    %c2 = arith.constant 2 : index
    %8 = vector.load %arg30[%c0_10, %c2] : memref<64x134xf32, #tpu.memory_space<vmem>>, vector<8x128xf32>
    %c0_11 = arith.constant 0 : index
    %c3_12 = arith.constant 3 : index
    %9 = vector.load %arg30[%c0_11, %c3_12] : memref<64x134xf32, #tpu.memory_space<vmem>>, vector<8x128xf32>
    %c0_13 = arith.constant 0 : index
    %c4 = arith.constant 4 : index
    %10 = vector.load %arg30[%c0_13, %c4] : memref<64x134xf32, #tpu.memory_space<vmem>>, vector<8x128xf32>
    %c0_14 = arith.constant 0 : index
    %c5 = arith.constant 5 : index
    %11 = vector.load %arg30[%c0_14, %c5] : memref<64x134xf32, #tpu.memory_space<vmem>>, vector<8x128xf32>
    %c0_15 = arith.constant 0 : index
    %c6 = arith.constant 6 : index
    %12 = vector.load %arg30[%c0_15, %c6] : memref<64x134xf32, #tpu.memory_space<vmem>>, vector<8x128xf32>
    %13 = tpu.concatenate %6, %7, %8, %9, %10, %11, %12 in 0 : vector<8x128xf32>, vector<8x128xf32>, vector<8x128xf32>, vector<8x128xf32>, vector<8x128xf32>, vector<8x128xf32>, vector<8x128xf32> -> vector<56x128xf32>
    %14 = arith.truncf %13 : vector<56x128xf32> to vector<56x128xbf16>
    %cst_16 = arith.constant dense<0.000000e+00> : vector<8x128xf32>
    %15 = tpu.matmul %2, %14, %cst_16 {dimension_numbers = #tpu.dot_dimension_numbers<[1], [0], [0], [1], [0, 0, 1, 1], [], []>} : vector<8x56xbf16>, vector<56x128xbf16>, vector<8x128xf32> -> vector<8x128xf32>
    %c0_17 = arith.constant 0 : index
    %c0_18 = arith.constant 0 : index
    %16 = vector.load %arg3[%c0_17, %c0_18] : memref<8x56xbf16, #tpu.memory_space<vmem>>, vector<8x56xbf16>
    %cst_19 = arith.constant 0.000000e+00 : f32
    %17 = vector.broadcast %cst_19 : f32 to vector<8x134xf32>
    %c0_20 = arith.constant 0 : index
    %c0_21 = arith.constant 0 : index
    %18 = vector.load %arg30[%c0_20, %c0_21] : memref<64x134xf32, #tpu.memory_space<vmem>>, vector<8x134xf32>
    tpu.vector_store %arg30[%c0_20, %c0_21], %17 {strides = array<i32>} : memref<64x134xf32, #tpu.memory_space<vmem>>, vector<8x134xf32>,
    %c0_22 = arith.constant 0 : index
    %c3_23 = arith.constant 3 : index
    %19 = vector.load %arg30[%c0_22, %c3_23] : memref<64x134xf32, #tpu.memory_space<vmem>>, vector<8x128xf32>
    tpu.vector_store %arg30[%c0_22, %c3_23], %15 {strides = array<i32>} : memref<64x134xf32, #tpu.memory_space<vmem>>, vector<8x128xf32>,
    %c0_24 = arith.constant 0 : index
    %c0_25 = arith.constant 0 : index
    %20 = vector.load %arg30[%c0_24, %c0_25] : memref<64x134xf32, #tpu.memory_space<vmem>>, vector<8x128xf32>
    %c0_26 = arith.constant 0 : index
    %c1_27 = arith.constant 1 : index
    %21 = vector.load %arg30[%c0_26, %c1_27] : memref<64x134xf32, #tpu.memory_space<vmem>>, vector<8x128xf32>
    %c0_28 = arith.constant 0 : index
    %c2_29 = arith.constant 2 : index
    %22 = vector.load %arg30[%c0_28, %c2_29] : memref<64x134xf32, #tpu.memory_space<vmem>>, vector<8x128xf32>
    %c0_30 = arith.constant 0 : index
    %c3_31 = arith.constant 3 : index
    %23 = vector.load %arg30[%c0_30, %c3_31] : memref<64x134xf32, #tpu.memory_space<vmem>>, vector<8x128xf32>
    %c0_32 = arith.constant 0 : index
    %c4_33 = arith.constant 4 : index
    %24 = vector.load %arg30[%c0_32, %c4_33] : memref<64x134xf32, #tpu.memory_space<vmem>>, vector<8x128xf32>
    %c0_34 = arith.constant 0 : index
    %c5_35 = arith.constant 5 : index
    %25 = vector.load %arg30[%c0_34, %c5_35] : memref<64x134xf32, #tpu.memory_space<vmem>>, vector<8x128xf32>
    %c0_36 = arith.constant 0 : index
    %c6_37 = arith.constant 6 : index
    %26 = vector.load %arg30[%c0_36, %c6_37] : memref<64x134xf32, #tpu.memory_space<vmem>>, vector<8x128xf32>
    %27 = tpu.concatenate %20, %21, %22, %23, %24, %25, %26 in 0 : vector<8x128xf32>, vector<8x128xf32>, vector<8x128xf32>, vector<8x128xf32>, vector<8x128xf32>, vector<8x128xf32>, vector<8x128xf32> -> vector<56x128xf32>
    %28 = arith.truncf %27 : vector<56x128xf32> to vector<56x128xbf16>
    %cst_38 = arith.constant dense<0.000000e+00> : vector<8x128xf32>
    %29 = tpu.matmul %16, %28, %cst_38 {dimension_numbers = #tpu.dot_dimension_numbers<[1], [0], [0], [1], [0, 0, 1, 1], [], []>} : vector<8x56xbf16>, vector<56x128xbf16>, vector<8x128xf32> -> vector<8x128xf32>
    %c0_39 = arith.constant 0 : index
    %c0_40 = arith.constant 0 : index
    %30 = vector.load %arg4[%c0_39, %c0_40] : memref<8x56xbf16, #tpu.memory_space<vmem>>, vector<8x56xbf16>
    %cst_41 = arith.constant 0.000000e+00 : f32
    %31 = vector.broadcast %cst_41 : f32 to vector<8x134xf32>
    %c0_42 = arith.constant 0 : index
    %c0_43 = arith.constant 0 : index
    %32 = vector.load %arg30[%c0_42, %c0_43] : memref<64x134xf32, #tpu.memory_space<vmem>>, vector<8x134xf32>
    tpu.vector_store %arg30[%c0_42, %c0_43], %31 {strides = array<i32>} : memref<64x134xf32, #tpu.memory_space<vmem>>, vector<8x134xf32>,
    %c0_44 = arith.constant 0 : index
    %c3_45 = arith.constant 3 : index
    %33 = vector.load %arg30[%c0_44, %c3_45] : memref<64x134xf32, #tpu.memory_space<vmem>>, vector<8x128xf32>
    tpu.vector_store %arg30[%c0_44, %c3_45], %29 {strides = array<i32>} : memref<64x134xf32, #tpu.memory_space<vmem>>, vector<8x128xf32>,
    %c0_46 = arith.constant 0 : index
    %c0_47 = arith.constant 0 : index
    %34 = vector.load %arg30[%c0_46, %c0_47] : memref<64x134xf32, #tpu.memory_space<vmem>>, vector<8x128xf32>
    %c0_48 = arith.constant 0 : index
    %c1_49 = arith.constant 1 : index
    %35 = vector.load %arg30[%c0_48, %c1_49] : memref<64x134xf32, #tpu.memory_space<vmem>>, vector<8x128xf32>
    %c0_50 = arith.constant 0 : index
    %c2_51 = arith.constant 2 : index
    %36 = vector.load %arg30[%c0_50, %c2_51] : memref<64x134xf32, #tpu.memory_space<vmem>>, vector<8x128xf32>
    %c0_52 = arith.constant 0 : index
    %c3_53 = arith.constant 3 : index
    %37 = vector.load %arg30[%c0_52, %c3_53] : memref<64x134xf32, #tpu.memory_space<vmem>>, vector<8x128xf32>
    %c0_54 = arith.constant 0 : index
    %c4_55 = arith.constant 4 : index
    %38 = vector.load %arg30[%c0_54, %c4_55] : memref<64x134xf32, #tpu.memory_space<vmem>>, vector<8x128xf32>
    %c0_56 = arith.constant 0 : index
    %c5_57 = arith.constant 5 : index
    %39 = vector.load %arg30[%c0_56, %c5_57] : memref<64x134xf32, #tpu.memory_space<vmem>>, vector<8x128xf32>
    %c0_58 = arith.constant 0 : index
    %c6_59 = arith.constant 6 : index
    %40 = vector.load %arg30[%c0_58, %c6_59] : memref<64x134xf32, #tpu.memory_space<vmem>>, vector<8x128xf32>
    %41 = tpu.concatenate %34, %35, %36, %37, %38, %39, %40 in 0 : vector<8x128xf32>, vector<8x128xf32>, vector<8x128xf32>, vector<8x128xf32>, vector<8x128xf32>, vector<8x128xf32>, vector<8x128xf32> -> vector<56x128xf32>
    %42 = arith.truncf %41 : vector<56x128xf32> to vector<56x128xbf16>
    %cst_60 = arith.constant dense<0.000000e+00> : vector<8x128xf32>
    %43 = tpu.matmul %30, %42, %cst_60 {dimension_numbers = #tpu.dot_dimension_numbers<[1], [0], [0], [1], [0, 0, 1, 1], [], []>} : vector<8x56xbf16>, vector<56x128xbf16>, vector<8x128xf32> -> vector<8x128xf32>
    %cst_61 = arith.constant 0.000000e+00 : f32
    %44 = vector.broadcast %cst_61 : f32 to vector<8x128xf32>
    %45 = arith.maximumf %43, %44 : vector<8x128xf32>
    %c0_62 = arith.constant 0 : index
    %c0_63 = arith.constant 0 : index
    %46 = vector.load %arg5[%c0_62, %c0_63] : memref<16x56xbf16, #tpu.memory_space<vmem>>, vector<16x56xbf16>
    %cst_64 = arith.constant 0.000000e+00 : f32
    %47 = vector.broadcast %cst_64 : f32 to vector<8x134xf32>
    %c0_65 = arith.constant 0 : index
    %c0_66 = arith.constant 0 : index
    %48 = vector.load %arg30[%c0_65, %c0_66] : memref<64x134xf32, #tpu.memory_space<vmem>>, vector<8x134xf32>
    tpu.vector_store %arg30[%c0_65, %c0_66], %47 {strides = array<i32>} : memref<64x134xf32, #tpu.memory_space<vmem>>, vector<8x134xf32>,
    %c0_67 = arith.constant 0 : index
    %c3_68 = arith.constant 3 : index
    %49 = vector.load %arg30[%c0_67, %c3_68] : memref<64x134xf32, #tpu.memory_space<vmem>>, vector<8x128xf32>
    tpu.vector_store %arg30[%c0_67, %c3_68], %45 {strides = array<i32>} : memref<64x134xf32, #tpu.memory_space<vmem>>, vector<8x128xf32>,
    %c0_69 = arith.constant 0 : index
    %c0_70 = arith.constant 0 : index
    %50 = vector.load %arg30[%c0_69, %c0_70] : memref<64x134xf32, #tpu.memory_space<vmem>>, vector<8x128xf32>
    %c0_71 = arith.constant 0 : index
    %c1_72 = arith.constant 1 : index
    %51 = vector.load %arg30[%c0_71, %c1_72] : memref<64x134xf32, #tpu.memory_space<vmem>>, vector<8x128xf32>
    %c0_73 = arith.constant 0 : index
    %c2_74 = arith.constant 2 : index
    %52 = vector.load %arg30[%c0_73, %c2_74] : memref<64x134xf32, #tpu.memory_space<vmem>>, vector<8x128xf32>
    %c0_75 = arith.constant 0 : index
    %c3_76 = arith.constant 3 : index
    %53 = vector.load %arg30[%c0_75, %c3_76] : memref<64x134xf32, #tpu.memory_space<vmem>>, vector<8x128xf32>
    %c0_77 = arith.constant 0 : index
    %c4_78 = arith.constant 4 : index
    %54 = vector.load %arg30[%c0_77, %c4_78] : memref<64x134xf32, #tpu.memory_space<vmem>>, vector<8x128xf32>
    %c0_79 = arith.constant 0 : index
    %c5_80 = arith.constant 5 : index
    %55 = vector.load %arg30[%c0_79, %c5_80] : memref<64x134xf32, #tpu.memory_space<vmem>>, vector<8x128xf32>
    %c0_81 = arith.constant 0 : index
    %c6_82 = arith.constant 6 : index
    %56 = vector.load %arg30[%c0_81, %c6_82] : memref<64x134xf32, #tpu.memory_space<vmem>>, vector<8x128xf32>
    %57 = tpu.concatenate %50, %51, %52, %53, %54, %55, %56 in 0 : vector<8x128xf32>, vector<8x128xf32>, vector<8x128xf32>, vector<8x128xf32>, vector<8x128xf32>, vector<8x128xf32>, vector<8x128xf32> -> vector<56x128xf32>
    %58 = arith.truncf %57 : vector<56x128xf32> to vector<56x128xbf16>
    %cst_83 = arith.constant dense<0.000000e+00> : vector<16x128xf32>
    %59 = tpu.matmul %46, %58, %cst_83 {dimension_numbers = #tpu.dot_dimension_numbers<[1], [0], [0], [1], [0, 0, 1, 1], [], []>} : vector<16x56xbf16>, vector<56x128xbf16>, vector<16x128xf32> -> vector<16x128xf32>
    %cst_84 = arith.constant 0.000000e+00 : f32
    %60 = vector.broadcast %cst_84 : f32 to vector<16x128xf32>
    %61 = arith.maximumf %59, %60 : vector<16x128xf32>
    %62 = arith.truncf %61 : vector<16x128xf32> to vector<16x128xbf16>
    %c0_85 = arith.constant 0 : index
    %c0_86 = arith.constant 0 : index
    %63 = vector.load %arg21[%c0_85, %c0_86] : memref<128x64xbf16, #tpu.memory_space<vmem>>, vector<128x64xbf16>
    %cst_87 = arith.constant dense<0.000000e+00> : vector<16x64xf32>
    %64 = tpu.matmul %62, %63, %cst_87 {dimension_numbers = #tpu.dot_dimension_numbers<[1], [0], [0], [1], [0, 0, 1, 1], [], []>} : vector<16x128xbf16>, vector<128x64xbf16>, vector<16x64xf32> -> vector<16x64xf32>
    %c0_88 = arith.constant 0 : index
    %c0_89 = arith.constant 0 : index
    %65 = vector.load %arg6[%c0_88, %c0_89] : memref<16x112xbf16, #tpu.memory_space<vmem>>, vector<16x112xbf16>
    %cst_90 = arith.constant 0.000000e+00 : f32
    %66 = vector.broadcast %cst_90 : f32 to vector<16x70xf32>
    %c0_91 = arith.constant 0 : index
    %c0_92 = arith.constant 0 : index
    %67 = vector.load %arg30[%c0_91, %c0_92] : memref<64x134xf32, #tpu.memory_space<vmem>>, vector<16x70xf32>
    tpu.vector_store %arg30[%c0_91, %c0_92], %66 {strides = array<i32>} : memref<64x134xf32, #tpu.memory_space<vmem>>, vector<16x70xf32>,
    %c0_93 = arith.constant 0 : index
    %c3_94 = arith.constant 3 : index
    %68 = vector.load %arg30[%c0_93, %c3_94] : memref<64x134xf32, #tpu.memory_space<vmem>>, vector<16x64xf32>
    tpu.vector_store %arg30[%c0_93, %c3_94], %64 {strides = array<i32>} : memref<64x134xf32, #tpu.memory_space<vmem>>, vector<16x64xf32>,
    %c0_95 = arith.constant 0 : index
    %c0_96 = arith.constant 0 : index
    %69 = vector.load %arg30[%c0_95, %c0_96] : memref<64x134xf32, #tpu.memory_space<vmem>>, vector<16x64xf32>
    %c0_97 = arith.constant 0 : index
    %c1_98 = arith.constant 1 : index
    %70 = vector.load %arg30[%c0_97, %c1_98] : memref<64x134xf32, #tpu.memory_space<vmem>>, vector<16x64xf32>
    %c0_99 = arith.constant 0 : index
    %c2_100 = arith.constant 2 : index
    %71 = vector.load %arg30[%c0_99, %c2_100] : memref<64x134xf32, #tpu.memory_space<vmem>>, vector<16x64xf32>
    %c0_101 = arith.constant 0 : index
    %c3_102 = arith.constant 3 : index
    %72 = vector.load %arg30[%c0_101, %c3_102] : memref<64x134xf32, #tpu.memory_space<vmem>>, vector<16x64xf32>
    %c0_103 = arith.constant 0 : index
    %c4_104 = arith.constant 4 : index
    %73 = vector.load %arg30[%c0_103, %c4_104] : memref<64x134xf32, #tpu.memory_space<vmem>>, vector<16x64xf32>
    %c0_105 = arith.constant 0 : index
    %c5_106 = arith.constant 5 : index
    %74 = vector.load %arg30[%c0_105, %c5_106] : memref<64x134xf32, #tpu.memory_space<vmem>>, vector<16x64xf32>
    %c0_107 = arith.constant 0 : index
    %c6_108 = arith.constant 6 : index
    %75 = vector.load %arg30[%c0_107, %c6_108] : memref<64x134xf32, #tpu.memory_space<vmem>>, vector<16x64xf32>
    %76 = tpu.concatenate %69, %70, %71, %72, %73, %74, %75 in 0 : vector<16x64xf32>, vector<16x64xf32>, vector<16x64xf32>, vector<16x64xf32>, vector<16x64xf32>, vector<16x64xf32>, vector<16x64xf32> -> vector<112x64xf32>
    %77 = arith.truncf %76 : vector<112x64xf32> to vector<112x64xbf16>
    %cst_109 = arith.constant dense<0.000000e+00> : vector<16x64xf32>
    %78 = tpu.matmul %65, %77, %cst_109 {dimension_numbers = #tpu.dot_dimension_numbers<[1], [0], [0], [1], [0, 0, 1, 1], [], []>} : vector<16x112xbf16>, vector<112x64xbf16>, vector<16x64xf32> -> vector<16x64xf32>
    %cst_110 = arith.constant 0.000000e+00 : f32
    %79 = vector.broadcast %cst_110 : f32 to vector<16x64xf32>
    %80 = arith.maximumf %78, %79 : vector<16x64xf32>
    %c0_111 = arith.constant 0 : index
    %c0_112 = arith.constant 0 : index
    %81 = vector.load %arg7[%c0_111, %c0_112] : memref<16x112xbf16, #tpu.memory_space<vmem>>, vector<16x112xbf16>
    %cst_113 = arith.constant 0.000000e+00 : f32
    %82 = vector.broadcast %cst_113 : f32 to vector<16x70xf32>
    %c0_114 = arith.constant 0 : index
    %c0_115 = arith.constant 0 : index
    %83 = vector.load %arg30[%c0_114, %c0_115] : memref<64x134xf32, #tpu.memory_space<vmem>>, vector<16x70xf32>
    tpu.vector_store %arg30[%c0_114, %c0_115], %82 {strides = array<i32>} : memref<64x134xf32, #tpu.memory_space<vmem>>, vector<16x70xf32>,
    %c0_116 = arith.constant 0 : index
    %c3_117 = arith.constant 3 : index
    %84 = vector.load %arg30[%c0_116, %c3_117] : memref<64x134xf32, #tpu.memory_space<vmem>>, vector<16x64xf32>
    tpu.vector_store %arg30[%c0_116, %c3_117], %80 {strides = array<i32>} : memref<64x134xf32, #tpu.memory_space<vmem>>, vector<16x64xf32>,
    %c0_118 = arith.constant 0 : index
    %c0_119 = arith.constant 0 : index
    %85 = vector.load %arg30[%c0_118, %c0_119] : memref<64x134xf32, #tpu.memory_space<vmem>>, vector<16x64xf32>
    %c0_120 = arith.constant 0 : index
    %c1_121 = arith.constant 1 : index
    %86 = vector.load %arg30[%c0_120, %c1_121] : memref<64x134xf32, #tpu.memory_space<vmem>>, vector<16x64xf32>
    %c0_122 = arith.constant 0 : index
    %c2_123 = arith.constant 2 : index
    %87 = vector.load %arg30[%c0_122, %c2_123] : memref<64x134xf32, #tpu.memory_space<vmem>>, vector<16x64xf32>
    %c0_124 = arith.constant 0 : index
    %c3_125 = arith.constant 3 : index
    %88 = vector.load %arg30[%c0_124, %c3_125] : memref<64x134xf32, #tpu.memory_space<vmem>>, vector<16x64xf32>
    %c0_126 = arith.constant 0 : index
    %c4_127 = arith.constant 4 : index
    %89 = vector.load %arg30[%c0_126, %c4_127] : memref<64x134xf32, #tpu.memory_space<vmem>>, vector<16x64xf32>
    %c0_128 = arith.constant 0 : index
    %c5_129 = arith.constant 5 : index
    %90 = vector.load %arg30[%c0_128, %c5_129] : memref<64x134xf32, #tpu.memory_space<vmem>>, vector<16x64xf32>
    %c0_130 = arith.constant 0 : index
    %c6_131 = arith.constant 6 : index
    %91 = vector.load %arg30[%c0_130, %c6_131] : memref<64x134xf32, #tpu.memory_space<vmem>>, vector<16x64xf32>
    %92 = tpu.concatenate %85, %86, %87, %88, %89, %90, %91 in 0 : vector<16x64xf32>, vector<16x64xf32>, vector<16x64xf32>, vector<16x64xf32>, vector<16x64xf32>, vector<16x64xf32>, vector<16x64xf32> -> vector<112x64xf32>
    %93 = arith.truncf %92 : vector<112x64xf32> to vector<112x64xbf16>
    %cst_132 = arith.constant dense<0.000000e+00> : vector<16x64xf32>
    %94 = tpu.matmul %81, %93, %cst_132 {dimension_numbers = #tpu.dot_dimension_numbers<[1], [0], [0], [1], [0, 0, 1, 1], [], []>} : vector<16x112xbf16>, vector<112x64xbf16>, vector<16x64xf32> -> vector<16x64xf32>
    %cst_133 = arith.constant 0.000000e+00 : f32
    %95 = vector.broadcast %cst_133 : f32 to vector<16x64xf32>
    %96 = arith.maximumf %94, %95 : vector<16x64xf32>
    %97 = arith.truncf %96 : vector<16x64xf32> to vector<16x64xbf16>
    %c0_134 = arith.constant 0 : index
    %c0_135 = arith.constant 0 : index
    %98 = vector.load %arg22[%c0_134, %c0_135] : memref<64x32xbf16, #tpu.memory_space<vmem>>, vector<64x32xbf16>
    %cst_136 = arith.constant dense<0.000000e+00> : vector<16x32xf32>
    %99 = tpu.matmul %97, %98, %cst_136 {dimension_numbers = #tpu.dot_dimension_numbers<[1], [0], [0], [1], [0, 0, 1, 1], [], []>} : vector<16x64xbf16>, vector<64x32xbf16>, vector<16x32xf32> -> vector<16x32xf32>
    %c0_137 = arith.constant 0 : index
    %c0_138 = arith.constant 0 : index
    %100 = vector.load %arg8[%c0_137, %c0_138] : memref<16x112xbf16, #tpu.memory_space<vmem>>, vector<16x112xbf16>
    %cst_139 = arith.constant 0.000000e+00 : f32
    %101 = vector.broadcast %cst_139 : f32 to vector<16x38xf32>
    %c0_140 = arith.constant 0 : index
    %c0_141 = arith.constant 0 : index
    %102 = vector.load %arg30[%c0_140, %c0_141] : memref<64x134xf32, #tpu.memory_space<vmem>>, vector<16x38xf32>
    tpu.vector_store %arg30[%c0_140, %c0_141], %101 {strides = array<i32>} : memref<64x134xf32, #tpu.memory_space<vmem>>, vector<16x38xf32>,
    %c0_142 = arith.constant 0 : index
    %c3_143 = arith.constant 3 : index
    %103 = vector.load %arg30[%c0_142, %c3_143] : memref<64x134xf32, #tpu.memory_space<vmem>>, vector<16x32xf32>
    tpu.vector_store %arg30[%c0_142, %c3_143], %99 {strides = array<i32>} : memref<64x134xf32, #tpu.memory_space<vmem>>, vector<16x32xf32>,
    %c0_144 = arith.constant 0 : index
    %c0_145 = arith.constant 0 : index
    %104 = vector.load %arg30[%c0_144, %c0_145] : memref<64x134xf32, #tpu.memory_space<vmem>>, vector<16x32xf32>
    %c0_146 = arith.constant 0 : index
    %c1_147 = arith.constant 1 : index
    %105 = vector.load %arg30[%c0_146, %c1_147] : memref<64x134xf32, #tpu.memory_space<vmem>>, vector<16x32xf32>
    %c0_148 = arith.constant 0 : index
    %c2_149 = arith.constant 2 : index
    %106 = vector.load %arg30[%c0_148, %c2_149] : memref<64x134xf32, #tpu.memory_space<vmem>>, vector<16x32xf32>
    %c0_150 = arith.constant 0 : index
    %c3_151 = arith.constant 3 : index
    %107 = vector.load %arg30[%c0_150, %c3_151] : memref<64x134xf32, #tpu.memory_space<vmem>>, vector<16x32xf32>
    %c0_152 = arith.constant 0 : index
    %c4_153 = arith.constant 4 : index
    %108 = vector.load %arg30[%c0_152, %c4_153] : memref<64x134xf32, #tpu.memory_space<vmem>>, vector<16x32xf32>
    %c0_154 = arith.constant 0 : index
    %c5_155 = arith.constant 5 : index
    %109 = vector.load %arg30[%c0_154, %c5_155] : memref<64x134xf32, #tpu.memory_space<vmem>>, vector<16x32xf32>
    %c0_156 = arith.constant 0 : index
    %c6_157 = arith.constant 6 : index
    %110 = vector.load %arg30[%c0_156, %c6_157] : memref<64x134xf32, #tpu.memory_space<vmem>>, vector<16x32xf32>
    %111 = tpu.concatenate %104, %105, %106, %107, %108, %109, %110 in 0 : vector<16x32xf32>, vector<16x32xf32>, vector<16x32xf32>, vector<16x32xf32>, vector<16x32xf32>, vector<16x32xf32>, vector<16x32xf32> -> vector<112x32xf32>
    %112 = arith.truncf %111 : vector<112x32xf32> to vector<112x32xbf16>
    %cst_158 = arith.constant dense<0.000000e+00> : vector<16x32xf32>
    %113 = tpu.matmul %100, %112, %cst_158 {dimension_numbers = #tpu.dot_dimension_numbers<[1], [0], [0], [1], [0, 0, 1, 1], [], []>} : vector<16x112xbf16>, vector<112x32xbf16>, vector<16x32xf32> -> vector<16x32xf32>
    %cst_159 = arith.constant 0.000000e+00 : f32
    %114 = vector.broadcast %cst_159 : f32 to vector<16x32xf32>
    %115 = arith.maximumf %113, %114 : vector<16x32xf32>
    %c0_160 = arith.constant 0 : index
    %c0_161 = arith.constant 0 : index
    %116 = vector.load %arg9[%c0_160, %c0_161] : memref<32x112xbf16, #tpu.memory_space<vmem>>, vector<32x112xbf16>
    %cst_162 = arith.constant 0.000000e+00 : f32
    %117 = vector.broadcast %cst_162 : f32 to vector<16x38xf32>
    %c0_163 = arith.constant 0 : index
    %c0_164 = arith.constant 0 : index
    %118 = vector.load %arg30[%c0_163, %c0_164] : memref<64x134xf32, #tpu.memory_space<vmem>>, vector<16x38xf32>
    tpu.vector_store %arg30[%c0_163, %c0_164], %117 {strides = array<i32>} : memref<64x134xf32, #tpu.memory_space<vmem>>, vector<16x38xf32>,
    %c0_165 = arith.constant 0 : index
    %c3_166 = arith.constant 3 : index
    %119 = vector.load %arg30[%c0_165, %c3_166] : memref<64x134xf32, #tpu.memory_space<vmem>>, vector<16x32xf32>
    tpu.vector_store %arg30[%c0_165, %c3_166], %115 {strides = array<i32>} : memref<64x134xf32, #tpu.memory_space<vmem>>, vector<16x32xf32>,
    %c0_167 = arith.constant 0 : index
    %c0_168 = arith.constant 0 : index
    %120 = vector.load %arg30[%c0_167, %c0_168] : memref<64x134xf32, #tpu.memory_space<vmem>>, vector<16x32xf32>
    %c0_169 = arith.constant 0 : index
    %c1_170 = arith.constant 1 : index
    %121 = vector.load %arg30[%c0_169, %c1_170] : memref<64x134xf32, #tpu.memory_space<vmem>>, vector<16x32xf32>
    %c0_171 = arith.constant 0 : index
    %c2_172 = arith.constant 2 : index
    %122 = vector.load %arg30[%c0_171, %c2_172] : memref<64x134xf32, #tpu.memory_space<vmem>>, vector<16x32xf32>
    %c0_173 = arith.constant 0 : index
    %c3_174 = arith.constant 3 : index
    %123 = vector.load %arg30[%c0_173, %c3_174] : memref<64x134xf32, #tpu.memory_space<vmem>>, vector<16x32xf32>
    %c0_175 = arith.constant 0 : index
    %c4_176 = arith.constant 4 : index
    %124 = vector.load %arg30[%c0_175, %c4_176] : memref<64x134xf32, #tpu.memory_space<vmem>>, vector<16x32xf32>
    %c0_177 = arith.constant 0 : index
    %c5_178 = arith.constant 5 : index
    %125 = vector.load %arg30[%c0_177, %c5_178] : memref<64x134xf32, #tpu.memory_space<vmem>>, vector<16x32xf32>
    %c0_179 = arith.constant 0 : index
    %c6_180 = arith.constant 6 : index
    %126 = vector.load %arg30[%c0_179, %c6_180] : memref<64x134xf32, #tpu.memory_space<vmem>>, vector<16x32xf32>
    %127 = tpu.concatenate %120, %121, %122, %123, %124, %125, %126 in 0 : vector<16x32xf32>, vector<16x32xf32>, vector<16x32xf32>, vector<16x32xf32>, vector<16x32xf32>, vector<16x32xf32>, vector<16x32xf32> -> vector<112x32xf32>
    %128 = arith.truncf %127 : vector<112x32xf32> to vector<112x32xbf16>
    %cst_181 = arith.constant dense<0.000000e+00> : vector<32x32xf32>
    %129 = tpu.matmul %116, %128, %cst_181 {dimension_numbers = #tpu.dot_dimension_numbers<[1], [0], [0], [1], [0, 0, 1, 1], [], []>} : vector<32x112xbf16>, vector<112x32xbf16>, vector<32x32xf32> -> vector<32x32xf32>
    %cst_182 = arith.constant 0.000000e+00 : f32
    %130 = vector.broadcast %cst_182 : f32 to vector<32x32xf32>
    %131 = arith.maximumf %129, %130 : vector<32x32xf32>
    %132 = arith.truncf %131 : vector<32x32xf32> to vector<32x32xbf16>
    %c0_183 = arith.constant 0 : index
    %c0_184 = arith.constant 0 : index
    %133 = vector.load %arg23[%c0_183, %c0_184] : memref<32x16xbf16, #tpu.memory_space<vmem>>, vector<32x16xbf16>
    %cst_185 = arith.constant dense<0.000000e+00> : vector<32x16xf32>
    %134 = tpu.matmul %132, %133, %cst_185 {dimension_numbers = #tpu.dot_dimension_numbers<[1], [0], [0], [1], [0, 0, 1, 1], [], []>} : vector<32x32xbf16>, vector<32x16xbf16>, vector<32x16xf32> -> vector<32x16xf32>
    %c0_186 = arith.constant 0 : index
    %c0_187 = arith.constant 0 : index
    %135 = vector.load %arg10[%c0_186, %c0_187] : memref<32x224xbf16, #tpu.memory_space<vmem>>, vector<32x224xbf16>
    %cst_188 = arith.constant 0.000000e+00 : f32
    %136 = vector.broadcast %cst_188 : f32 to vector<32x22xf32>
    %c0_189 = arith.constant 0 : index
    %c0_190 = arith.constant 0 : index
    %137 = vector.load %arg30[%c0_189, %c0_190] : memref<64x134xf32, #tpu.memory_space<vmem>>, vector<32x22xf32>
    tpu.vector_store %arg30[%c0_189, %c0_190], %136 {strides = array<i32>} : memref<64x134xf32, #tpu.memory_space<vmem>>, vector<32x22xf32>,
    %c0_191 = arith.constant 0 : index
    %c3_192 = arith.constant 3 : index
    %138 = vector.load %arg30[%c0_191, %c3_192] : memref<64x134xf32, #tpu.memory_space<vmem>>, vector<32x16xf32>
    tpu.vector_store %arg30[%c0_191, %c3_192], %134 {strides = array<i32>} : memref<64x134xf32, #tpu.memory_space<vmem>>, vector<32x16xf32>,
    %c0_193 = arith.constant 0 : index
    %c0_194 = arith.constant 0 : index
    %139 = vector.load %arg30[%c0_193, %c0_194] : memref<64x134xf32, #tpu.memory_space<vmem>>, vector<32x16xf32>
    %c0_195 = arith.constant 0 : index
    %c1_196 = arith.constant 1 : index
    %140 = vector.load %arg30[%c0_195, %c1_196] : memref<64x134xf32, #tpu.memory_space<vmem>>, vector<32x16xf32>
    %c0_197 = arith.constant 0 : index
    %c2_198 = arith.constant 2 : index
    %141 = vector.load %arg30[%c0_197, %c2_198] : memref<64x134xf32, #tpu.memory_space<vmem>>, vector<32x16xf32>
    %c0_199 = arith.constant 0 : index
    %c3_200 = arith.constant 3 : index
    %142 = vector.load %arg30[%c0_199, %c3_200] : memref<64x134xf32, #tpu.memory_space<vmem>>, vector<32x16xf32>
    %c0_201 = arith.constant 0 : index
    %c4_202 = arith.constant 4 : index
    %143 = vector.load %arg30[%c0_201, %c4_202] : memref<64x134xf32, #tpu.memory_space<vmem>>, vector<32x16xf32>
    %c0_203 = arith.constant 0 : index
    %c5_204 = arith.constant 5 : index
    %144 = vector.load %arg30[%c0_203, %c5_204] : memref<64x134xf32, #tpu.memory_space<vmem>>, vector<32x16xf32>
    %c0_205 = arith.constant 0 : index
    %c6_206 = arith.constant 6 : index
    %145 = vector.load %arg30[%c0_205, %c6_206] : memref<64x134xf32, #tpu.memory_space<vmem>>, vector<32x16xf32>
    %146 = tpu.concatenate %139, %140, %141, %142, %143, %144, %145 in 0 : vector<32x16xf32>, vector<32x16xf32>, vector<32x16xf32>, vector<32x16xf32>, vector<32x16xf32>, vector<32x16xf32>, vector<32x16xf32> -> vector<224x16xf32>
    %147 = arith.truncf %146 : vector<224x16xf32> to vector<224x16xbf16>
    %cst_207 = arith.constant dense<0.000000e+00> : vector<32x16xf32>
    %148 = tpu.matmul %135, %147, %cst_207 {dimension_numbers = #tpu.dot_dimension_numbers<[1], [0], [0], [1], [0, 0, 1, 1], [], []>} : vector<32x224xbf16>, vector<224x16xbf16>, vector<32x16xf32> -> vector<32x16xf32>
    %cst_208 = arith.constant 0.000000e+00 : f32
    %149 = vector.broadcast %cst_208 : f32 to vector<32x16xf32>
    %150 = arith.maximumf %148, %149 : vector<32x16xf32>
    %c0_209 = arith.constant 0 : index
    %c0_210 = arith.constant 0 : index
    %151 = vector.load %arg11[%c0_209, %c0_210] : memref<32x224xbf16, #tpu.memory_space<vmem>>, vector<32x224xbf16>
    %cst_211 = arith.constant 0.000000e+00 : f32
    %152 = vector.broadcast %cst_211 : f32 to vector<32x22xf32>
    %c0_212 = arith.constant 0 : index
    %c0_213 = arith.constant 0 : index
    %153 = vector.load %arg30[%c0_212, %c0_213] : memref<64x134xf32, #tpu.memory_space<vmem>>, vector<32x22xf32>
    tpu.vector_store %arg30[%c0_212, %c0_213], %152 {strides = array<i32>} : memref<64x134xf32, #tpu.memory_space<vmem>>, vector<32x22xf32>,
    %c0_214 = arith.constant 0 : index
    %c3_215 = arith.constant 3 : index
    %154 = vector.load %arg30[%c0_214, %c3_215] : memref<64x134xf32, #tpu.memory_space<vmem>>, vector<32x16xf32>
    tpu.vector_store %arg30[%c0_214, %c3_215], %150 {strides = array<i32>} : memref<64x134xf32, #tpu.memory_space<vmem>>, vector<32x16xf32>,
    %c0_216 = arith.constant 0 : index
    %c0_217 = arith.constant 0 : index
    %155 = vector.load %arg30[%c0_216, %c0_217] : memref<64x134xf32, #tpu.memory_space<vmem>>, vector<32x16xf32>
    %c0_218 = arith.constant 0 : index
    %c1_219 = arith.constant 1 : index
    %156 = vector.load %arg30[%c0_218, %c1_219] : memref<64x134xf32, #tpu.memory_space<vmem>>, vector<32x16xf32>
    %c0_220 = arith.constant 0 : index
    %c2_221 = arith.constant 2 : index
    %157 = vector.load %arg30[%c0_220, %c2_221] : memref<64x134xf32, #tpu.memory_space<vmem>>, vector<32x16xf32>
    %c0_222 = arith.constant 0 : index
    %c3_223 = arith.constant 3 : index
    %158 = vector.load %arg30[%c0_222, %c3_223] : memref<64x134xf32, #tpu.memory_space<vmem>>, vector<32x16xf32>
    %c0_224 = arith.constant 0 : index
    %c4_225 = arith.constant 4 : index
    %159 = vector.load %arg30[%c0_224, %c4_225] : memref<64x134xf32, #tpu.memory_space<vmem>>, vector<32x16xf32>
    %c0_226 = arith.constant 0 : index
    %c5_227 = arith.constant 5 : index
    %160 = vector.load %arg30[%c0_226, %c5_227] : memref<64x134xf32, #tpu.memory_space<vmem>>, vector<32x16xf32>
    %c0_228 = arith.constant 0 : index
    %c6_229 = arith.constant 6 : index
    %161 = vector.load %arg30[%c0_228, %c6_229] : memref<64x134xf32, #tpu.memory_space<vmem>>, vector<32x16xf32>
    %162 = tpu.concatenate %155, %156, %157, %158, %159, %160, %161 in 0 : vector<32x16xf32>, vector<32x16xf32>, vector<32x16xf32>, vector<32x16xf32>, vector<32x16xf32>, vector<32x16xf32>, vector<32x16xf32> -> vector<224x16xf32>
    %163 = arith.truncf %162 : vector<224x16xf32> to vector<224x16xbf16>
    %cst_230 = arith.constant dense<0.000000e+00> : vector<32x16xf32>
    %164 = tpu.matmul %151, %163, %cst_230 {dimension_numbers = #tpu.dot_dimension_numbers<[1], [0], [0], [1], [0, 0, 1, 1], [], []>} : vector<32x224xbf16>, vector<224x16xbf16>, vector<32x16xf32> -> vector<32x16xf32>
    %cst_231 = arith.constant 0.000000e+00 : f32
    %165 = vector.broadcast %cst_231 : f32 to vector<32x16xf32>
    %166 = arith.maximumf %164, %165 : vector<32x16xf32>
    %167 = arith.truncf %166 : vector<32x16xf32> to vector<32x16xbf16>
    %c0_232 = arith.constant 0 : index
    %c0_233 = arith.constant 0 : index
    %168 = vector.load %arg24[%c0_232, %c0_233] : memref<16x8xbf16, #tpu.memory_space<vmem>>, vector<16x8xbf16>
    %cst_234 = arith.constant dense<0.000000e+00> : vector<32x8xf32>
    %169 = tpu.matmul %167, %168, %cst_234 {dimension_numbers = #tpu.dot_dimension_numbers<[1], [0], [0], [1], [0, 0, 1, 1], [], []>} : vector<32x16xbf16>, vector<16x8xbf16>, vector<32x8xf32> -> vector<32x8xf32>
    %170 = arith.truncf %169 : vector<32x8xf32> to vector<32x8xbf16>
    %c0_235 = arith.constant 0 : index
    %c0_236 = arith.constant 0 : index
    %171 = vector.load %arg25[%c0_235, %c0_236] : memref<8x22xbf16, #tpu.memory_space<vmem>>, vector<8x22xbf16>
    %cst_237 = arith.constant dense<0.000000e+00> : vector<32x22xf32>
    %172 = tpu.matmul %170, %171, %cst_237 {dimension_numbers = #tpu.dot_dimension_numbers<[1], [0], [0], [1], [0, 0, 1, 1], [], []>} : vector<32x8xbf16>, vector<8x22xbf16>, vector<32x22xf32> -> vector<32x22xf32>
    %c0_238 = arith.constant 0 : index
    %c0_239 = arith.constant 0 : index
    %173 = vector.load %arg12[%c0_238, %c0_239] : memref<32x224xbf16, #tpu.memory_space<vmem>>, vector<32x224xbf16>
    %c0_240 = arith.constant 0 : index
    %c0_241 = arith.constant 0 : index
    %174 = vector.load %arg30[%c0_240, %c0_241] : memref<64x134xf32, #tpu.memory_space<vmem>>, vector<32x22xf32>
    tpu.vector_store %arg30[%c0_240, %c0_241], %172 {strides = array<i32>} : memref<64x134xf32, #tpu.memory_space<vmem>>, vector<32x22xf32>,
    %c0_242 = arith.constant 0 : index
    %c0_243 = arith.constant 0 : index
    %175 = vector.load %arg30[%c0_242, %c0_243] : memref<64x134xf32, #tpu.memory_space<vmem>>, vector<32x16xf32>
    %c0_244 = arith.constant 0 : index
    %c1_245 = arith.constant 1 : index
    %176 = vector.load %arg30[%c0_244, %c1_245] : memref<64x134xf32, #tpu.memory_space<vmem>>, vector<32x16xf32>
    %c0_246 = arith.constant 0 : index
    %c2_247 = arith.constant 2 : index
    %177 = vector.load %arg30[%c0_246, %c2_247] : memref<64x134xf32, #tpu.memory_space<vmem>>, vector<32x16xf32>
    %c0_248 = arith.constant 0 : index
    %c3_249 = arith.constant 3 : index
    %178 = vector.load %arg30[%c0_248, %c3_249] : memref<64x134xf32, #tpu.memory_space<vmem>>, vector<32x16xf32>
    %c0_250 = arith.constant 0 : index
    %c4_251 = arith.constant 4 : index
    %179 = vector.load %arg30[%c0_250, %c4_251] : memref<64x134xf32, #tpu.memory_space<vmem>>, vector<32x16xf32>
    %c0_252 = arith.constant 0 : index
    %c5_253 = arith.constant 5 : index
    %180 = vector.load %arg30[%c0_252, %c5_253] : memref<64x134xf32, #tpu.memory_space<vmem>>, vector<32x16xf32>
    %c0_254 = arith.constant 0 : index
    %c6_255 = arith.constant 6 : index
    %181 = vector.load %arg30[%c0_254, %c6_255] : memref<64x134xf32, #tpu.memory_space<vmem>>, vector<32x16xf32>
    %182 = tpu.concatenate %175, %176, %177, %178, %179, %180, %181 in 0 : vector<32x16xf32>, vector<32x16xf32>, vector<32x16xf32>, vector<32x16xf32>, vector<32x16xf32>, vector<32x16xf32>, vector<32x16xf32> -> vector<224x16xf32>
    %183 = arith.truncf %182 : vector<224x16xf32> to vector<224x16xbf16>
    %cst_256 = arith.constant dense<0.000000e+00> : vector<32x16xf32>
    %184 = tpu.matmul %173, %183, %cst_256 {dimension_numbers = #tpu.dot_dimension_numbers<[1], [0], [0], [1], [0, 0, 1, 1], [], []>} : vector<32x224xbf16>, vector<224x16xbf16>, vector<32x16xf32> -> vector<32x16xf32>
    %cst_257 = arith.constant 0.000000e+00 : f32
    %185 = vector.broadcast %cst_257 : f32 to vector<32x16xf32>
    %186 = arith.maximumf %184, %185 : vector<32x16xf32>
    %c0_258 = arith.constant 0 : index
    %c0_259 = arith.constant 0 : index
    %187 = vector.load %arg13[%c0_258, %c0_259] : memref<32x448xbf16, #tpu.memory_space<vmem>>, vector<32x448xbf16>
    %cst_260 = arith.constant 0.000000e+00 : f32
    %188 = vector.broadcast %cst_260 : f32 to vector<64x22xf32>
    %c0_261 = arith.constant 0 : index
    %c0_262 = arith.constant 0 : index
    %189 = vector.load %arg30[%c0_261, %c0_262] : memref<64x134xf32, #tpu.memory_space<vmem>>, vector<64x22xf32>
    tpu.vector_store %arg30[%c0_261, %c0_262], %188 {strides = array<i32>} : memref<64x134xf32, #tpu.memory_space<vmem>>, vector<64x22xf32>,
    %c0_263 = arith.constant 0 : index
    %c3_264 = arith.constant 3 : index
    %190 = vector.load %arg30[%c0_263, %c3_264] : memref<64x134xf32, #tpu.memory_space<vmem>>, vector<32x16xf32>
    tpu.vector_store %arg30[%c0_263, %c3_264], %186 {strides = array<i32>} : memref<64x134xf32, #tpu.memory_space<vmem>>, vector<32x16xf32>,
    %c32 = arith.constant 32 : index
    %c3_265 = arith.constant 3 : index
    %191 = vector.load %arg30[%c32, %c3_265] : memref<64x134xf32, #tpu.memory_space<vmem>>, vector<32x16xf32>
    tpu.vector_store %arg30[%c32, %c3_265], %134 {strides = array<i32>} : memref<64x134xf32, #tpu.memory_space<vmem>>, vector<32x16xf32>,
    %c0_266 = arith.constant 0 : index
    %c0_267 = arith.constant 0 : index
    %192 = vector.load %arg30[%c0_266, %c0_267] : memref<64x134xf32, #tpu.memory_space<vmem>>, vector<64x16xf32>
    %c0_268 = arith.constant 0 : index
    %c1_269 = arith.constant 1 : index
    %193 = vector.load %arg30[%c0_268, %c1_269] : memref<64x134xf32, #tpu.memory_space<vmem>>, vector<64x16xf32>
    %c0_270 = arith.constant 0 : index
    %c2_271 = arith.constant 2 : index
    %194 = vector.load %arg30[%c0_270, %c2_271] : memref<64x134xf32, #tpu.memory_space<vmem>>, vector<64x16xf32>
    %c0_272 = arith.constant 0 : index
    %c3_273 = arith.constant 3 : index
    %195 = vector.load %arg30[%c0_272, %c3_273] : memref<64x134xf32, #tpu.memory_space<vmem>>, vector<64x16xf32>
    %c0_274 = arith.constant 0 : index
    %c4_275 = arith.constant 4 : index
    %196 = vector.load %arg30[%c0_274, %c4_275] : memref<64x134xf32, #tpu.memory_space<vmem>>, vector<64x16xf32>
    %c0_276 = arith.constant 0 : index
    %c5_277 = arith.constant 5 : index
    %197 = vector.load %arg30[%c0_276, %c5_277] : memref<64x134xf32, #tpu.memory_space<vmem>>, vector<64x16xf32>
    %c0_278 = arith.constant 0 : index
    %c6_279 = arith.constant 6 : index
    %198 = vector.load %arg30[%c0_278, %c6_279] : memref<64x134xf32, #tpu.memory_space<vmem>>, vector<64x16xf32>
    %199 = tpu.concatenate %192, %193, %194, %195, %196, %197, %198 in 0 : vector<64x16xf32>, vector<64x16xf32>, vector<64x16xf32>, vector<64x16xf32>, vector<64x16xf32>, vector<64x16xf32>, vector<64x16xf32> -> vector<448x16xf32>
    %200 = arith.truncf %199 : vector<448x16xf32> to vector<448x16xbf16>
    %cst_280 = arith.constant dense<0.000000e+00> : vector<32x16xf32>
    %201 = tpu.matmul %187, %200, %cst_280 {dimension_numbers = #tpu.dot_dimension_numbers<[1], [0], [0], [1], [0, 0, 1, 1], [], []>} : vector<32x448xbf16>, vector<448x16xbf16>, vector<32x16xf32> -> vector<32x16xf32>
    %cst_281 = arith.constant 0.000000e+00 : f32
    %202 = vector.broadcast %cst_281 : f32 to vector<32x16xf32>
    %203 = arith.maximumf %201, %202 : vector<32x16xf32>
    %204 = arith.truncf %203 : vector<32x16xf32> to vector<32x16xbf16>
    %c0_282 = arith.constant 0 : index
    %c0_283 = arith.constant 0 : index
    %205 = vector.load %arg26[%c0_282, %c0_283] : memref<16x38xbf16, #tpu.memory_space<vmem>>, vector<16x38xbf16>
    %cst_284 = arith.constant dense<0.000000e+00> : vector<32x38xf32>
    %206 = tpu.matmul %204, %205, %cst_284 {dimension_numbers = #tpu.dot_dimension_numbers<[1], [0], [0], [1], [0, 0, 1, 1], [], []>} : vector<32x16xbf16>, vector<16x38xbf16>, vector<32x38xf32> -> vector<32x38xf32>
    %c0_285 = arith.constant 0 : index
    %c0_286 = arith.constant 0 : index
    %207 = vector.load %arg14[%c0_285, %c0_286] : memref<16x224xbf16, #tpu.memory_space<vmem>>, vector<16x224xbf16>
    %c0_287 = arith.constant 0 : index
    %c0_288 = arith.constant 0 : index
    %208 = vector.load %arg30[%c0_287, %c0_288] : memref<64x134xf32, #tpu.memory_space<vmem>>, vector<32x38xf32>
    tpu.vector_store %arg30[%c0_287, %c0_288], %206 {strides = array<i32>} : memref<64x134xf32, #tpu.memory_space<vmem>>, vector<32x38xf32>,
    %c0_289 = arith.constant 0 : index
    %c0_290 = arith.constant 0 : index
    %209 = vector.load %arg30[%c0_289, %c0_290] : memref<64x134xf32, #tpu.memory_space<vmem>>, vector<32x32xf32>
    %c0_291 = arith.constant 0 : index
    %c1_292 = arith.constant 1 : index
    %210 = vector.load %arg30[%c0_291, %c1_292] : memref<64x134xf32, #tpu.memory_space<vmem>>, vector<32x32xf32>
    %c0_293 = arith.constant 0 : index
    %c2_294 = arith.constant 2 : index
    %211 = vector.load %arg30[%c0_293, %c2_294] : memref<64x134xf32, #tpu.memory_space<vmem>>, vector<32x32xf32>
    %c0_295 = arith.constant 0 : index
    %c3_296 = arith.constant 3 : index
    %212 = vector.load %arg30[%c0_295, %c3_296] : memref<64x134xf32, #tpu.memory_space<vmem>>, vector<32x32xf32>
    %c0_297 = arith.constant 0 : index
    %c4_298 = arith.constant 4 : index
    %213 = vector.load %arg30[%c0_297, %c4_298] : memref<64x134xf32, #tpu.memory_space<vmem>>, vector<32x32xf32>
    %c0_299 = arith.constant 0 : index
    %c5_300 = arith.constant 5 : index
    %214 = vector.load %arg30[%c0_299, %c5_300] : memref<64x134xf32, #tpu.memory_space<vmem>>, vector<32x32xf32>
    %c0_301 = arith.constant 0 : index
    %c6_302 = arith.constant 6 : index
    %215 = vector.load %arg30[%c0_301, %c6_302] : memref<64x134xf32, #tpu.memory_space<vmem>>, vector<32x32xf32>
    %216 = tpu.concatenate %209, %210, %211, %212, %213, %214, %215 in 0 : vector<32x32xf32>, vector<32x32xf32>, vector<32x32xf32>, vector<32x32xf32>, vector<32x32xf32>, vector<32x32xf32>, vector<32x32xf32> -> vector<224x32xf32>
    %217 = arith.truncf %216 : vector<224x32xf32> to vector<224x32xbf16>
    %cst_303 = arith.constant dense<0.000000e+00> : vector<16x32xf32>
    %218 = tpu.matmul %207, %217, %cst_303 {dimension_numbers = #tpu.dot_dimension_numbers<[1], [0], [0], [1], [0, 0, 1, 1], [], []>} : vector<16x224xbf16>, vector<224x32xbf16>, vector<16x32xf32> -> vector<16x32xf32>
    %cst_304 = arith.constant 0.000000e+00 : f32
    %219 = vector.broadcast %cst_304 : f32 to vector<16x32xf32>
    %220 = arith.maximumf %218, %219 : vector<16x32xf32>
    %c0_305 = arith.constant 0 : index
    %c0_306 = arith.constant 0 : index
    %221 = vector.load %arg15[%c0_305, %c0_306] : memref<16x224xbf16, #tpu.memory_space<vmem>>, vector<16x224xbf16>
    %cst_307 = arith.constant 0.000000e+00 : f32
    %222 = vector.broadcast %cst_307 : f32 to vector<32x38xf32>
    %c0_308 = arith.constant 0 : index
    %c0_309 = arith.constant 0 : index
    %223 = vector.load %arg30[%c0_308, %c0_309] : memref<64x134xf32, #tpu.memory_space<vmem>>, vector<32x38xf32>
    tpu.vector_store %arg30[%c0_308, %c0_309], %222 {strides = array<i32>} : memref<64x134xf32, #tpu.memory_space<vmem>>, vector<32x38xf32>,
    %c0_310 = arith.constant 0 : index
    %c3_311 = arith.constant 3 : index
    %224 = vector.load %arg30[%c0_310, %c3_311] : memref<64x134xf32, #tpu.memory_space<vmem>>, vector<16x32xf32>
    tpu.vector_store %arg30[%c0_310, %c3_311], %220 {strides = array<i32>} : memref<64x134xf32, #tpu.memory_space<vmem>>, vector<16x32xf32>,
    %c16 = arith.constant 16 : index
    %c3_312 = arith.constant 3 : index
    %225 = vector.load %arg30[%c16, %c3_312] : memref<64x134xf32, #tpu.memory_space<vmem>>, vector<16x32xf32>
    tpu.vector_store %arg30[%c16, %c3_312], %99 {strides = array<i32>} : memref<64x134xf32, #tpu.memory_space<vmem>>, vector<16x32xf32>,
    %c0_313 = arith.constant 0 : index
    %c0_314 = arith.constant 0 : index
    %226 = vector.load %arg30[%c0_313, %c0_314] : memref<64x134xf32, #tpu.memory_space<vmem>>, vector<32x32xf32>
    %c0_315 = arith.constant 0 : index
    %c1_316 = arith.constant 1 : index
    %227 = vector.load %arg30[%c0_315, %c1_316] : memref<64x134xf32, #tpu.memory_space<vmem>>, vector<32x32xf32>
    %c0_317 = arith.constant 0 : index
    %c2_318 = arith.constant 2 : index
    %228 = vector.load %arg30[%c0_317, %c2_318] : memref<64x134xf32, #tpu.memory_space<vmem>>, vector<32x32xf32>
    %c0_319 = arith.constant 0 : index
    %c3_320 = arith.constant 3 : index
    %229 = vector.load %arg30[%c0_319, %c3_320] : memref<64x134xf32, #tpu.memory_space<vmem>>, vector<32x32xf32>
    %c0_321 = arith.constant 0 : index
    %c4_322 = arith.constant 4 : index
    %230 = vector.load %arg30[%c0_321, %c4_322] : memref<64x134xf32, #tpu.memory_space<vmem>>, vector<32x32xf32>
    %c0_323 = arith.constant 0 : index
    %c5_324 = arith.constant 5 : index
    %231 = vector.load %arg30[%c0_323, %c5_324] : memref<64x134xf32, #tpu.memory_space<vmem>>, vector<32x32xf32>
    %c0_325 = arith.constant 0 : index
    %c6_326 = arith.constant 6 : index
    %232 = vector.load %arg30[%c0_325, %c6_326] : memref<64x134xf32, #tpu.memory_space<vmem>>, vector<32x32xf32>
    %233 = tpu.concatenate %226, %227, %228, %229, %230, %231, %232 in 0 : vector<32x32xf32>, vector<32x32xf32>, vector<32x32xf32>, vector<32x32xf32>, vector<32x32xf32>, vector<32x32xf32>, vector<32x32xf32> -> vector<224x32xf32>
    %234 = arith.truncf %233 : vector<224x32xf32> to vector<224x32xbf16>
    %cst_327 = arith.constant dense<0.000000e+00> : vector<16x32xf32>
    %235 = tpu.matmul %221, %234, %cst_327 {dimension_numbers = #tpu.dot_dimension_numbers<[1], [0], [0], [1], [0, 0, 1, 1], [], []>} : vector<16x224xbf16>, vector<224x32xbf16>, vector<16x32xf32> -> vector<16x32xf32>
    %cst_328 = arith.constant 0.000000e+00 : f32
    %236 = vector.broadcast %cst_328 : f32 to vector<16x32xf32>
    %237 = arith.maximumf %235, %236 : vector<16x32xf32>
    %238 = arith.truncf %237 : vector<16x32xf32> to vector<16x32xbf16>
    %c0_329 = arith.constant 0 : index
    %c0_330 = arith.constant 0 : index
    %239 = vector.load %arg27[%c0_329, %c0_330] : memref<32x70xbf16, #tpu.memory_space<vmem>>, vector<32x70xbf16>
    %cst_331 = arith.constant dense<0.000000e+00> : vector<16x70xf32>
    %240 = tpu.matmul %238, %239, %cst_331 {dimension_numbers = #tpu.dot_dimension_numbers<[1], [0], [0], [1], [0, 0, 1, 1], [], []>} : vector<16x32xbf16>, vector<32x70xbf16>, vector<16x70xf32> -> vector<16x70xf32>
    %c0_332 = arith.constant 0 : index
    %c0_333 = arith.constant 0 : index
    %241 = vector.load %arg16[%c0_332, %c0_333] : memref<16x112xbf16, #tpu.memory_space<vmem>>, vector<16x112xbf16>
    %c0_334 = arith.constant 0 : index
    %c0_335 = arith.constant 0 : index
    %242 = vector.load %arg30[%c0_334, %c0_335] : memref<64x134xf32, #tpu.memory_space<vmem>>, vector<16x70xf32>
    tpu.vector_store %arg30[%c0_334, %c0_335], %240 {strides = array<i32>} : memref<64x134xf32, #tpu.memory_space<vmem>>, vector<16x70xf32>,
    %c0_336 = arith.constant 0 : index
    %c0_337 = arith.constant 0 : index
    %243 = vector.load %arg30[%c0_336, %c0_337] : memref<64x134xf32, #tpu.memory_space<vmem>>, vector<16x64xf32>
    %c0_338 = arith.constant 0 : index
    %c1_339 = arith.constant 1 : index
    %244 = vector.load %arg30[%c0_338, %c1_339] : memref<64x134xf32, #tpu.memory_space<vmem>>, vector<16x64xf32>
    %c0_340 = arith.constant 0 : index
    %c2_341 = arith.constant 2 : index
    %245 = vector.load %arg30[%c0_340, %c2_341] : memref<64x134xf32, #tpu.memory_space<vmem>>, vector<16x64xf32>
    %c0_342 = arith.constant 0 : index
    %c3_343 = arith.constant 3 : index
    %246 = vector.load %arg30[%c0_342, %c3_343] : memref<64x134xf32, #tpu.memory_space<vmem>>, vector<16x64xf32>
    %c0_344 = arith.constant 0 : index
    %c4_345 = arith.constant 4 : index
    %247 = vector.load %arg30[%c0_344, %c4_345] : memref<64x134xf32, #tpu.memory_space<vmem>>, vector<16x64xf32>
    %c0_346 = arith.constant 0 : index
    %c5_347 = arith.constant 5 : index
    %248 = vector.load %arg30[%c0_346, %c5_347] : memref<64x134xf32, #tpu.memory_space<vmem>>, vector<16x64xf32>
    %c0_348 = arith.constant 0 : index
    %c6_349 = arith.constant 6 : index
    %249 = vector.load %arg30[%c0_348, %c6_349] : memref<64x134xf32, #tpu.memory_space<vmem>>, vector<16x64xf32>
    %250 = tpu.concatenate %243, %244, %245, %246, %247, %248, %249 in 0 : vector<16x64xf32>, vector<16x64xf32>, vector<16x64xf32>, vector<16x64xf32>, vector<16x64xf32>, vector<16x64xf32>, vector<16x64xf32> -> vector<112x64xf32>
    %251 = arith.truncf %250 : vector<112x64xf32> to vector<112x64xbf16>
    %cst_350 = arith.constant dense<0.000000e+00> : vector<16x64xf32>
    %252 = tpu.matmul %241, %251, %cst_350 {dimension_numbers = #tpu.dot_dimension_numbers<[1], [0], [0], [1], [0, 0, 1, 1], [], []>} : vector<16x112xbf16>, vector<112x64xbf16>, vector<16x64xf32> -> vector<16x64xf32>
    %cst_351 = arith.constant 0.000000e+00 : f32
    %253 = vector.broadcast %cst_351 : f32 to vector<16x64xf32>
    %254 = arith.maximumf %252, %253 : vector<16x64xf32>
    %c0_352 = arith.constant 0 : index
    %c0_353 = arith.constant 0 : index
    %255 = vector.load %arg17[%c0_352, %c0_353] : memref<16x224xbf16, #tpu.memory_space<vmem>>, vector<16x224xbf16>
    %cst_354 = arith.constant 0.000000e+00 : f32
    %256 = vector.broadcast %cst_354 : f32 to vector<32x70xf32>
    %c0_355 = arith.constant 0 : index
    %c0_356 = arith.constant 0 : index
    %257 = vector.load %arg30[%c0_355, %c0_356] : memref<64x134xf32, #tpu.memory_space<vmem>>, vector<32x70xf32>
    tpu.vector_store %arg30[%c0_355, %c0_356], %256 {strides = array<i32>} : memref<64x134xf32, #tpu.memory_space<vmem>>, vector<32x70xf32>,
    %c0_357 = arith.constant 0 : index
    %c3_358 = arith.constant 3 : index
    %258 = vector.load %arg30[%c0_357, %c3_358] : memref<64x134xf32, #tpu.memory_space<vmem>>, vector<16x64xf32>
    tpu.vector_store %arg30[%c0_357, %c3_358], %254 {strides = array<i32>} : memref<64x134xf32, #tpu.memory_space<vmem>>, vector<16x64xf32>,
    %c16_359 = arith.constant 16 : index
    %c3_360 = arith.constant 3 : index
    %259 = vector.load %arg30[%c16_359, %c3_360] : memref<64x134xf32, #tpu.memory_space<vmem>>, vector<16x64xf32>
    tpu.vector_store %arg30[%c16_359, %c3_360], %64 {strides = array<i32>} : memref<64x134xf32, #tpu.memory_space<vmem>>, vector<16x64xf32>,
    %c0_361 = arith.constant 0 : index
    %c0_362 = arith.constant 0 : index
    %260 = vector.load %arg30[%c0_361, %c0_362] : memref<64x134xf32, #tpu.memory_space<vmem>>, vector<32x64xf32>
    %c0_363 = arith.constant 0 : index
    %c1_364 = arith.constant 1 : index
    %261 = vector.load %arg30[%c0_363, %c1_364] : memref<64x134xf32, #tpu.memory_space<vmem>>, vector<32x64xf32>
    %c0_365 = arith.constant 0 : index
    %c2_366 = arith.constant 2 : index
    %262 = vector.load %arg30[%c0_365, %c2_366] : memref<64x134xf32, #tpu.memory_space<vmem>>, vector<32x64xf32>
    %c0_367 = arith.constant 0 : index
    %c3_368 = arith.constant 3 : index
    %263 = vector.load %arg30[%c0_367, %c3_368] : memref<64x134xf32, #tpu.memory_space<vmem>>, vector<32x64xf32>
    %c0_369 = arith.constant 0 : index
    %c4_370 = arith.constant 4 : index
    %264 = vector.load %arg30[%c0_369, %c4_370] : memref<64x134xf32, #tpu.memory_space<vmem>>, vector<32x64xf32>
    %c0_371 = arith.constant 0 : index
    %c5_372 = arith.constant 5 : index
    %265 = vector.load %arg30[%c0_371, %c5_372] : memref<64x134xf32, #tpu.memory_space<vmem>>, vector<32x64xf32>
    %c0_373 = arith.constant 0 : index
    %c6_374 = arith.constant 6 : index
    %266 = vector.load %arg30[%c0_373, %c6_374] : memref<64x134xf32, #tpu.memory_space<vmem>>, vector<32x64xf32>
    %267 = tpu.concatenate %260, %261, %262, %263, %264, %265, %266 in 0 : vector<32x64xf32>, vector<32x64xf32>, vector<32x64xf32>, vector<32x64xf32>, vector<32x64xf32>, vector<32x64xf32>, vector<32x64xf32> -> vector<224x64xf32>
    %268 = arith.truncf %267 : vector<224x64xf32> to vector<224x64xbf16>
    %cst_375 = arith.constant dense<0.000000e+00> : vector<16x64xf32>
    %269 = tpu.matmul %255, %268, %cst_375 {dimension_numbers = #tpu.dot_dimension_numbers<[1], [0], [0], [1], [0, 0, 1, 1], [], []>} : vector<16x224xbf16>, vector<224x64xbf16>, vector<16x64xf32> -> vector<16x64xf32>
    %cst_376 = arith.constant 0.000000e+00 : f32
    %270 = vector.broadcast %cst_376 : f32 to vector<16x64xf32>
    %271 = arith.maximumf %269, %270 : vector<16x64xf32>
    %272 = arith.truncf %271 : vector<16x64xf32> to vector<16x64xbf16>
    %c0_377 = arith.constant 0 : index
    %c0_378 = arith.constant 0 : index
    %273 = vector.load %arg28[%c0_377, %c0_378] : memref<64x134xbf16, #tpu.memory_space<vmem>>, vector<64x134xbf16>
    %cst_379 = arith.constant dense<0.000000e+00> : vector<16x134xf32>
    %274 = tpu.matmul %272, %273, %cst_379 {dimension_numbers = #tpu.dot_dimension_numbers<[1], [0], [0], [1], [0, 0, 1, 1], [], []>} : vector<16x64xbf16>, vector<64x134xbf16>, vector<16x134xf32> -> vector<16x134xf32>
    %c0_380 = arith.constant 0 : index
    %c0_381 = arith.constant 0 : index
    %275 = vector.load %arg18[%c0_380, %c0_381] : memref<8x112xbf16, #tpu.memory_space<vmem>>, vector<8x112xbf16>
    %c0_382 = arith.constant 0 : index
    %c0_383 = arith.constant 0 : index
    %276 = vector.load %arg30[%c0_382, %c0_383] : memref<64x134xf32, #tpu.memory_space<vmem>>, vector<16x134xf32>
    tpu.vector_store %arg30[%c0_382, %c0_383], %274 {strides = array<i32>} : memref<64x134xf32, #tpu.memory_space<vmem>>, vector<16x134xf32>,
    %c0_384 = arith.constant 0 : index
    %c0_385 = arith.constant 0 : index
    %277 = vector.load %arg30[%c0_384, %c0_385] : memref<64x134xf32, #tpu.memory_space<vmem>>, vector<16x128xf32>
    %c0_386 = arith.constant 0 : index
    %c1_387 = arith.constant 1 : index
    %278 = vector.load %arg30[%c0_386, %c1_387] : memref<64x134xf32, #tpu.memory_space<vmem>>, vector<16x128xf32>
    %c0_388 = arith.constant 0 : index
    %c2_389 = arith.constant 2 : index
    %279 = vector.load %arg30[%c0_388, %c2_389] : memref<64x134xf32, #tpu.memory_space<vmem>>, vector<16x128xf32>
    %c0_390 = arith.constant 0 : index
    %c3_391 = arith.constant 3 : index
    %280 = vector.load %arg30[%c0_390, %c3_391] : memref<64x134xf32, #tpu.memory_space<vmem>>, vector<16x128xf32>
    %c0_392 = arith.constant 0 : index
    %c4_393 = arith.constant 4 : index
    %281 = vector.load %arg30[%c0_392, %c4_393] : memref<64x134xf32, #tpu.memory_space<vmem>>, vector<16x128xf32>
    %c0_394 = arith.constant 0 : index
    %c5_395 = arith.constant 5 : index
    %282 = vector.load %arg30[%c0_394, %c5_395] : memref<64x134xf32, #tpu.memory_space<vmem>>, vector<16x128xf32>
    %c0_396 = arith.constant 0 : index
    %c6_397 = arith.constant 6 : index
    %283 = vector.load %arg30[%c0_396, %c6_397] : memref<64x134xf32, #tpu.memory_space<vmem>>, vector<16x128xf32>
    %284 = tpu.concatenate %277, %278, %279, %280, %281, %282, %283 in 0 : vector<16x128xf32>, vector<16x128xf32>, vector<16x128xf32>, vector<16x128xf32>, vector<16x128xf32>, vector<16x128xf32>, vector<16x128xf32> -> vector<112x128xf32>
    %285 = arith.truncf %284 : vector<112x128xf32> to vector<112x128xbf16>
    %cst_398 = arith.constant dense<0.000000e+00> : vector<8x128xf32>
    %286 = tpu.matmul %275, %285, %cst_398 {dimension_numbers = #tpu.dot_dimension_numbers<[1], [0], [0], [1], [0, 0, 1, 1], [], []>} : vector<8x112xbf16>, vector<112x128xbf16>, vector<8x128xf32> -> vector<8x128xf32>
    %cst_399 = arith.constant 0.000000e+00 : f32
    %287 = vector.broadcast %cst_399 : f32 to vector<8x128xf32>
    %288 = arith.maximumf %286, %287 : vector<8x128xf32>
    %c0_400 = arith.constant 0 : index
    %c0_401 = arith.constant 0 : index
    %289 = vector.load %arg19[%c0_400, %c0_401] : memref<8x112xbf16, #tpu.memory_space<vmem>>, vector<8x112xbf16>
    %cst_402 = arith.constant 0.000000e+00 : f32
    %290 = vector.broadcast %cst_402 : f32 to vector<16x134xf32>
    %c0_403 = arith.constant 0 : index
    %c0_404 = arith.constant 0 : index
    %291 = vector.load %arg30[%c0_403, %c0_404] : memref<64x134xf32, #tpu.memory_space<vmem>>, vector<16x134xf32>
    tpu.vector_store %arg30[%c0_403, %c0_404], %290 {strides = array<i32>} : memref<64x134xf32, #tpu.memory_space<vmem>>, vector<16x134xf32>,
    %c0_405 = arith.constant 0 : index
    %c3_406 = arith.constant 3 : index
    %292 = vector.load %arg30[%c0_405, %c3_406] : memref<64x134xf32, #tpu.memory_space<vmem>>, vector<8x128xf32>
    tpu.vector_store %arg30[%c0_405, %c3_406], %288 {strides = array<i32>} : memref<64x134xf32, #tpu.memory_space<vmem>>, vector<8x128xf32>,
    %c8 = arith.constant 8 : index
    %c3_407 = arith.constant 3 : index
    %293 = vector.load %arg30[%c8, %c3_407] : memref<64x134xf32, #tpu.memory_space<vmem>>, vector<8x128xf32>
    tpu.vector_store %arg30[%c8, %c3_407], %29 {strides = array<i32>} : memref<64x134xf32, #tpu.memory_space<vmem>>, vector<8x128xf32>,
    %c0_408 = arith.constant 0 : index
    %c0_409 = arith.constant 0 : index
    %294 = vector.load %arg30[%c0_408, %c0_409] : memref<64x134xf32, #tpu.memory_space<vmem>>, vector<16x128xf32>
    %c0_410 = arith.constant 0 : index
    %c1_411 = arith.constant 1 : index
    %295 = vector.load %arg30[%c0_410, %c1_411] : memref<64x134xf32, #tpu.memory_space<vmem>>, vector<16x128xf32>
    %c0_412 = arith.constant 0 : index
    %c2_413 = arith.constant 2 : index
    %296 = vector.load %arg30[%c0_412, %c2_413] : memref<64x134xf32, #tpu.memory_space<vmem>>, vector<16x128xf32>
    %c0_414 = arith.constant 0 : index
    %c3_415 = arith.constant 3 : index
    %297 = vector.load %arg30[%c0_414, %c3_415] : memref<64x134xf32, #tpu.memory_space<vmem>>, vector<16x128xf32>
    %c0_416 = arith.constant 0 : index
    %c4_417 = arith.constant 4 : index
    %298 = vector.load %arg30[%c0_416, %c4_417] : memref<64x134xf32, #tpu.memory_space<vmem>>, vector<16x128xf32>
    %c0_418 = arith.constant 0 : index
    %c5_419 = arith.constant 5 : index
    %299 = vector.load %arg30[%c0_418, %c5_419] : memref<64x134xf32, #tpu.memory_space<vmem>>, vector<16x128xf32>
    %c0_420 = arith.constant 0 : index
    %c6_421 = arith.constant 6 : index
    %300 = vector.load %arg30[%c0_420, %c6_421] : memref<64x134xf32, #tpu.memory_space<vmem>>, vector<16x128xf32>
    %301 = tpu.concatenate %294, %295, %296, %297, %298, %299, %300 in 0 : vector<16x128xf32>, vector<16x128xf32>, vector<16x128xf32>, vector<16x128xf32>, vector<16x128xf32>, vector<16x128xf32>, vector<16x128xf32> -> vector<112x128xf32>
    %302 = arith.truncf %301 : vector<112x128xf32> to vector<112x128xbf16>
    %cst_422 = arith.constant dense<0.000000e+00> : vector<8x128xf32>
    %303 = tpu.matmul %289, %302, %cst_422 {dimension_numbers = #tpu.dot_dimension_numbers<[1], [0], [0], [1], [0, 0, 1, 1], [], []>} : vector<8x112xbf16>, vector<112x128xbf16>, vector<8x128xf32> -> vector<8x128xf32>
    %cst_423 = arith.constant 0.000000e+00 : f32
    %304 = vector.broadcast %cst_423 : f32 to vector<8x128xf32>
    %305 = arith.maximumf %303, %304 : vector<8x128xf32>
    %c0_424 = arith.constant 0 : index
    %c0_425 = arith.constant 0 : index
    %306 = vector.load %arg20[%c0_424, %c0_425] : memref<8x56xbf16, #tpu.memory_space<vmem>>, vector<8x56xbf16>
    %cst_426 = arith.constant 0.000000e+00 : f32
    %307 = vector.broadcast %cst_426 : f32 to vector<8x134xf32>
    %c0_427 = arith.constant 0 : index
    %c0_428 = arith.constant 0 : index
    %308 = vector.load %arg30[%c0_427, %c0_428] : memref<64x134xf32, #tpu.memory_space<vmem>>, vector<8x134xf32>
    tpu.vector_store %arg30[%c0_427, %c0_428], %307 {strides = array<i32>} : memref<64x134xf32, #tpu.memory_space<vmem>>, vector<8x134xf32>,
    %c0_429 = arith.constant 0 : index
    %c3_430 = arith.constant 3 : index
    %309 = vector.load %arg30[%c0_429, %c3_430] : memref<64x134xf32, #tpu.memory_space<vmem>>, vector<8x128xf32>
    tpu.vector_store %arg30[%c0_429, %c3_430], %305 {strides = array<i32>} : memref<64x134xf32, #tpu.memory_space<vmem>>, vector<8x128xf32>,
    %c0_431 = arith.constant 0 : index
    %c0_432 = arith.constant 0 : index
    %310 = vector.load %arg30[%c0_431, %c0_432] : memref<64x134xf32, #tpu.memory_space<vmem>>, vector<8x128xf32>
    %c0_433 = arith.constant 0 : index
    %c1_434 = arith.constant 1 : index
    %311 = vector.load %arg30[%c0_433, %c1_434] : memref<64x134xf32, #tpu.memory_space<vmem>>, vector<8x128xf32>
    %c0_435 = arith.constant 0 : index
    %c2_436 = arith.constant 2 : index
    %312 = vector.load %arg30[%c0_435, %c2_436] : memref<64x134xf32, #tpu.memory_space<vmem>>, vector<8x128xf32>
    %c0_437 = arith.constant 0 : index
    %c3_438 = arith.constant 3 : index
    %313 = vector.load %arg30[%c0_437, %c3_438] : memref<64x134xf32, #tpu.memory_space<vmem>>, vector<8x128xf32>
    %c0_439 = arith.constant 0 : index
    %c4_440 = arith.constant 4 : index
    %314 = vector.load %arg30[%c0_439, %c4_440] : memref<64x134xf32, #tpu.memory_space<vmem>>, vector<8x128xf32>
    %c0_441 = arith.constant 0 : index
    %c5_442 = arith.constant 5 : index
    %315 = vector.load %arg30[%c0_441, %c5_442] : memref<64x134xf32, #tpu.memory_space<vmem>>, vector<8x128xf32>
    %c0_443 = arith.constant 0 : index
    %c6_444 = arith.constant 6 : index
    %316 = vector.load %arg30[%c0_443, %c6_444] : memref<64x134xf32, #tpu.memory_space<vmem>>, vector<8x128xf32>
    %317 = tpu.concatenate %310, %311, %312, %313, %314, %315, %316 in 0 : vector<8x128xf32>, vector<8x128xf32>, vector<8x128xf32>, vector<8x128xf32>, vector<8x128xf32>, vector<8x128xf32>, vector<8x128xf32> -> vector<56x128xf32>
    %318 = arith.truncf %317 : vector<56x128xf32> to vector<56x128xbf16>
    %cst_445 = arith.constant dense<0.000000e+00> : vector<8x128xf32>
    %319 = tpu.matmul %306, %318, %cst_445 {dimension_numbers = #tpu.dot_dimension_numbers<[1], [0], [0], [1], [0, 0, 1, 1], [], []>} : vector<8x56xbf16>, vector<56x128xbf16>, vector<8x128xf32> -> vector<8x128xf32>
    %320 = tpu.iota {dimensions = array<i32: 0>} : vector<8x128xi32>
    %c3_i32 = arith.constant 3 : i32
    %321 = vector.broadcast %c3_i32 : i32 to vector<8x128xi32>
    %322 = arith.cmpi slt, %320, %321 : vector<8x128xi32>
    %cst_446 = arith.constant -1.000000e+30 : f32
    %323 = vector.broadcast %cst_446 : f32 to vector<8x128xf32>
    %324 = arith.select %322, %319, %323 : vector<8x128xi1>, vector<8x128xf32>
    %cst_447 = arith.constant dense<0xFF800000> : vector<128xf32>
    %325 = vector.multi_reduction <maximumf>, %324, %cst_447 [0] : vector<8x128xf32> to vector<128xf32>
    %326 = vector.shape_cast %325 : vector<128xf32> to vector<1x128xf32>
    %327 = vector.broadcast %326 : vector<1x128xf32> to vector<8x128xf32>
    %328 = arith.subf %324, %327 : vector<8x128xf32>
    %329 = math.exp %328 : vector<8x128xf32>
    %cst_448 = arith.constant dense<0.000000e+00> : vector<128xf32>
    %330 = vector.multi_reduction <add>, %329, %cst_448 [0] : vector<8x128xf32> to vector<128xf32>
    %331 = vector.shape_cast %330 : vector<128xf32> to vector<1x128xf32>
    %332 = vector.broadcast %331 : vector<1x128xf32> to vector<8x128xf32>
    %333 = arith.divf %329, %332 : vector<8x128xf32>
    %c0_449 = arith.constant 0 : index
    %c0_450 = arith.constant 0 : index
    %c0_451 = arith.constant 0 : index
    %334 = vector.load %arg29[%c0_449, %c0_450, %c0_451] : memref<1x8x128xf32, #tpu.memory_space<vmem>>, vector<1x8x128xf32>
    %335 = vector.shape_cast %334 : vector<1x8x128xf32> to vector<8x128xf32>
    %336 = vector.shape_cast %333 : vector<8x128xf32> to vector<1x8x128xf32>
    tpu.vector_store %arg29[%c0_449, %c0_450, %c0_451], %336 {strides = array<i32>} : memref<1x8x128xf32, #tpu.memory_space<vmem>>, vector<1x8x128xf32>,
    return
  }
  func.func @transform_0(%arg0: i32) -> (i32, i32, i32) {
    %c0_i32 = arith.constant 0 : i32
    %c0_i32_0 = arith.constant 0 : i32
    %c0_i32_1 = arith.constant 0 : i32
    return %arg0, %c0_i32, %c0_i32_0 : i32, i32, i32
  }
  func.func @transform_1(%arg0: i32) -> (i32, i32) {
    %c0_i32 = arith.constant 0 : i32
    %c0_i32_0 = arith.constant 0 : i32
    %c0_i32_1 = arith.constant 0 : i32
    return %c0_i32, %c0_i32_0 : i32, i32
  }
  func.func @transform_2(%arg0: i32) -> (i32, i32) {
    %c0_i32 = arith.constant 0 : i32
    %c0_i32_0 = arith.constant 0 : i32
    %c0_i32_1 = arith.constant 0 : i32
    return %c0_i32, %c0_i32_0 : i32, i32
  }
  func.func @transform_3(%arg0: i32) -> (i32, i32) {
    %c0_i32 = arith.constant 0 : i32
    %c0_i32_0 = arith.constant 0 : i32
    %c0_i32_1 = arith.constant 0 : i32
    return %c0_i32, %c0_i32_0 : i32, i32
  }
  func.func @transform_4(%arg0: i32) -> (i32, i32) {
    %c0_i32 = arith.constant 0 : i32
    %c0_i32_0 = arith.constant 0 : i32
    %c0_i32_1 = arith.constant 0 : i32
    return %c0_i32, %c0_i32_0 : i32, i32
  }
  func.func @transform_5(%arg0: i32) -> (i32, i32) {
    %c0_i32 = arith.constant 0 : i32
    %c0_i32_0 = arith.constant 0 : i32
    %c0_i32_1 = arith.constant 0 : i32
    return %c0_i32, %c0_i32_0 : i32, i32
  }
  func.func @transform_6(%arg0: i32) -> (i32, i32) {
    %c0_i32 = arith.constant 0 : i32
    %c0_i32_0 = arith.constant 0 : i32
    %c0_i32_1 = arith.constant 0 : i32
    return %c0_i32, %c0_i32_0 : i32, i32
  }
  func.func @transform_7(%arg0: i32) -> (i32, i32) {
    %c0_i32 = arith.constant 0 : i32
    %c0_i32_0 = arith.constant 0 : i32
    %c0_i32_1 = arith.constant 0 : i32
    return %c0_i32, %c0_i32_0 : i32, i32
  }
  func.func @transform_8(%arg0: i32) -> (i32, i32) {
    %c0_i32 = arith.constant 0 : i32
    %c0_i32_0 = arith.constant 0 : i32
    %c0_i32_1 = arith.constant 0 : i32
    return %c0_i32, %c0_i32_0 : i32, i32
  }
  func.func @transform_9(%arg0: i32) -> (i32, i32) {
    %c0_i32 = arith.constant 0 : i32
    %c0_i32_0 = arith.constant 0 : i32
    %c0_i32_1 = arith.constant 0 : i32
    return %c0_i32, %c0_i32_0 : i32, i32
  }
  func.func @transform_10(%arg0: i32) -> (i32, i32) {
    %c0_i32 = arith.constant 0 : i32
    %c0_i32_0 = arith.constant 0 : i32
    %c0_i32_1 = arith.constant 0 : i32
    return %c0_i32, %c0_i32_0 : i32, i32
  }
  func.func @transform_11(%arg0: i32) -> (i32, i32) {
    %c0_i32 = arith.constant 0 : i32
    %c0_i32_0 = arith.constant 0 : i32
    %c0_i32_1 = arith.constant 0 : i32
    return %c0_i32, %c0_i32_0 : i32, i32
  }
  func.func @transform_12(%arg0: i32) -> (i32, i32) {
    %c0_i32 = arith.constant 0 : i32
    %c0_i32_0 = arith.constant 0 : i32
    %c0_i32_1 = arith.constant 0 : i32
    return %c0_i32, %c0_i32_0 : i32, i32
  }
  func.func @transform_13(%arg0: i32) -> (i32, i32) {
    %c0_i32 = arith.constant 0 : i32
    %c0_i32_0 = arith.constant 0 : i32
    %c0_i32_1 = arith.constant 0 : i32
    return %c0_i32, %c0_i32_0 : i32, i32
  }
  func.func @transform_14(%arg0: i32) -> (i32, i32) {
    %c0_i32 = arith.constant 0 : i32
    %c0_i32_0 = arith.constant 0 : i32
    %c0_i32_1 = arith.constant 0 : i32
    return %c0_i32, %c0_i32_0 : i32, i32
  }
  func.func @transform_15(%arg0: i32) -> (i32, i32) {
    %c0_i32 = arith.constant 0 : i32
    %c0_i32_0 = arith.constant 0 : i32
    %c0_i32_1 = arith.constant 0 : i32
    return %c0_i32, %c0_i32_0 : i32, i32
  }
  func.func @transform_16(%arg0: i32) -> (i32, i32) {
    %c0_i32 = arith.constant 0 : i32
    %c0_i32_0 = arith.constant 0 : i32
    %c0_i32_1 = arith.constant 0 : i32
    return %c0_i32, %c0_i32_0 : i32, i32
  }
  func.func @transform_17(%arg0: i32) -> (i32, i32) {
    %c0_i32 = arith.constant 0 : i32
    %c0_i32_0 = arith.constant 0 : i32
    %c0_i32_1 = arith.constant 0 : i32
    return %c0_i32, %c0_i32_0 : i32, i32
  }
  func.func @transform_18(%arg0: i32) -> (i32, i32) {
    %c0_i32 = arith.constant 0 : i32
    %c0_i32_0 = arith.constant 0 : i32
    %c0_i32_1 = arith.constant 0 : i32
    return %c0_i32, %c0_i32_0 : i32, i32
  }
  func.func @transform_19(%arg0: i32) -> (i32, i32) {
    %c0_i32 = arith.constant 0 : i32
    %c0_i32_0 = arith.constant 0 : i32
    %c0_i32_1 = arith.constant 0 : i32
    return %c0_i32, %c0_i32_0 : i32, i32
  }
  func.func @transform_20(%arg0: i32) -> (i32, i32) {
    %c0_i32 = arith.constant 0 : i32
    %c0_i32_0 = arith.constant 0 : i32
    %c0_i32_1 = arith.constant 0 : i32
    return %c0_i32, %c0_i32_0 : i32, i32
  }
  func.func @transform_21(%arg0: i32) -> (i32, i32) {
    %c0_i32 = arith.constant 0 : i32
    %c0_i32_0 = arith.constant 0 : i32
    %c0_i32_1 = arith.constant 0 : i32
    return %c0_i32, %c0_i32_0 : i32, i32
  }
  func.func @transform_22(%arg0: i32) -> (i32, i32) {
    %c0_i32 = arith.constant 0 : i32
    %c0_i32_0 = arith.constant 0 : i32
    %c0_i32_1 = arith.constant 0 : i32
    return %c0_i32, %c0_i32_0 : i32, i32
  }
  func.func @transform_23(%arg0: i32) -> (i32, i32) {
    %c0_i32 = arith.constant 0 : i32
    %c0_i32_0 = arith.constant 0 : i32
    %c0_i32_1 = arith.constant 0 : i32
    return %c0_i32, %c0_i32_0 : i32, i32
  }
  func.func @transform_24(%arg0: i32) -> (i32, i32) {
    %c0_i32 = arith.constant 0 : i32
    %c0_i32_0 = arith.constant 0 : i32
    %c0_i32_1 = arith.constant 0 : i32
    return %c0_i32, %c0_i32_0 : i32, i32
  }
  func.func @transform_25(%arg0: i32) -> (i32, i32) {
    %c0_i32 = arith.constant 0 : i32
    %c0_i32_0 = arith.constant 0 : i32
    %c0_i32_1 = arith.constant 0 : i32
    return %c0_i32, %c0_i32_0 : i32, i32
  }
  func.func @transform_26(%arg0: i32) -> (i32, i32) {
    %c0_i32 = arith.constant 0 : i32
    %c0_i32_0 = arith.constant 0 : i32
    %c0_i32_1 = arith.constant 0 : i32
    return %c0_i32, %c0_i32_0 : i32, i32
  }
  func.func @transform_27(%arg0: i32) -> (i32, i32) {
    %c0_i32 = arith.constant 0 : i32
    %c0_i32_0 = arith.constant 0 : i32
    %c0_i32_1 = arith.constant 0 : i32
    return %c0_i32, %c0_i32_0 : i32, i32
  }
  func.func @transform_28(%arg0: i32) -> (i32, i32, i32) {
    %c0_i32 = arith.constant 0 : i32
    %c0_i32_0 = arith.constant 0 : i32
    %c0_i32_1 = arith.constant 0 : i32
    return %arg0, %c0_i32, %c0_i32_0 : i32, i32, i32
  }
}

</mosaic_0001>

<bundles_post_ra>
// kernel: tpu_custom_call.1
= control target key start
LH: loop header
LB: loop body
LE: loop exit
PB: predicated region body
PF: predicated region fallthrough
CT: control target
= control target key end

     0   :  { %s8556_s0 = inlined_call_operand.hbm [shape: f32[2,8,128], index: 0, kind: input, shape index: {}]   ;;  %s8557_s1 = inlined_call_operand.hbm [shape: bf16[8,56], index: 1, kind: input, shape index: {}]   ;;  %s8558_s2 = inlined_call_operand.hbm [shape: bf16[8,56], index: 2, kind: input, shape index: {}]   ;;  %s8559_s3 = inlined_call_operand.hbm [shape: bf16[8,56], index: 3, kind: input, shape index: {}]   ;;  %s8560_s4 = inlined_call_operand.hbm [shape: bf16[16,56], index: 4, kind: input, shape index: {}]   ;;  %s8561_s5 = inlined_call_operand.hbm [shape: bf16[16,112], index: 5, kind: input, shape index: {}]   ;;  %s8562_s6 = inlined_call_operand.hbm [shape: bf16[16,112], index: 6, kind: input, shape index: {}]   ;;  %s8563_s7 = inlined_call_operand.hbm [shape: bf16[16,112], index: 7, kind: input, shape index: {}]   ;;  %s8564_s8 = inlined_call_operand.hbm [shape: bf16[32,112], index: 8, kind: input, shape index: {}]   ;;  %s8565_s9 = inlined_call_operand.vmem [shape: bf16[32,224], index: 9, kind: input, shape index: {}]   ;;  %s8566_s10 = inlined_call_operand.hbm [shape: bf16[32,224], index: 10, kind: input, shape index: {}]   ;;  %s8567_s11 = inlined_call_operand.hbm [shape: bf16[32,224], index: 11, kind: input, shape index: {}]   ;;  %s8568_s12 = inlined_call_operand.vmem [shape: bf16[32,448], index: 12, kind: input, shape index: {}]   ;;  %s8569_s13 = inlined_call_operand.vmem [shape: bf16[16,224], index: 13, kind: input, shape index: {}]   ;;  %s8570_s14 = inlined_call_operand.hbm [shape: bf16[16,224], index: 14, kind: input, shape index: {}]   ;;  %s8571_s15 = inlined_call_operand.hbm [shape: bf16[16,112], index: 15, kind: input, shape index: {}]   ;;  %s8572_s16 = inlined_call_operand.vmem [shape: bf16[16,224], index: 16, kind: input, shape index: {}]   ;;  %s8573_s17 = inlined_call_operand.hbm [shape: bf16[8,112], index: 17, kind: input, shape index: {}]   ;;  %s8574_s18 = inlined_call_operand.hbm [shape: bf16[8,112], index: 18, kind: input, shape index: {}]   ;;  %s8575_s19 = inlined_call_operand.hbm [shape: bf16[8,56], index: 19, kind: input, shape index: {}]   ;;  %s8576_s20 = inlined_call_operand.vmem [shape: bf16[128,64], index: 20, kind: input, shape index: {}]   ;;  %s8577_s21 = inlined_call_operand.vmem [shape: bf16[64,32], index: 21, kind: input, shape index: {}]   ;;  %s8578_s22 = inlined_call_operand.vmem [shape: bf16[32,16], index: 22, kind: input, shape index: {}]   ;;  %s8579_s23 = inlined_call_operand.vmem [shape: bf16[16,8], index: 23, kind: input, shape index: {}]   ;;  %s8580_s24 = inlined_call_operand.vmem [shape: bf16[8,22], index: 24, kind: input, shape index: {}]   ;;  %s8581_s25 = inlined_call_operand.vmem [shape: bf16[16,38], index: 25, kind: input, shape index: {}]   ;;  %s8582_s26 = inlined_call_operand.vmem [shape: bf16[32,70], index: 26, kind: input, shape index: {}]   ;;  %s8583_s27 = inlined_call_operand.vmem [shape: bf16[64,134], index: 27, kind: input, shape index: {}]   ;;  %s8584_s28 = inlined_call_operand.hbm [shape: f32[2,8,128], index: 28, kind: output, shape index: {}]  }
   0x1   :  { %8654 = sst [smem:[#allocation40_spill]] %s8556_s0 }
   0x2   :  { %8655 = sst [smem:[#allocation41_spill]] %s8557_s1 }
   0x3   :  { %8656 = sst [smem:[#allocation42_spill]] %s8558_s2 }
   0x4   :  { %8657 = sst [smem:[#allocation43_spill]] %s8559_s3 }
   0x5   :  { %8658 = sst [smem:[#allocation44_spill]] %s8560_s4 }
   0x6   :  { %8659 = sst [smem:[#allocation45_spill]] %s8561_s5 }
   0x7   :  { %8660 = sst [smem:[#allocation46_spill]] %s8562_s6 }
   0x8   :  { %8661 = sst [smem:[#allocation47_spill]] %s8563_s7 }
   0x9   :  { %8662 = sst [smem:[#allocation48_spill]] %s8564_s8 }
   0xa   :  { %8663 = sst [smem:[#allocation49_spill]] %s8565_s9 }
   0xb   :  { %8664 = sst [smem:[#allocation50_spill]] %s8566_s10 }
   0xc   :  { %8665 = sst [smem:[#allocation51_spill]] %s8567_s11 }
   0xd   :  { %8666 = sst [smem:[#allocation52_spill]] %s8568_s12 }
   0xe   :  { %8667 = sst [smem:[#allocation53_spill]] %s8569_s13 }
   0xf   :  { %8668 = sst [smem:[#allocation54_spill]] %s8570_s14 }
  0x10   :  { %8669 = sst [smem:[#allocation55_spill]] %s8571_s15 }
  0x11   :  { %8670 = sst [smem:[#allocation56_spill]] %s8572_s16 }
  0x12   :  { %8671 = sst [smem:[#allocation57_spill]] %s8573_s17 }
  0x13   :  { %8672 = sst [smem:[#allocation58_spill]] %s8574_s18 }
  0x14   :  { %8673 = sst [smem:[#allocation59_spill]] %s8575_s19 }
  0x15   :  { %8674 = sst [smem:[#allocation60_spill]] %s8576_s20 }
  0x16   :  { %8675 = sst [smem:[#allocation61_spill]] %s8577_s21 }
  0x17   :  { %8676 = sst [smem:[#allocation62_spill]] %s8578_s22 }
  0x18   :  { %8677 = sst [smem:[#allocation63_spill]] %s8579_s23 }
  0x19   :  { %8678 = sst [smem:[#allocation64_spill]] %s8580_s24 }
  0x1a   :  { %8679 = sst [smem:[#allocation65_spill]] %s8581_s25 }
  0x1b   :  { %8680 = sst [smem:[#allocation66_spill]] %s8582_s26 }
  0x1c   :  { %8681 = sst [smem:[#allocation67_spill]] %s8583_s27 }
  0x1d   :  { %8682 = sst [smem:[#allocation68_spill]] %s8584_s28 }
  0x1e   :  { %33 = vsyncpa [#allocation4], 0 }
  0x1f   :  { %35 = vsyncpa [#allocation4 + $0x1], 0 }
  0x20   :  { %36 = vsyncpa [#allocation7], 0 }
  0x21   :  { %37 = vsyncpa [#allocation10], 0 }
  0x22   :  { %38 = vsyncpa [#allocation13], 0 }
  0x23   :  { %39 = vsyncpa [#allocation16], 0 }
  0x24   :  { %40 = vsyncpa [#allocation19], 0 }
  0x25   :  { %41 = vsyncpa [#allocation22], 0 }
  0x26   :  { %42 = vsyncpa [#allocation25], 0 }
  0x27   :  { %43 = vsyncpa [#allocation28], 0 }
  0x28   :  { %44 = vsyncpa [#allocation5], 0 }
  0x29   :  { %46 = vsyncpa [#allocation5 + $0x1], 0  ;;  %s7185_s8 = smov 0   ;;  %s7187_s5 = smov 0  }
  0x2a   :  { %s7189_s9 = smov 0   ;;  %s7191_s30 = smov 0  }
  0x2b LB: > { %s7009_s3 = smov [#allocation6]   ;;  %s7206_s10 = sadd.s32 4294967295, %s7007_s30   ;;  %s7007_s30 = sphi %s7191_s30, %s8786_s30   ;;  %s7003_s9 = sphi %s7189_s9, %s8785_s9   ;;  %s6999_s5 = sphi %s7187_s5, %s8784_s5   ;;  %s6995_s8 = sphi %s7185_s8, %s8783_s8  }
  0x2c   : > { %s689_s6 = sshll.u32 %s7009_s3, 4  ;;  %p4740_p0 = scmp.ge.s32.totalorder %s7007_s30, 1  ;;  %s690_s6 = int_to_ptr.vmem [resolvable:$true] %s689_s6 }
  0x2d   : > { %p8602_p1 = scmp.eq.s32.totalorder %s7206_s10, 0  ;;  %p676_p2 = scmp.lt.s32.totalorder %s7007_s30, 3 }
  0x2e   : > { %s7010_s11 = smov [#allocation9]   ;;  %s7011_s7 = smov [#allocation12]  }
  0x2f   : > { %p7211_p3 = pnand %p4740_p0, %p676_p2  ;;  %s711_s29 = sshll.u32 %s7010_s11, 4  ;;  %s7218_s29 = int_to_ptr.vmem [resolvable:$true] %s711_s29 }
  0x30   : > { %s734_s12 = sshll.u32 %s7011_s7, 4  ;;  %s8685_s3 = sld [smem:[#allocation41_spill]]  ;;  %s7226_s12 = int_to_ptr.vmem [resolvable:$true] %s734_s12 }
  0x31   : > { %s8683_s0 = scalar_select %p7211_p3, 1, 0 }
  0x32   : > { %p5332_p5 = pneg %p7211_p3 }
  0x34   : > { %p7222_p6 = pnand %p5332_p5, %p8602_p1 }
  0x36   : > { %s6459_s28 = scalar_lea.hbm %s8685_s3, 64  ;;  %p7236_p8 = pneg %p7222_p6 }
  0x37   : > { %p6460_p7 = scmp.ne.s32.totalorder %s8685_s3, %s6459_s28  ;;  %p6466_p11 = scmp.lt.u32.totalorder %s6459_s28, %s8685_s3 }
  0x39   : > { %p6462_p9 = pnand %p7236_p8, %p6460_p7 }
  0x3b   : > { %p6463_p10 = pneg %p6462_p9 }
  0x3d   : > { %p6468_p12 = pnand %p6466_p11, %p6463_p10 }
  0x3f   : > { %6471 = shalt.err (!%p6468_p12)
}
  0x40   : > { %s6472_s1 = scalar_lea.vmem %s690_s6, 64  ;;  %p6480_p5 = scmp.lt.s32.totalorder %s690_s6, %s690_s6 }
  0x41   : > { %p6473_p13 = scmp.ne.s32.totalorder %s690_s6, %s6472_s1  ;;  %p6481_p4 = scmp.lt.s32.totalorder %s6472_s1, %s6472_s1 }
  0x43   : > { %p6475_p0 = pnand %p6473_p13, %p7236_p8  ;;  %p6482_p1 = por %p6481_p4, %p6480_p5 }
  0x45   : > { %p6476_p2 = pneg %p6475_p0 }
  0x47   : > { %p6483_p3 = pnand %p6482_p1, %p6476_p2 }
  0x49   : > { %6486 = shalt.err (!%p6483_p3)
}
  0x4a   : > { %5335 = dma.hbm_to_vmem [thread:$0]  (!%p7222_p6), %s8685_s3, 64, %s690_s6, [#allocation7]  }
  0x4b   : > { %s8687_s4 = sld [smem:[#allocation43_spill]] }
  0x51   : > { %s6487_s7 = scalar_lea.hbm %s8687_s4, 64 }
  0x52   : > { %p6488_p7 = scmp.ne.s32.totalorder %s8687_s4, %s6487_s7  ;;  %p6494_p1 = scmp.lt.u32.totalorder %s6487_s7, %s8687_s4 }
  0x54   : > { %p6490_p9 = pnand %p6488_p7, %p7236_p8 }
  0x56   : > { %p6491_p4 = pneg %p6490_p9 }
  0x58   : > { %p6496_p3 = pnand %p6494_p1, %p6491_p4 }
  0x5a   : > { %6499 = shalt.err (!%p6496_p3)
}
  0x5b   : > { %s6500_s6 = scalar_lea.vmem %s7218_s29, 64  ;;  %p6508_p13 = scmp.lt.s32.totalorder %s7218_s29, %s7218_s29 }
  0x5c   : > { %p6501_p10 = scmp.ne.s32.totalorder %s7218_s29, %s6500_s6  ;;  %p6509_p0 = scmp.lt.s32.totalorder %s6500_s6, %s6500_s6 }
  0x5e   : > { %p6503_p11 = pnand %p6501_p10, %p7236_p8  ;;  %p6510_p2 = por %p6509_p0, %p6508_p13 }
  0x60   : > { %p6504_p12 = pneg %p6503_p11 }
  0x62   : > { %p6511_p5 = pnand %p6510_p2, %p6504_p12 }
  0x64   : > { %6514 = shalt.err (!%p6511_p5)
}
  0x65   : > { %5341 = dma.hbm_to_vmem [thread:$0]  (!%p7222_p6), %s8687_s4, 64, %s7218_s29, [#allocation10]  }
  0x66   : > { %s8688_s27 = sld [smem:[#allocation45_spill]] }
  0x6c   : > { %s6515_s26 = scalar_lea.hbm %s8688_s27, 128 }
  0x6d   : > { %p6516_p7 = scmp.ne.s32.totalorder %s8688_s27, %s6515_s26  ;;  %p6522_p1 = scmp.lt.u32.totalorder %s6515_s26, %s8688_s27 }
  0x6f   : > { %p6518_p9 = pnand %p6516_p7, %p7236_p8 }
  0x71   : > { %p6519_p4 = pneg %p6518_p9 }
  0x73   : > { %p6524_p3 = pnand %p6522_p1, %p6519_p4 }
  0x75   : > { %6527 = shalt.err (!%p6524_p3)
}
  0x76   : > { %s6528_s29 = scalar_lea.vmem %s7226_s12, 128  ;;  %p6536_p13 = scmp.lt.s32.totalorder %s7226_s12, %s7226_s12 }
  0x77   : > { %p6529_p10 = scmp.ne.s32.totalorder %s7226_s12, %s6528_s29  ;;  %p6537_p0 = scmp.lt.s32.totalorder %s6528_s29, %s6528_s29 }
  0x79   : > { %p6531_p11 = pnand %p6529_p10, %p7236_p8  ;;  %p6538_p2 = por %p6537_p0, %p6536_p13 }
  0x7b   : > { %p6532_p12 = pneg %p6531_p11 }
  0x7d   : > { %p6539_p5 = pnand %p6538_p2, %p6532_p12 }
  0x7f   : > { %6542 = shalt.err (!%p6539_p5)
}
  0x80   : > { %s8610_s13 = smov 64   ;;  %s8612_s24 = smov 4  }
  0x81   : > { %5347 = dma.hbm_to_vmem [thread:$0]  (!%p7222_p6), %s8688_s27, 128, %s7226_s12, [#allocation13], %s8610_s13, %s8610_s13, %s8612_s24  }
  0x82   : > { %s7014_s26 = smov [#allocation15]   ;;  %s7015_s7 = smov [#allocation18]  }
  0x83   : > { %s760_s28 = sshll.u32 %s7014_s26, 4  ;;  %s789_s1 = sshll.u32 %s7015_s7, 4  ;;  %s761_s28 = int_to_ptr.vmem [resolvable:$true] %s760_s28  ;;  %s790_s1 = int_to_ptr.vmem [resolvable:$true] %s789_s1 }
  0x84   : > { %s8689_s3 = sld [smem:[#allocation47_spill]] }
  0x8a   : > { %s6543_s4 = scalar_lea.hbm %s8689_s3, 128 }
  0x8b   : > { %p6544_p7 = scmp.ne.s32.totalorder %s8689_s3, %s6543_s4  ;;  %p6550_p1 = scmp.lt.u32.totalorder %s6543_s4, %s8689_s3 }
  0x8d   : > { %p6546_p9 = pnand %p6544_p7, %p7236_p8 }
  0x8f   : > { %p6547_p4 = pneg %p6546_p9 }
  0x91   : > { %p6552_p3 = pnand %p6550_p1, %p6547_p4 }
  0x93   : > { %6555 = shalt.err (!%p6552_p3)
}
  0x94   : > { %s6556_s12 = scalar_lea.vmem %s761_s28, 128  ;;  %p6564_p13 = scmp.lt.s32.totalorder %s761_s28, %s761_s28 }
  0x95   : > { %p6557_p10 = scmp.ne.s32.totalorder %s761_s28, %s6556_s12  ;;  %p6565_p0 = scmp.lt.s32.totalorder %s6556_s12, %s6556_s12 }
  0x97   : > { %p6559_p11 = pnand %p6557_p10, %p7236_p8  ;;  %p6566_p2 = por %p6565_p0, %p6564_p13 }
  0x99   : > { %p6560_p12 = pneg %p6559_p11 }
  0x9b   : > { %p6567_p5 = pnand %p6566_p2, %p6560_p12 }
  0x9d   : > { %6570 = shalt.err (!%p6567_p5)
}
  0x9e   : > { %5353 = dma.hbm_to_vmem [thread:$0]  (!%p7222_p6), %s8689_s3, 128, %s761_s28, [#allocation16], %s8610_s13, %s8610_s13, %s8612_s24  }
  0x9f   : > { %s8690_s4 = sld [smem:[#allocation50_spill]] }
  0xa5   : > { %s6571_s25 = scalar_lea.hbm %s8690_s4, 512 }
  0xa6   : > { %p6572_p7 = scmp.ne.s32.totalorder %s8690_s4, %s6571_s25  ;;  %p6578_p1 = scmp.lt.u32.totalorder %s6571_s25, %s8690_s4 }
  0xa8   : > { %p6574_p9 = pnand %p6572_p7, %p7236_p8 }
  0xaa   : > { %p6575_p4 = pneg %p6574_p9 }
  0xac   : > { %p6580_p3 = pnand %p6578_p1, %p6575_p4 }
  0xae   : > { %6583 = shalt.err (!%p6580_p3)
}
  0xaf   : > { %s6584_s29 = scalar_lea.vmem %s790_s1, 512  ;;  %p6592_p13 = scmp.lt.s32.totalorder %s790_s1, %s790_s1 }
  0xb0   : > { %p6585_p10 = scmp.ne.s32.totalorder %s790_s1, %s6584_s29  ;;  %p6593_p0 = scmp.lt.s32.totalorder %s6584_s29, %s6584_s29 }
  0xb2   : > { %p6587_p11 = pnand %p6585_p10, %p7236_p8  ;;  %p6594_p2 = por %p6593_p0, %p6592_p13 }
  0xb4   : > { %p6588_p12 = pneg %p6587_p11 }
  0xb6   : > { %p6595_p5 = pnand %p6594_p2, %p6588_p12 }
  0xb8   : > { %6598 = shalt.err (!%p6595_p5)
}
  0xb9   : > { %s8615_s28 = smov 128   ;;  %s8616_s12 = smov 8  }
  0xba   : > { %5359 = dma.hbm_to_vmem [thread:$0]  (!%p7222_p6), %s8690_s4, 512, %s790_s1, [#allocation19], %s8615_s28, %s8615_s28, %s8616_s12  }
  0xbb   : > { %s7018_s22 = smov [#allocation21]   ;;  %s7019_s25 = smov [#allocation24]  }
  0xbc   : > { %s821_s23 = sshll.u32 %s7018_s22, 4  ;;  %s851_s16 = sshll.u32 %s7019_s25, 4  ;;  %s822_s23 = int_to_ptr.vmem [resolvable:$true] %s821_s23  ;;  %s852_s16 = int_to_ptr.vmem [resolvable:$true] %s851_s16 }
  0xbd   : > { %s8691_s14 = sld [smem:[#allocation54_spill]] }
  0xc3   : > { %s6599_s6 = scalar_lea.hbm %s8691_s14, 256 }
  0xc4   : > { %p6600_p7 = scmp.ne.s32.totalorder %s8691_s14, %s6599_s6  ;;  %p6606_p1 = scmp.lt.u32.totalorder %s6599_s6, %s8691_s14 }
  0xc6   : > { %p6602_p9 = pnand %p6600_p7, %p7236_p8 }
  0xc8   : > { %p6603_p4 = pneg %p6602_p9 }
  0xca   : > { %p6608_p3 = pnand %p6606_p1, %p6603_p4 }
  0xcc   : > { %6611 = shalt.err (!%p6608_p3)
}
  0xcd   : > { %s6612_s1 = scalar_lea.vmem %s822_s23, 256  ;;  %p6620_p13 = scmp.lt.s32.totalorder %s822_s23, %s822_s23 }
  0xce   : > { %p6613_p10 = scmp.ne.s32.totalorder %s822_s23, %s6612_s1  ;;  %p6621_p0 = scmp.lt.s32.totalorder %s6612_s1, %s6612_s1 }
  0xd0   : > { %p6615_p11 = pnand %p6613_p10, %p7236_p8  ;;  %p6622_p2 = por %p6621_p0, %p6620_p13 }
  0xd2   : > { %p6616_p12 = pneg %p6615_p11 }
  0xd4   : > { %p6623_p5 = pnand %p6622_p2, %p6616_p12 }
  0xd6   : > { %6626 = shalt.err (!%p6623_p5)
}
  0xd7   : > { %5365 = dma.hbm_to_vmem [thread:$0]  (!%p7222_p6), %s8691_s14, 256, %s822_s23, [#allocation22], %s8615_s28, %s8615_s28, %s8616_s12  }
  0xd8   : > { %s8692_s17 = sld [smem:[#allocation57_spill]] }
  0xde   : > { %s6627_s21 = scalar_lea.hbm %s8692_s17, 64 }
  0xdf   : > { %p6628_p7 = scmp.ne.s32.totalorder %s8692_s17, %s6627_s21  ;;  %p6634_p1 = scmp.lt.u32.totalorder %s6627_s21, %s8692_s17 }
  0xe1   : > { %p6630_p9 = pnand %p6628_p7, %p7236_p8 }
  0xe3   : > { %p6631_p4 = pneg %p6630_p9 }
  0xe5   : > { %p6636_p3 = pnand %p6634_p1, %p6631_p4 }
  0xe7   : > { %6639 = shalt.err (!%p6636_p3)
}
  0xe8   : > { %s6640_s6 = scalar_lea.vmem %s852_s16, 64  ;;  %p6648_p13 = scmp.lt.s32.totalorder %s852_s16, %s852_s16 }
  0xe9   : > { %p6641_p10 = scmp.ne.s32.totalorder %s852_s16, %s6640_s6  ;;  %p6649_p0 = scmp.lt.s32.totalorder %s6640_s6, %s6640_s6 }
  0xeb   : > { %p6643_p11 = pnand %p6641_p10, %p7236_p8  ;;  %p6650_p2 = por %p6649_p0, %p6648_p13 }
  0xed   : > { %p6644_p12 = pneg %p6643_p11 }
  0xef   : > { %p6651_p5 = pnand %p6650_p2, %p6644_p12 }
  0xf1   : > { %6654 = shalt.err (!%p6651_p5)
}
  0xf2   : > { %5371 = dma.hbm_to_vmem [thread:$0]  (!%p7222_p6), %s8692_s17, 64, %s852_s16, [#allocation25]  }
  0xf3   : > { %s7020_s1 = smov [#allocation8]   ;;  %s7021_s13 = smov [#allocation11]  }
  0xf4   : > { %s700_s3 = sshll.u32 %s7020_s1, 4  ;;  %s721_s24 = sshll.u32 %s7021_s13, 4  ;;  %s701_s3 = int_to_ptr.vmem [resolvable:$true] %s700_s3  ;;  %s722_s24 = int_to_ptr.vmem [resolvable:$true] %s721_s24 }
  0xf5   : > { %s8693_s22 = sld [smem:[#allocation42_spill]] }
  0xfb   : > { %s6655_s25 = scalar_lea.hbm %s8693_s22, 64 }
  0xfc   : > { %p6656_p7 = scmp.ne.s32.totalorder %s8693_s22, %s6655_s25  ;;  %p6662_p1 = scmp.lt.u32.totalorder %s6655_s25, %s8693_s22 }
  0xfe   : > { %p6658_p9 = pnand %p6656_p7, %p7236_p8 }
 0x100   : > { %p6659_p4 = pneg %p6658_p9 }
 0x102   : > { %p6664_p3 = pnand %p6662_p1, %p6659_p4 }
 0x104   : > { %6667 = shalt.err (!%p6664_p3)
}
 0x105   : > { %s6668_s16 = scalar_lea.vmem %s701_s3, 64  ;;  %p6676_p13 = scmp.lt.s32.totalorder %s701_s3, %s701_s3 }
 0x106   : > { %p6669_p10 = scmp.ne.s32.totalorder %s701_s3, %s6668_s16  ;;  %p6677_p0 = scmp.lt.s32.totalorder %s6668_s16, %s6668_s16 }
 0x108   : > { %p6671_p11 = pnand %p6669_p10, %p7236_p8  ;;  %p6678_p2 = por %p6677_p0, %p6676_p13 }
 0x10a   : > { %p6672_p12 = pneg %p6671_p11 }
 0x10c   : > { %p6679_p5 = pnand %p6678_p2, %p6672_p12 }
 0x10e   : > { %6682 = shalt.err (!%p6679_p5)
}
 0x10f   : > { %5338 = dma.hbm_to_vmem [thread:$0]  (!%p7222_p6), %s8693_s22, 64, %s701_s3, [#allocation7]  }
 0x110   : > { %s8694_s21 = sld [smem:[#allocation44_spill]] }
 0x116   : > { %s6683_s25 = scalar_lea.hbm %s8694_s21, 128 }
 0x117   : > { %p6684_p7 = scmp.ne.s32.totalorder %s8694_s21, %s6683_s25  ;;  %p6690_p1 = scmp.lt.u32.totalorder %s6683_s25, %s8694_s21 }
 0x119   : > { %p6686_p9 = pnand %p6684_p7, %p7236_p8 }
 0x11b   : > { %p6687_p4 = pneg %p6686_p9 }
 0x11d   : > { %p6692_p3 = pnand %p6690_p1, %p6687_p4 }
 0x11f   : > { %6695 = shalt.err (!%p6692_p3)
}
 0x120   : > { %s6696_s16 = scalar_lea.vmem %s722_s24, 128  ;;  %p6704_p13 = scmp.lt.s32.totalorder %s722_s24, %s722_s24 }
 0x121   : > { %p6697_p10 = scmp.ne.s32.totalorder %s722_s24, %s6696_s16  ;;  %p6705_p0 = scmp.lt.s32.totalorder %s6696_s16, %s6696_s16 }
 0x123   : > { %p6699_p11 = pnand %p6697_p10, %p7236_p8  ;;  %p6706_p2 = por %p6705_p0, %p6704_p13 }
 0x125   : > { %p6700_p12 = pneg %p6699_p11 }
 0x127   : > { %p6707_p5 = pnand %p6706_p2, %p6700_p12 }
 0x129   : > { %6710 = shalt.err (!%p6707_p5)
}
 0x12a   : > { %s8695_s3 = smov 4   ;;  %s8696_s29 = smov 64  }
 0x12b   : > { %5344 = dma.hbm_to_vmem [thread:$0]  (!%p7222_p6), %s8694_s21, 128, %s722_s24, [#allocation10], %s8696_s29, %s8696_s29, %s8695_s3  }
 0x12c   : > { %s7022_s20 = smov [#allocation14]   ;;  %s7023_s26 = smov [#allocation17]  }
 0x12d   : > { %s747_s25 = sshll.u32 %s7022_s20, 4  ;;  %s773_s7 = sshll.u32 %s7023_s26, 4  ;;  %s748_s25 = int_to_ptr.vmem [resolvable:$true] %s747_s25  ;;  %s774_s7 = int_to_ptr.vmem [resolvable:$true] %s773_s7 }
 0x12e   : > { %s8697_s16 = sld [smem:[#allocation46_spill]] }
 0x134   : > { %s6711_s28 = scalar_lea.hbm %s8697_s16, 128 }
 0x135   : > { %p6712_p7 = scmp.ne.s32.totalorder %s8697_s16, %s6711_s28  ;;  %p6718_p1 = scmp.lt.u32.totalorder %s6711_s28, %s8697_s16 }
 0x137   : > { %p6714_p9 = pnand %p6712_p7, %p7236_p8 }
 0x139   : > { %p6715_p4 = pneg %p6714_p9 }
 0x13b   : > { %p6720_p3 = pnand %p6718_p1, %p6715_p4 }
 0x13d   : > { %6723 = shalt.err (!%p6720_p3)
}
 0x13e   : > { %s6724_s24 = scalar_lea.vmem %s748_s25, 128  ;;  %p6732_p13 = scmp.lt.s32.totalorder %s748_s25, %s748_s25 }
 0x13f   : > { %p6725_p10 = scmp.ne.s32.totalorder %s748_s25, %s6724_s24  ;;  %p6733_p0 = scmp.lt.s32.totalorder %s6724_s24, %s6724_s24 }
 0x141   : > { %p6727_p11 = pnand %p6725_p10, %p7236_p8  ;;  %p6734_p2 = por %p6733_p0, %p6732_p13 }
 0x143   : > { %p6728_p12 = pneg %p6727_p11 }
 0x145   : > { %p6735_p5 = pnand %p6734_p2, %p6728_p12 }
 0x147   : > { %6738 = shalt.err (!%p6735_p5)
}
 0x148   : > { %5350 = dma.hbm_to_vmem [thread:$0]  (!%p7222_p6), %s8697_s16, 128, %s748_s25, [#allocation13], %s8696_s29, %s8696_s29, %s8695_s3  }
 0x149   : > { %s8698_s13 = sld [smem:[#allocation48_spill]] }
 0x14f   : > { %s6739_s20 = scalar_lea.hbm %s8698_s13, 256 }
 0x150   : > { %p6740_p7 = scmp.ne.s32.totalorder %s8698_s13, %s6739_s20  ;;  %p6746_p1 = scmp.lt.u32.totalorder %s6739_s20, %s8698_s13 }
 0x152   : > { %p6742_p9 = pnand %p6740_p7, %p7236_p8 }
 0x154   : > { %p6743_p4 = pneg %p6742_p9 }
 0x156   : > { %p6748_p3 = pnand %p6746_p1, %p6743_p4 }
 0x158   : > { %6751 = shalt.err (!%p6748_p3)
}
 0x159   : > { %s6752_s24 = scalar_lea.vmem %s774_s7, 256  ;;  %p6760_p13 = scmp.lt.s32.totalorder %s774_s7, %s774_s7 }
 0x15a   : > { %p6753_p10 = scmp.ne.s32.totalorder %s774_s7, %s6752_s24  ;;  %p6761_p0 = scmp.lt.s32.totalorder %s6752_s24, %s6752_s24 }
 0x15c   : > { %p6755_p11 = pnand %p6753_p10, %p7236_p8  ;;  %p6762_p2 = por %p6761_p0, %p6760_p13 }
 0x15e   : > { %p6756_p12 = pneg %p6755_p11 }
 0x160   : > { %p6763_p5 = pnand %p6762_p2, %p6756_p12 }
 0x162   : > { %6766 = shalt.err (!%p6763_p5)
}
 0x163   : > { %5356 = dma.hbm_to_vmem [thread:$0]  (!%p7222_p6), %s8698_s13, 256, %s774_s7, [#allocation16], %s8696_s29, %s8696_s29, %s8695_s3  }
 0x164   : > { %s7024_s4 = smov [#allocation20]   ;;  %s7025_s12 = smov [#allocation23]  }
 0x165   : > { %s802_s28 = sshll.u32 %s7024_s4, 4  ;;  %s834_s20 = sshll.u32 %s7025_s12, 4  ;;  %s803_s28 = int_to_ptr.vmem [resolvable:$true] %s802_s28  ;;  %s835_s20 = int_to_ptr.vmem [resolvable:$true] %s834_s20 }
 0x166   : > { %s8699_s23 = sld [smem:[#allocation51_spill]] }
 0x16c   : > { %s6767_s1 = scalar_lea.hbm %s8699_s23, 512 }
 0x16d   : > { %p6768_p7 = scmp.ne.s32.totalorder %s8699_s23, %s6767_s1  ;;  %p6774_p1 = scmp.lt.u32.totalorder %s6767_s1, %s8699_s23 }
 0x16f   : > { %p6770_p9 = pnand %p6768_p7, %p7236_p8 }
 0x171   : > { %p6771_p4 = pneg %p6770_p9 }
 0x173   : > { %p6776_p3 = pnand %p6774_p1, %p6771_p4 }
 0x175   : > { %6779 = shalt.err (!%p6776_p3)
}
 0x176   : > { %s6780_s7 = scalar_lea.vmem %s803_s28, 512  ;;  %p6788_p13 = scmp.lt.s32.totalorder %s803_s28, %s803_s28 }
 0x177   : > { %p6781_p10 = scmp.ne.s32.totalorder %s803_s28, %s6780_s7  ;;  %p6789_p0 = scmp.lt.s32.totalorder %s6780_s7, %s6780_s7 }
 0x179   : > { %p6783_p11 = pnand %p6781_p10, %p7236_p8  ;;  %p6790_p2 = por %p6789_p0, %p6788_p13 }
 0x17b   : > { %p6784_p12 = pneg %p6783_p11 }
 0x17d   : > { %p6791_p5 = pnand %p6790_p2, %p6784_p12 }
 0x17f   : > { %6794 = shalt.err (!%p6791_p5)
}
 0x180   : > { %s8700_s16 = smov 8   ;;  %s8701_s14 = smov 128  }
 0x181   : > { %5362 = dma.hbm_to_vmem [thread:$0]  (!%p7222_p6), %s8699_s23, 512, %s803_s28, [#allocation19], %s8701_s14, %s8701_s14, %s8700_s16  }
 0x182   : > { %s8702_s15 = sld [smem:[#allocation55_spill]] }
 0x188   : > { %s6795_s6 = scalar_lea.hbm %s8702_s15, 128 }
 0x189   : > { %p6796_p7 = scmp.ne.s32.totalorder %s8702_s15, %s6795_s6  ;;  %p6802_p1 = scmp.lt.u32.totalorder %s6795_s6, %s8702_s15 }
 0x18b   : > { %p6798_p9 = pnand %p6796_p7, %p7236_p8 }
 0x18d   : > { %p6799_p4 = pneg %p6798_p9 }
 0x18f   : > { %p6804_p3 = pnand %p6802_p1, %p6799_p4 }
 0x191   : > { %6807 = shalt.err (!%p6804_p3)
}
 0x192   : > { %s6808_s17 = scalar_lea.vmem %s835_s20, 128  ;;  %p6816_p13 = scmp.lt.s32.totalorder %s835_s20, %s835_s20 }
 0x193   : > { %p6809_p10 = scmp.ne.s32.totalorder %s835_s20, %s6808_s17  ;;  %p6817_p0 = scmp.lt.s32.totalorder %s6808_s17, %s6808_s17 }
 0x195   : > { %p6811_p11 = pnand %p6809_p10, %p7236_p8  ;;  %p6818_p2 = por %p6817_p0, %p6816_p13 }
 0x197   : > { %p6812_p12 = pneg %p6811_p11 }
 0x199   : > { %p6819_p5 = pnand %p6818_p2, %p6812_p12 }
 0x19b   : > { %6822 = shalt.err (!%p6819_p5)
}
 0x19c   : > { %5368 = dma.hbm_to_vmem [thread:$0]  (!%p7222_p6), %s8702_s15, 128, %s835_s20, [#allocation22], %s8696_s29, %s8696_s29, %s8695_s3  }
 0x19d   : > { %s7026_s14 = smov [#allocation26]   ;;  %s7027_s12 = smov [#allocation27]  }
 0x19e   : > { %s862_s4 = sshll.u32 %s7026_s14, 4  ;;  %s873_s26 = sshll.u32 %s7027_s12, 4  ;;  %s863_s4 = int_to_ptr.vmem [resolvable:$true] %s862_s4  ;;  %s874_s26 = int_to_ptr.vmem [resolvable:$true] %s873_s26 }
 0x19f   : > { %s8703_s18 = sld [smem:[#allocation58_spill]] }
 0x1a5   : > { %s6823_s24 = scalar_lea.hbm %s8703_s18, 64 }
 0x1a6   : > { %p6824_p7 = scmp.ne.s32.totalorder %s8703_s18, %s6823_s24  ;;  %p6830_p1 = scmp.lt.u32.totalorder %s6823_s24, %s8703_s18 }
 0x1a8   : > { %p6826_p9 = pnand %p6824_p7, %p7236_p8 }
 0x1aa   : > { %p6827_p4 = pneg %p6826_p9 }
 0x1ac   : > { %p6832_p3 = pnand %p6830_p1, %p6827_p4 }
 0x1ae   : > { %6835 = shalt.err (!%p6832_p3)
}
 0x1af   : > { %s6836_s3 = scalar_lea.vmem %s863_s4, 64  ;;  %p6844_p13 = scmp.lt.s32.totalorder %s863_s4, %s863_s4 }
 0x1b0   : > { %p6837_p10 = scmp.ne.s32.totalorder %s863_s4, %s6836_s3  ;;  %p6845_p0 = scmp.lt.s32.totalorder %s6836_s3, %s6836_s3 }
 0x1b2   : > { %p6839_p11 = pnand %p6837_p10, %p7236_p8  ;;  %p6846_p2 = por %p6845_p0, %p6844_p13 }
 0x1b4   : > { %p6840_p12 = pneg %p6839_p11 }
 0x1b6   : > { %p6847_p5 = pnand %p6846_p2, %p6840_p12 }
 0x1b8   : > { %6850 = shalt.err (!%p6847_p5)
}
 0x1b9   : > { %5374 = dma.hbm_to_vmem [thread:$0]  (!%p7222_p6), %s8703_s18, 64, %s863_s4, [#allocation25]  }
 0x1ba   : > { %s8704_s19 = sld [smem:[#allocation59_spill]] }
 0x1c0   : > { %s6851_s12 = scalar_lea.hbm %s8704_s19, 64 }
 0x1c1   : > { %p6852_p7 = scmp.ne.s32.totalorder %s8704_s19, %s6851_s12  ;;  %p6858_p1 = scmp.lt.u32.totalorder %s6851_s12, %s8704_s19 }
 0x1c3   : > { %p6854_p9 = pnand %p6852_p7, %p7236_p8 }
 0x1c5   : > { %p6855_p4 = pneg %p6854_p9 }
 0x1c7   : > { %p6860_p3 = pnand %p6858_p1, %p6855_p4 }
 0x1c9   : > { %6863 = shalt.err (!%p6860_p3)
}
 0x1ca   : > { %s6864_s7 = scalar_lea.vmem %s874_s26, 64  ;;  %p6872_p13 = scmp.lt.s32.totalorder %s874_s26, %s874_s26 }
 0x1cb   : > { %p6865_p10 = scmp.ne.s32.totalorder %s874_s26, %s6864_s7  ;;  %p6873_p0 = scmp.lt.s32.totalorder %s6864_s7, %s6864_s7 }
 0x1cd   : > { %p6867_p11 = pnand %p6865_p10, %p7236_p8  ;;  %p6874_p2 = por %p6873_p0, %p6872_p13 }
 0x1cf   : > { %p6868_p12 = pneg %p6867_p11 }
 0x1d1   : > { %p6875_p5 = pnand %p6874_p2, %p6868_p12 }
 0x1d3   : > { %6878 = shalt.err (!%p6875_p5)
}
 0x1d4   : > { %5377 = dma.hbm_to_vmem [thread:$0]  (!%p7222_p6), %s8704_s19, 64, %s874_s26, [#allocation28]  }
 0x1d5   : > { %s4739_s11 = sadd.s32 4294967294, %s7007_s30   ;;  %s7543_s2 = sadd.s32 1, %s7007_s30  }
 0x1d6   : > { %s59_s28 = sadd.s32 1, %s7003_s9  ;;  %s56_s3 = ssub.s32 %s7007_s30, %s7543_s2 }
 0x1d7   : > { %p66_p8 = scmp.ne.s32.totalorder %s7003_s9, %s6999_s5  ;;  %p57_p7 = scmp.eq.s32.totalorder %s56_s3, 0 }
 0x1d8   : > { %p67_p9 = scmp.eq.s32.totalorder %s7007_s30, 0  ;;  %p72_p4 = scmp.ne.s32.totalorder %s6999_s5, %s6995_s8 }
 0x1d9   : > { %p663_p1 = scmp.eq.s32.totalorder %s7206_s10, 1  ;;  %p8705_p10 = scmp.eq.s32.totalorder %s7206_s10, 0 }
 0x1da   : > { %s7555_s29 = scalar_select %p57_p7, %s7003_s9, %s59_s28  }
 0x1db   : > { %p68_p3 = por %p67_p9, %p66_p8  ;;  %p7559_p11 = por %p8705_p10, %p72_p4 }
 0x1dc   : > { %p7563_p6 = por %p663_p1, %p66_p8  ;;  %p669_p12 = scmp.eq.s32.totalorder %s4739_s11, 1 }
 0x1dd   : > { %p5401_p13 = scmp.lt.s32.totalorder %s7007_s30, 2  ;;  %s908_s16 = sand.u32 1, %s7003_s9  }
 0x1de   : > { %s8707_s26 = scalar_select %p7563_p6, 1, 0 }
 0x1df   : > { %p7569_p0 = por %p669_p12, %p72_p4  ;;  %s4757_s12 = sshll.u32 %s908_s16, 3 }
 0x1e0   : > { %s4758_s6 = sshll.u32 %s7007_s30, 7  ;;  %s8709_s25 = sld [smem:[#allocation40_spill]] }
 0x1e1   : > { %s8708_s14 = scalar_select %p7569_p0, 1, 0 }
 0x1e2   : > { %s912_s4 = scalar_lea.vmem [#allocation3], %s4757_s12  ;;  %p7579_p2 = pnand %p5401_p13, %p68_p3 }
 0x1e3   : > { %s919_s17 = sshll.u32 %s912_s4, 4  ;;  %s909_s28 = scalar_lea.sflag [#allocation4], %s908_s16  ;;  %s7583_s17 = int_to_ptr.vmem [resolvable:$true] %s919_s17 }
 0x1e4   : > { %p6881_p8 = pneg %p7579_p2 }
 0x1e6   : > { %s7577_s7 = scalar_lea.hbm %s8709_s25, %s4758_s6  ;;  %s6884_s1 = scalar_lea.hbm %s8709_s25, 256 }
 0x1e7   : > { %s6879_s3 = scalar_lea.hbm %s7577_s7, 128  ;;  %p6885_p4 = scmp.lt.u32.totalorder %s7577_s7, %s8709_s25 }
 0x1e8   : > { %p6880_p5 = scmp.ne.s32.totalorder %s7577_s7, %s6879_s3  ;;  %p6886_p1 = scmp.lt.u32.totalorder %s6884_s1, %s6879_s3 }
 0x1e9   : > { %p6888_p10 = scmp.lt.u32.totalorder %s6879_s3, %s7577_s7 }
 0x1ea   : > { %p6882_p7 = pnand %p6881_p8, %p6880_p5  ;;  %p6887_p3 = por %p6886_p1, %p6885_p4 }
 0x1ec   : > { %p6883_p9 = pneg %p6882_p7  ;;  %p6889_p12 = por %p6888_p10, %p6887_p3 }
 0x1ee   : > { %p6890_p13 = pnand %p6889_p12, %p6883_p9 }
 0x1f0   : > { %6893 = shalt.err (!%p6890_p13)
}
 0x1f1   : > { %s6894_s16 = scalar_lea.vmem %s7583_s17, 128  ;;  %s7028_s6 = smov [#allocation3]  }
 0x1f2   : > { %p6895_p5 = scmp.ne.s32.totalorder %s7583_s17, %s6894_s16  ;;  %s6899_s12 = sshll.u32 %s7028_s6, 4  ;;  %s6900_s12 = int_to_ptr.vmem [resolvable:$false] %s6899_s12 }
 0x1f3   : > { %s6901_s24 = scalar_lea.vmem %s6900_s12, 256  ;;  %p6902_p6 = scmp.lt.s32.totalorder %s7583_s17, %s6900_s12 }
 0x1f4   : > { %p6897_p7 = pnand %p6895_p5, %p6881_p8  ;;  %p6903_p4 = scmp.lt.s32.totalorder %s6901_s24, %s6894_s16 }
 0x1f6   : > { %p6898_p0 = pneg %p6897_p7  ;;  %p6904_p1 = por %p6903_p4, %p6902_p6 }
 0x1f8   : > { %p6905_p3 = pnand %p6904_p1, %p6898_p0 }
 0x1fa   : > { %6908 = shalt.err (!%p6905_p3)
}
 0x1fb   : > { %5381 = dma.hbm_to_vmem [thread:$0]  (!%p7579_p2), %s7577_s7, 128, %s7583_s17, %s909_s28  }
 0x1fc   : > { %p8711_p9 = scmp.ne.s32.totalorder %s8683_s0, 0 }
 0x1fd   : > { %s7613_s3 = sand.u32 (!%p8711_p9), 1, %s6999_s5  }
 0x1fe   : > { %928 = sbr.rel (%p8711_p9) target bundleno = 11248 (0x2bf0), region = 132  ;;  %s8620_s1 = sshll.u32 (!%p8711_p9), %s7613_s3, 3 }
 0x1ff   : > { %s931_s4 = scalar_lea.sflag (!%p8711_p9), [#allocation4], %s7613_s3  ;;  %s934_s16 = scalar_lea.vmem (!%p8711_p9), [#allocation3], %s8620_s1 }
 0x205   : > { %6954 = dma.done.wait (%p7559_p11), %s931_s4, 128  }
 0x206   : > { %6956 = vsyncadd (%p7559_p11), %s931_s4, 4294967168  ;;  %p8712_p6 = scmp.eq.s32.totalorder %s7206_s10, 0 }
 0x208   : > { %6958 = dma.done.wait (%p8712_p6), [#allocation7], 128   ;;  %p8713_p0 = pmov %p8712_p6 }
 0x20a   : > { %6960 = vsyncadd (%p8713_p0), [#allocation7], 4294967168  ;;  %p8714_p2 = pmov %p8713_p0 }
 0x20b   : > { %p8715_p8 = pmov %p8713_p0 }
 0x20c   : > { %6962 = dma.done.wait (%p8714_p2), [#allocation10], 192  }
 0x20d   : > { %6964 = vsyncadd (%p8715_p8), [#allocation10], 4294967104  ;;  %p8716_p10 = pmov %p8713_p0 }
 0x20e   : > { %p8717_p12 = pmov %p8713_p0 }
 0x20f   : > { %6966 = dma.done.wait (%p8716_p10), [#allocation13], 256  }
 0x210   : > { %6968 = vsyncadd (%p8717_p12), [#allocation13], 4294967040  ;;  %p8718_p11 = pmov %p8713_p0 }
 0x211   : > { %p8719_p13 = pmov %p8713_p0 }
 0x212   : > { %6970 = dma.done.wait (%p8718_p11), [#allocation16], 384  }
 0x213   : > { %6972 = vsyncadd (%p8719_p13), [#allocation16], 4294966912  ;;  %p8720_p5 = pmov %p8713_p0 }
 0x214   : > { %p8721_p7 = pmov %p8713_p0 }
 0x215   : > { %6974 = dma.done.wait (%p8720_p5), [#allocation19], 1024  }
 0x216   : > { %6976 = vsyncadd (%p8721_p7), [#allocation19], 4294966272  ;;  %p8722_p4 = pmov %p8713_p0 }
 0x217   : > { %p8723_p1 = pmov %p8713_p0 }
 0x218   : > { %6978 = dma.done.wait (%p8722_p4), [#allocation22], 384  }
 0x219   : > { %6980 = vsyncadd (%p8723_p1), [#allocation22], 4294966912  ;;  %p8724_p3 = pmov %p8713_p0 }
 0x21a   : > { %p8725_p9 = pmov %p8713_p0 }
 0x21b   : > { %6982 = dma.done.wait (%p8724_p3), [#allocation25], 128  }
 0x21c   : > { %6984 = vsyncadd (%p8725_p9), [#allocation25], 4294967168  ;;  %p8726_p6 = pmov %p8713_p0 }
 0x21e   : > { %6986 = dma.done.wait (%p8726_p6), [#allocation28], 64  }
 0x21f   : > { %6988 = vsyncadd (%p8713_p0), [#allocation28], 4294967232  ;;  %vm1071_vm0 = vcmask 48128   ;;  %v7029_v0 = vmov 0.0   ;;  %v1068_v1 = vld [vmem:[%s934_s16] sm:$0xff]  ;;  %s8638_s0 = smov 3  }
 0x220   : > { %1070 = vst [vmem:[#allocation2] sm:$0xff] %v7029_v0  ;;  %1072 = vst.msk [vmem:[#allocation2 + $0x8] sm:$0xff] %vm1071_vm0, %v7029_v0  ;;  %5015 = vmatprep.subr.bf16.mxu0 %v7029_v0  ;;  %5027 = vmatprep.subr.bf16.mxu1 %v7029_v0  ;;  %vm1077_vm1 = vcmask 1047576   ;;  %vm1079_vm2 = vcmask 23552   ;;  %s8627_s20 = smov 126   ;;  %s8621_s7 = smov 127  }
 0x221   : > { %1074 = vrot.lane.b32.xlu0 %v1068_v1, %s8638_s0  ;;  %s8633_s17 = smov 125   ;;  %s8623_s11 = smov 124   ;;  %vm7035_vm3 = vmmov 0   ;;  %vm8644_vm4 = vcmask 1039360   ;;  %vm8640_vm5 = vcmask 1031168   ;;  %vm8637_vm6 = vcmask 1022976  }
 0x222   : > { %5023 = vmatprep.mubr.msk.bf16.mxu0 %vm7035_vm3, %v7029_v0  ;;  %5035 = vmatprep.mubr.msk.bf16.mxu1 %vm7035_vm3, %v7029_v0  ;;  %s8625_s28 = smov 123   ;;  %s8631_s6 = smov 122   ;;  %vm8636_vm7 = vcmask 1014784   ;;  %vm8635_vm8 = vcmask 1006592   ;;  %vm8630_vm9 = vcmask 998400   ;;  %vm8645_vm10 = vcmask 1043456  }
 0x223   : > { %v1069_v35 = vld [vmem:[#allocation6] sm:$0xf]  ;;  %vm8629_vm11 = vcmask 457728   ;;  %s8727_s4 = sld [smem:[#allocation60_spill]]  ;;  %vm1594_vm12 = vcmask 572416   ;;  %vm1605_vm13 = vcmask 547864  }
 0x224   : > { %1596 = vst.msk [vmem:[#allocation2 + $0x10] sm:$0xff] %vm1594_vm12, %v7029_v0  ;;  %s8728_s1 = smov 127   ;;  %s8729_s16 = smov 124   ;;  %vm1660_vm14 = vcmask 916480   ;;  %vm1852_vm15 = vcmask 523264  }
 0x225   : > { %s8731_s12 = sld [smem:[#allocation61_spill]]  ;;  %s8733_s24 = sld [smem:[#allocation62_spill]] }
 0x226   : > { %s8739_s15 = sld [smem:[#allocation64_spill]]  ;;  %s8741_s22 = sld [smem:[#allocation65_spill]] }
 0x227   : > { %s8743_s13 = sld [smem:[#allocation66_spill]]  ;;  %s4513_s21 = scalar_lea.sflag [#allocation5], %s7613_s3 }
 0x228   : > { %p8780_p8 = scmp.ne.s32.totalorder %s8707_s26, 0 }
 0x293   : > { %v1075_v2 = vpop.permute.xlu0 %1074 }
 0x294   : > { %1078 = vst.msk [vmem:[#allocation2] sm:$0xff] %vm1077_vm1, %v1075_v2 }
 0x295   : > { %1080 = vst.msk [vmem:[#allocation2 + $0x8] sm:$0xff] %vm1079_vm2, %v1075_v2 }
 0x29b   : > { %v1081_v3 = vld [vmem:[#allocation2] sm:$0xff] }
 0x29c   : > { %v1082_v4 = vld [vmem:[#allocation2 + $0x8] sm:$0xff]  ;;  %1180 = vst [vmem:[#allocation2] sm:$0xff] %v7029_v0 }
 0x29d   : > { %v5484_v5 = vpack.i.bf16 %v1082_v4, %v1081_v3  ;;  %1181 = vst.msk [vmem:[#allocation2 + $0x8] sm:$0xff] %vm1071_vm0, %v7029_v0 }
 0x29f   : > { %5485 = vrot.lane.b32.xlu1 %v5484_v5, %s8627_s20  ;;  %5480 = vrot.lane.b32.xlu0 %v5484_v5, %s8621_s7 }
 0x2a3   : > { %5490 = vrot.lane.b32.xlu1 %v5484_v5, %s8633_s17  ;;  %5495 = vrot.lane.b32.xlu0 %v5484_v5, %s8623_s11 }
 0x2a7   : > { %5500 = vrot.lane.b32.xlu1 %v5484_v5, %s8625_s28  ;;  %5505 = vrot.lane.b32.xlu0 %v5484_v5, %s8631_s6 }
 0x311   : > { %v5486_v6 = vpop.permute.xlu1 %5485  ;;  %v5481_v7 = vpop.permute.xlu0 %5480 }
 0x312   : > { %v5483_v8 = vunpack.i.h.bf16 %v5481_v7  ;;  %v5482_v9 = vunpack.i.l.bf16 %v5481_v7  ;;  %v5488_v10 = vunpack.i.h.bf16 %v5486_v6  ;;  %v5487_v11 = vunpack.i.l.bf16 %v5486_v6 }
 0x314   : > { %v1090_v12 = vsel %vm8644_vm4, %v5482_v9, %v5483_v8  ;;  %v1097_v20 = vsel %vm8640_vm5, %v5487_v11, %v5488_v10  ;;  %v1179_v10 = vld [vmem:[#allocation8] sm:$0xf] }
 0x315   : > { %v5491_v13 = vpop.permute.xlu1 %5490  ;;  %v5496_v14 = vpop.permute.xlu0 %5495  ;;  %v1127_v15 = vpack.c.bf16 %v1090_v12, %v1081_v3 }
 0x316   : > { %v5493_v16 = vunpack.i.h.bf16 %v5491_v13  ;;  %v5492_v17 = vunpack.i.l.bf16 %v5491_v13  ;;  %v5498_v18 = vunpack.i.h.bf16 %v5496_v14  ;;  %v5497_v19 = vunpack.i.l.bf16 %v5496_v14 }
 0x317   : > { %5016 = vmatpush3.bf16.msra.mxu0 %v1127_v15 }
 0x318   : > { %5017 = vmatprep.subr.bf16.mxu0 %v7029_v0  ;;  %v1104_v21 = vsel %vm8637_vm6, %v5492_v17, %v5493_v16  ;;  %v1111_v29 = vsel %vm8636_vm7, %v5497_v19, %v5498_v18 }
 0x319   : > { %v5501_v22 = vpop.permute.xlu1 %5500  ;;  %v5506_v23 = vpop.permute.xlu0 %5505  ;;  %v1128_v24 = vpack.c.bf16 %v1104_v21, %v1097_v20 }
 0x31a   : > { %v5503_v25 = vunpack.i.h.bf16 %v5501_v22  ;;  %v5502_v26 = vunpack.i.l.bf16 %v5501_v22  ;;  %v5508_v27 = vunpack.i.h.bf16 %v5506_v23  ;;  %v5507_v28 = vunpack.i.l.bf16 %v5506_v23 }
 0x31b   : > { %5018 = vmatpush3.bf16.msra.mxu0 %v1128_v24 }
 0x31c   : > { %5019 = vmatprep.subr.bf16.mxu0 %v7029_v0  ;;  %v1118_v30 = vsel %vm8635_vm8, %v5502_v26, %v5503_v25  ;;  %v1125_v31 = vsel %vm8630_vm9, %v5507_v28, %v5508_v27 }
 0x31d   : > { %v1129_v32 = vpack.c.bf16 %v1118_v30, %v1111_v29  ;;  %v1130_v33 = vpack.c.bf16 %v1125_v31, %v1125_v31 }
 0x31f   : > { %5020 = vmatpush3.bf16.msra.mxu0 %v1129_v32  ;;  %v1137_v34 = vsel %vm8645_vm10, %v1130_v33, 0 }
 0x320   : > { %5021 = vmatprep.subr.bf16.mxu0 %v7029_v0 }
 0x323   : > { %5022 = vmatpush3.bf16.msra.mxu0 %v1137_v34 }
 0x324   : > { %5039 = vmatprep.subr.bf16.mxu0 %v7029_v0 }
 0x326   : > { %5024 = vmatmul.mubr.msk.bf16.vlgmr.msra.gmra.mrb[0].mxu0 %vm8629_vm11, %v1069_v35 }
 0x327   : > { %5047 = vmatprep.mubr.msk.bf16.mxu0 %vm7035_vm3, %v7029_v0 }
 0x3f9   : > { %v1173_v36 = vpop.f32.mrb[0].mxu0 }
 0x3fa   : > { %1183 = vrot.lane.b32.xlu1 %v1173_v36, %s8638_s0  ;;  %v5025_v37 = vpop.f32.mrb[1].mxu0 }
 0x3fb   : > { %v1176_v38 = vpop.f32.mrb[2].mxu0 }
 0x3fc   : > { %v5026_v39 = vpop.f32.mrb[3].mxu0 }
 0x46c   : > { %v1184_v40 = vpop.permute.xlu1 %1183 }
 0x46d   : > { %1186 = vst.msk [vmem:[#allocation2] sm:$0xff] %vm1077_vm1, %v1184_v40 }
 0x46e   : > { %1187 = vst.msk [vmem:[#allocation2 + $0x8] sm:$0xff] %vm1079_vm2, %v1184_v40 }
 0x474   : > { %v1188_v41 = vld [vmem:[#allocation2] sm:$0xff] }
 0x475   : > { %v1189_v42 = vld [vmem:[#allocation2 + $0x8] sm:$0xff]  ;;  %1279 = vst [vmem:[#allocation2] sm:$0xff] %v7029_v0 }
 0x476   : > { %1280 = vst.msk [vmem:[#allocation2 + $0x8] sm:$0xff] %vm1071_vm0, %v7029_v0  ;;  %v5514_v43 = vpack.i.bf16 %v1189_v42, %v1188_v41 }
 0x478   : > { %5515 = vrot.lane.b32.xlu1 %v5514_v43, %s8627_s20  ;;  %5510 = vrot.lane.b32.xlu0 %v5514_v43, %s8621_s7 }
 0x47c   : > { %5525 = vrot.lane.b32.xlu1 %v5514_v43, %s8623_s11  ;;  %5520 = vrot.lane.b32.xlu0 %v5514_v43, %s8633_s17 }
 0x480   : > { %5535 = vrot.lane.b32.xlu1 %v5514_v43, %s8631_s6  ;;  %5530 = vrot.lane.b32.xlu0 %v5514_v43, %s8625_s28 }
 0x4ea   : > { %v5516_v44 = vpop.permute.xlu1 %5515  ;;  %v5511_v45 = vpop.permute.xlu0 %5510 }
 0x4eb   : > { %v5513_v46 = vunpack.i.h.bf16 %v5511_v45  ;;  %v5512_v47 = vunpack.i.l.bf16 %v5511_v45  ;;  %v5518_v48 = vunpack.i.h.bf16 %v5516_v44  ;;  %v5517_v49 = vunpack.i.l.bf16 %v5516_v44 }
 0x4ed   : > { %v1196_v50 = vsel %vm8644_vm4, %v5512_v47, %v5513_v46  ;;  %v1202_v58 = vsel %vm8640_vm5, %v5517_v49, %v5518_v48  ;;  %v1278_v48 = vld [vmem:[#allocation9] sm:$0xf] }
 0x4ee   : > { %v5526_v51 = vpop.permute.xlu1 %5525  ;;  %v5521_v52 = vpop.permute.xlu0 %5520  ;;  %v1228_v53 = vpack.c.bf16 %v1196_v50, %v1188_v41 }
 0x4ef   : > { %v5523_v54 = vunpack.i.h.bf16 %v5521_v52  ;;  %v5522_v55 = vunpack.i.l.bf16 %v5521_v52  ;;  %v5528_v56 = vunpack.i.h.bf16 %v5526_v51  ;;  %v5527_v57 = vunpack.i.l.bf16 %v5526_v51 }
 0x4f0   : > { %5028 = vmatpush3.bf16.msra.mxu1 %v1228_v53 }
 0x4f1   : > { %5029 = vmatprep.subr.bf16.mxu1 %v7029_v0  ;;  %v1208_v59 = vsel %vm8637_vm6, %v5522_v55, %v5523_v54  ;;  %v1214_v4 = vsel %vm8636_vm7, %v5527_v57, %v5528_v56 }
 0x4f2   : > { %v5536_v60 = vpop.permute.xlu1 %5535  ;;  %v5531_v61 = vpop.permute.xlu0 %5530  ;;  %v1229_v62 = vpack.c.bf16 %v1208_v59, %v1202_v58  ;;  %v6380_v58 = vld [vmem:[%s8727_s4] sm:$0xff]   ;;  %v6381_v59 = vld [vmem:[%s8727_s4 + $0x8] sm:$0xff]  }
 0x4f3   : > { %v5538_v63 = vunpack.i.h.bf16 %v5536_v60  ;;  %v5537_v1 = vunpack.i.l.bf16 %v5536_v60  ;;  %v5533_v2 = vunpack.i.h.bf16 %v5531_v61  ;;  %v5532_v3 = vunpack.i.l.bf16 %v5531_v61  ;;  %v6382_v60 = vld [vmem:[%s8727_s4 + $0x10] sm:$0xff]   ;;  %v6383_v61 = vld [vmem:[%s8727_s4 + $0x18] sm:$0xff]  }
 0x4f4   : > { %5030 = vmatpush3.bf16.msra.mxu1 %v1229_v62  ;;  %v6384_v62 = vld [vmem:[%s8727_s4 + $0x20] sm:$0xff]  }
 0x4f5   : > { %5031 = vmatprep.subr.bf16.mxu1 %v7029_v0  ;;  %v1220_v5 = vsel %vm8635_vm8, %v5532_v3, %v5533_v2  ;;  %v1226_v6 = vsel %vm8630_vm9, %v5537_v1, %v5538_v63  ;;  %v6385_v63 = vld [vmem:[%s8727_s4 + $0x28] sm:$0xff]  }
 0x4f6   : > { %v1230_v7 = vpack.c.bf16 %v1220_v5, %v1214_v4  ;;  %v1231_v8 = vpack.c.bf16 %v1226_v6, %v1226_v6 }
 0x4f8   : > { %5032 = vmatpush3.bf16.msra.mxu1 %v1230_v7  ;;  %v1236_v9 = vsel %vm8645_vm10, %v1231_v8, 0 }
 0x4f9   : > { %5033 = vmatprep.subr.bf16.mxu1 %v7029_v0 }
 0x4fc   : > { %5034 = vmatpush3.bf16.msra.mxu1 %v1236_v9 }
 0x4fd   : > { %5051 = vmatprep.subr.bf16.mxu1 %v7029_v0 }
 0x4ff   : > { %5036 = vmatmul.mubr.msk.bf16.vlgmr.msra.gmra.mrb[0].mxu1 %vm8629_vm11, %v1179_v10 }
 0x500   : > { %5059 = vmatprep.mubr.msk.bf16.mxu1 %vm7035_vm3, %v7029_v0 }
 0x5d2   : > { %v1272_v11 = vpop.f32.mrb[0].mxu1 }
 0x5d3   : > { %1282 = vrot.lane.b32.xlu0 %v1272_v11, %s8638_s0  ;;  %v5037_v12 = vpop.f32.mrb[1].mxu1 }
 0x5d4   : > { %v1275_v13 = vpop.f32.mrb[2].mxu1 }
 0x5d5   : > { %v5038_v14 = vpop.f32.mrb[3].mxu1 }
 0x645   : > { %v7717_v15 = vpop.permute.xlu0 %1282 }
 0x646   : > { %1285 = vst.msk [vmem:[#allocation2] sm:$0xff] %vm1077_vm1, %v7717_v15 }
 0x647   : > { %1286 = vst.msk [vmem:[#allocation2 + $0x8] sm:$0xff] %vm1079_vm2, %v7717_v15 }
 0x64d   : > { %v1287_v16 = vld [vmem:[#allocation2] sm:$0xff] }
 0x64e   : > { %v1288_v17 = vld [vmem:[#allocation2 + $0x8] sm:$0xff]  ;;  %1380 = vst [vmem:[#allocation2] sm:$0xff] %v7029_v0 }
 0x64f   : > { %v5544_v18 = vpack.i.bf16 %v1288_v17, %v1287_v16  ;;  %1381 = vst.msk [vmem:[#allocation2 + $0x8] sm:$0xff] %vm1071_vm0, %v7029_v0 }
 0x651   : > { %5545 = vrot.lane.b32.xlu0 %v5544_v18, %s8627_s20  ;;  %5540 = vrot.lane.b32.xlu1 %v5544_v18, %s8621_s7 }
 0x655   : > { %5555 = vrot.lane.b32.xlu0 %v5544_v18, %s8623_s11  ;;  %5550 = vrot.lane.b32.xlu1 %v5544_v18, %s8633_s17 }
 0x659   : > { %5565 = vrot.lane.b32.xlu0 %v5544_v18, %s8631_s6  ;;  %5560 = vrot.lane.b32.xlu1 %v5544_v18, %s8625_s28 }
 0x6c3   : > { %v5546_v19 = vpop.permute.xlu0 %5545  ;;  %v5541_v20 = vpop.permute.xlu1 %5540 }
 0x6c4   : > { %v5543_v21 = vunpack.i.h.bf16 %v5541_v20  ;;  %v5542_v22 = vunpack.i.l.bf16 %v5541_v20  ;;  %v5548_v23 = vunpack.i.h.bf16 %v5546_v19  ;;  %v5547_v24 = vunpack.i.l.bf16 %v5546_v19 }
 0x6c6   : > { %v1295_v25 = vsel %vm8644_vm4, %v5542_v22, %v5543_v21  ;;  %v1301_v31 = vsel %vm8640_vm5, %v5547_v24, %v5548_v23 }
 0x6c7   : > { %v5556_v26 = vpop.permute.xlu0 %5555  ;;  %v5551_v27 = vpop.permute.xlu1 %5550  ;;  %v1327_v28 = vpack.c.bf16 %v1295_v25, %v1287_v16 }
 0x6c8   : > { %v5553_v29 = vunpack.i.h.bf16 %v5551_v27  ;;  %v5552_v30 = vunpack.i.l.bf16 %v5551_v27  ;;  %v5558_v32 = vunpack.i.h.bf16 %v5556_v26  ;;  %v5557_v33 = vunpack.i.l.bf16 %v5556_v26 }
 0x6c9   : > { %5040 = vmatpush3.bf16.msra.mxu0 %v1327_v28 }
 0x6ca   : > { %v1307_v34 = vsel %vm8637_vm6, %v5552_v30, %v5553_v29  ;;  %5041 = vmatprep.subr.bf16.mxu0 %v7029_v0  ;;  %v1313_v42 = vsel %vm8636_vm7, %v5557_v33, %v5558_v32  ;;  %v6386_v32 = vld [vmem:[%s8727_s4 + $0x30] sm:$0xff]   ;;  %v6387_v33 = vld [vmem:[%s8727_s4 + $0x38] sm:$0xff]   ;;  %s8738_s4 = sld [smem:[#allocation63_spill]] }
 0x6cb   : > { %v5566_v35 = vpop.permute.xlu0 %5565  ;;  %v5561_v36 = vpop.permute.xlu1 %5560  ;;  %v1328_v37 = vpack.c.bf16 %v1307_v34, %v1301_v31  ;;  %v6379_v31 = vld [vmem:[#allocation11] sm:$0xff]  }
 0x6cc   : > { %v5568_v38 = vunpack.i.h.bf16 %v5566_v35  ;;  %v5567_v39 = vunpack.i.l.bf16 %v5566_v35  ;;  %v5563_v40 = vunpack.i.h.bf16 %v5561_v36  ;;  %v5562_v41 = vunpack.i.l.bf16 %v5561_v36 }
 0x6cd   : > { %5042 = vmatpush3.bf16.msra.mxu0 %v1328_v37 }
 0x6ce   : > { %v1319_v43 = vsel %vm8635_vm8, %v5562_v41, %v5563_v40  ;;  %5043 = vmatprep.subr.bf16.mxu0 %v7029_v0  ;;  %v1325_v44 = vsel %vm8630_vm9, %v5567_v39, %v5568_v38 }
 0x6cf   : > { %v1329_v45 = vpack.c.bf16 %v1319_v43, %v1313_v42  ;;  %v1330_v46 = vpack.c.bf16 %v1325_v44, %v1325_v44 }
 0x6d1   : > { %5044 = vmatpush3.bf16.msra.mxu0 %v1329_v45  ;;  %v1335_v47 = vsel %vm8645_vm10, %v1330_v46, 0 }
 0x6d2   : > { %5045 = vmatprep.subr.bf16.mxu0 %v7029_v0 }
 0x6d5   : > { %5046 = vmatpush3.bf16.msra.mxu0 %v1335_v47 }
 0x6d6   : > { %5063 = vmatprep.subr.bf16.mxu0 %v7029_v0 }
 0x6d8   : > { %5048 = vmatmul.mubr.msk.bf16.vlgmr.msra.gmra.mrb[4].mxu0 %vm8629_vm11, %v1278_v48 }
 0x6d9   : > { %5079 = vmatprep.mubr.msk.bf16.mxu0 %vm7035_vm3, %v7029_v0  ;;  %5064 = vmatpush3.bf16.msra.mxu0 %v6380_v58 }
 0x6da   : > { %5065 = vmatprep.subr.bf16.mxu0 %v7029_v0 }
 0x6dd   : > { %5066 = vmatpush3.bf16.msra.mxu0 %v6381_v59 }
 0x6de   : > { %5067 = vmatprep.subr.bf16.mxu0 %v7029_v0 }
 0x6e1   : > { %5068 = vmatpush3.bf16.msra.mxu0 %v6382_v60 }
 0x6e2   : > { %5069 = vmatprep.subr.bf16.mxu0 %v7029_v0 }
 0x6e5   : > { %5070 = vmatpush3.bf16.msra.mxu0 %v6383_v61 }
 0x6e6   : > { %5071 = vmatprep.subr.bf16.mxu0 %v7029_v0 }
 0x6e9   : > { %5072 = vmatpush3.bf16.msra.mxu0 %v6384_v62 }
 0x6ea   : > { %5073 = vmatprep.subr.bf16.mxu0 %v7029_v0 }
 0x6ed   : > { %5074 = vmatpush3.bf16.msra.mxu0 %v6385_v63 }
 0x6ee   : > { %5075 = vmatprep.subr.bf16.mxu0 %v7029_v0 }
 0x6f1   : > { %5076 = vmatpush3.bf16.msra.mxu0 %v6386_v32 }
 0x6f2   : > { %5077 = vmatprep.subr.bf16.mxu0 %v7029_v0 }
 0x6f5   : > { %5078 = vmatpush3.bf16.msra.mxu0 %v6387_v33 }
 0x6f6   : > { %5119 = vmatprep.subr.bf16.mxu0 %v7029_v0 }
 0x7ab   : > { %v1371_v49 = vpop.f32.mrb[4].mxu0 }
 0x7ac   : > { %v1377_v50 = vmax.f32 %v1371_v49, 0.0  ;;  %v5049_v51 = vpop.f32.mrb[5].mxu0 }
 0x7ad   : > { %v1374_v52 = vpop.f32.mrb[6].mxu0 }
 0x7ae   : > { %1383 = vrot.lane.b32.xlu1 %v1377_v50, %s8638_s0  ;;  %v5050_v53 = vpop.f32.mrb[7].mxu0 }
 0x820   : > { %v1384_v54 = vpop.permute.xlu1 %1383 }
 0x821   : > { %1386 = vst.msk [vmem:[#allocation2] sm:$0xff] %vm1077_vm1, %v1384_v54 }
 0x822   : > { %1387 = vst.msk [vmem:[#allocation2 + $0x8] sm:$0xff] %vm1079_vm2, %v1384_v54 }
 0x828   : > { %v1388_v55 = vld [vmem:[#allocation2] sm:$0xff] }
 0x829   : > { %v1389_v56 = vld [vmem:[#allocation2 + $0x8] sm:$0xff]  ;;  %1595 = vst.msk [vmem:[#allocation2] sm:$0xff] %vm1594_vm12, %v7029_v0 }
 0x82a   : > { %v5574_v57 = vpack.i.bf16 %v1389_v56, %v1388_v55 }
 0x82c   : > { %5575 = vrot.lane.b32.xlu1 %v5574_v57, %s8627_s20  ;;  %5570 = vrot.lane.b32.xlu0 %v5574_v57, %s8621_s7  ;;  %s8730_s7 = smov 123  }
 0x830   : > { %5585 = vrot.lane.b32.xlu1 %v5574_v57, %s8623_s11  ;;  %5580 = vrot.lane.b32.xlu0 %v5574_v57, %s8633_s17  ;;  %s8737_s11 = smov 3  }
 0x834   : > { %5595 = vrot.lane.b32.xlu1 %v5574_v57, %s8631_s6  ;;  %5590 = vrot.lane.b32.xlu0 %v5574_v57, %s8625_s28 }
 0x89e   : > { %v5576_v1 = vpop.permute.xlu1 %5575  ;;  %v5571_v2 = vpop.permute.xlu0 %5570 }
 0x89f   : > { %v5573_v3 = vunpack.i.h.bf16 %v5571_v2  ;;  %v5572_v4 = vunpack.i.l.bf16 %v5571_v2  ;;  %v5578_v5 = vunpack.i.h.bf16 %v5576_v1  ;;  %v5577_v6 = vunpack.i.l.bf16 %v5576_v1 }
 0x8a1   : > { %v1396_v7 = vsel %vm8644_vm4, %v5572_v4, %v5573_v3  ;;  %v1402_v13 = vsel %vm8640_vm5, %v5577_v6, %v5578_v5  ;;  %vm2359_vm5 = vcmask 785408   ;;  %vm2628_vm4 = vcmask 130048  }
 0x8a2   : > { %v5586_v8 = vpop.permute.xlu1 %5585  ;;  %v5581_v9 = vpop.permute.xlu0 %5580  ;;  %v1428_v10 = vpack.c.bf16 %v1396_v7, %v1388_v55 }
 0x8a3   : > { %v5583_v11 = vunpack.i.h.bf16 %v5581_v9  ;;  %v5582_v12 = vunpack.i.l.bf16 %v5581_v9  ;;  %v5588_v14 = vunpack.i.h.bf16 %v5586_v8  ;;  %v5587_v16 = vunpack.i.l.bf16 %v5586_v8 }
 0x8a4   : > { %5052 = vmatpush3.bf16.msra.mxu1 %v1428_v10 }
 0x8a5   : > { %v1408_v17 = vsel %vm8637_vm6, %v5582_v12, %v5583_v11  ;;  %5053 = vmatprep.subr.bf16.mxu1 %v7029_v0  ;;  %v1414_v25 = vsel %vm8636_vm7, %v5587_v16, %v5588_v14  ;;  %v6388_v12 = vld [vmem:[#allocation12] sm:$0xff]   ;;  %vm2221_vm7 = vcmask 179200   ;;  %vm2242_vm6 = vcmask 154648  }
 0x8a6   : > { %v5596_v18 = vpop.permute.xlu1 %5595  ;;  %v5591_v19 = vpop.permute.xlu0 %5590  ;;  %v1429_v20 = vpack.c.bf16 %v1408_v17, %v1402_v13  ;;  %2937 = vst.msk [vmem:[#allocation2 + $0x40] sm:$0xff] %vm2221_vm7, %v7029_v0  ;;  %2224 = vst.msk [vmem:[#allocation2 + $0x20] sm:$0xff] %vm2221_vm7, %v7029_v0 }
 0x8a7   : > { %v5598_v21 = vunpack.i.h.bf16 %v5596_v18  ;;  %v5597_v22 = vunpack.i.l.bf16 %v5596_v18  ;;  %v5593_v23 = vunpack.i.h.bf16 %v5591_v19  ;;  %v5592_v24 = vunpack.i.l.bf16 %v5591_v19  ;;  %2225 = vst.msk [vmem:[#allocation2 + $0x30] sm:$0xff] %vm2221_vm7, %v7029_v0  ;;  %2938 = vst.msk [vmem:[#allocation2 + $0x50] sm:$0xff] %vm2221_vm7, %v7029_v0 }
 0x8a8   : > { %5054 = vmatpush3.bf16.msra.mxu1 %v1429_v20  ;;  %2939 = vst.msk [vmem:[#allocation2 + $0x60] sm:$0xff] %vm2221_vm7, %v7029_v0  ;;  %2940 = vst.msk [vmem:[#allocation2 + $0x70] sm:$0xff] %vm2221_vm7, %v7029_v0 }
 0x8a9   : > { %v1420_v26 = vsel %vm8635_vm8, %v5592_v24, %v5593_v23  ;;  %5055 = vmatprep.subr.bf16.mxu1 %v7029_v0  ;;  %v1426_v27 = vsel %vm8630_vm9, %v5597_v22, %v5598_v21  ;;  %vm1910_vm9 = vcmask 285720   ;;  %vm2161_vm8 = vcmask 261120  }
 0x8aa   : > { %v1430_v28 = vpack.c.bf16 %v1420_v26, %v1414_v25  ;;  %v1431_v29 = vpack.c.bf16 %v1426_v27, %v1426_v27  ;;  %v6390_v26 = vld [vmem:[%s8731_s12] sm:$0xff]   ;;  %v6391_v27 = vld [vmem:[%s8731_s12 + $0x8] sm:$0xff]  }
 0x8ac   : > { %5056 = vmatpush3.bf16.msra.mxu1 %v1430_v28  ;;  %v1441_v30 = vsel %vm8645_vm10, %v1431_v29, 0 }
 0x8ad   : > { %5057 = vmatprep.subr.bf16.mxu1 %v7029_v0 }
 0x8b0   : > { %5058 = vmatpush3.bf16.msra.mxu1 %v1441_v30 }
 0x8b1   : > { %5083 = vmatprep.subr.bf16.mxu1 %v7029_v0 }
 0x8b3   : > { %5060 = vmatmul.mubr.msk.bf16.vlgmr.msra.gmra.mrb[4].mxu1 %vm8629_vm11, %v6379_v31  ;;  %vm1899_vm11 = vcmask 310272  }
 0x8b4   : > { %5097 = vmatprep.mubr.msk.bf16.mxu1 %vm7035_vm3, %v7029_v0 }
 0x986   : > { %v1477_v34 = vpop.f32.mrb[4].mxu1 }
 0x987   : > { %v5061_v35 = vpop.f32.mrb[5].mxu1  ;;  %v1484_v37 = vmax.f32 %v1477_v34, 0.0 }
 0x988   : > { %v1480_v36 = vpop.f32.mrb[6].mxu1 }
 0x989   : > { %v1485_v38 = vmax.f32 %v1480_v36, 0.0  ;;  %v5062_v39 = vpop.f32.mrb[7].mxu1 }
 0x98b   : > { %v1486_v40 = vpack.c.bf16 %v1485_v38, %v1484_v37 }
 0x98d   : > { %5080 = vmatmul.mubr.bf16.vlgmr.msra.gmra.mrb[8].mxu0 %v1486_v40 }
 0x98e   : > { %5127 = vmatprep.mubr.msk.bf16.mxu0 %vm7035_vm3, %v7029_v0  ;;  %5120 = vmatpush3.bf16.msra.mxu0 %v6390_v26 }
 0x98f   : > { %5121 = vmatprep.subr.bf16.mxu0 %v7029_v0 }
 0x992   : > { %5122 = vmatpush3.bf16.msra.mxu0 %v6391_v27 }
 0x993   : > { %5123 = vmatprep.subr.bf16.mxu0 %v7029_v0 }
 0xa60   : > { %v1585_v41 = vpop.f32.mrb[8].mxu0 }
 0xa61   : > { %1599 = vrot.lane.b32.xlu0 %v1585_v41, %s8638_s0  ;;  %v5081_v42 = vpop.f32.mrb[9].mxu0 }
 0xa62   : > { %v1588_v43 = vpop.f32.mrb[10].mxu0 }
 0xa63   : > { %1601 = vrot.lane.b32.xlu1 %v1588_v43, %s8638_s0  ;;  %v5082_v44 = vpop.f32.mrb[11].mxu0 }
 0xad3   : > { %v7809_v45 = vpop.permute.xlu0 %1599 }
 0xad4   : > { %1606 = vst.msk [vmem:[#allocation2] sm:$0xff] %vm1605_vm13, %v7809_v45 }
 0xad5   : > { %v7813_v46 = vpop.permute.xlu1 %1601 }
 0xad6   : > { %1607 = vst.msk [vmem:[#allocation2 + $0x10] sm:$0xff] %vm1605_vm13, %v7813_v46 }
 0xadb   : > { %v1608_v47 = vld [vmem:[#allocation2] sm:$0xff] }
 0xadc   : > { %1709 = vst.msk [vmem:[#allocation2] sm:$0xff] %vm1594_vm12, %v7029_v0 }
 0xadd   : > { %v1609_v48 = vld [vmem:[#allocation2 + $0x10] sm:$0xff] }
 0xade   : > { %v5604_v49 = vpack.i.bf16 %v1609_v48, %v1608_v47  ;;  %1710 = vst.msk [vmem:[#allocation2 + $0x10] sm:$0xff] %vm1594_vm12, %v7029_v0  ;;  %v1648_v50 = vpack.c.bf16 %v1609_v48, %v1608_v47 }
 0xae0   : > { %5605 = vrot.lane.b32.xlu1 %v5604_v49, %s8627_s20  ;;  %5600 = vrot.lane.b32.xlu0 %v5604_v49, %s8728_s1 }
 0xae1   : > { %5084 = vmatpush3.bf16.msra.mxu1 %v1648_v50 }
 0xae2   : > { %5085 = vmatprep.subr.bf16.mxu1 %v7029_v0 }
 0xae4   : > { %5615 = vrot.lane.b32.xlu1 %v5604_v49, %s8729_s16  ;;  %5610 = vrot.lane.b32.xlu0 %v5604_v49, %s8633_s17 }
 0xae8   : > { %5625 = vrot.lane.b32.xlu1 %v5604_v49, %s8631_s6  ;;  %5620 = vrot.lane.b32.xlu0 %v5604_v49, %s8730_s7 }
 0xb52   : > { %v5606_v51 = vpop.permute.xlu1 %5605  ;;  %v5601_v52 = vpop.permute.xlu0 %5600 }
 0xb53   : > { %v5603_v53 = vunpack.i.h.bf16 %v5601_v52  ;;  %v5602_v54 = vunpack.i.l.bf16 %v5601_v52  ;;  %v5608_v55 = vunpack.i.h.bf16 %v5606_v51  ;;  %v5607_v56 = vunpack.i.l.bf16 %v5606_v51 }
 0xb55   : > { %v1649_v57 = vpack.c.bf16 %v5603_v53, %v5602_v54  ;;  %v1650_v59 = vpack.c.bf16 %v5608_v55, %v5607_v56  ;;  %v6389_v54 = vld [vmem:[#allocation14] sm:$0xff]   ;;  %v6393_v56 = vld [vmem:[%s8731_s12 + $0x18] sm:$0xff]  }
 0xb56   : > { %v5611_v58 = vpop.permute.xlu0 %5610  ;;  %v5616_v62 = vpop.permute.xlu1 %5615  ;;  %v6392_v55 = vld [vmem:[%s8731_s12 + $0x10] sm:$0xff]   ;;  %s8740_s12 = sld [smem:[#allocation52_spill]] }
 0xb57   : > { %5086 = vmatpush3.bf16.msra.mxu1 %v1649_v57  ;;  %v5613_v60 = vunpack.i.h.bf16 %v5611_v58  ;;  %v5612_v61 = vunpack.i.l.bf16 %v5611_v58  ;;  %v5618_v63 = vunpack.i.h.bf16 %v5616_v62  ;;  %v5617_v1 = vunpack.i.l.bf16 %v5616_v62  ;;  %5124 = vmatpush3.bf16.msra.mxu0 %v6392_v55 }
 0xb58   : > { %5087 = vmatprep.subr.bf16.mxu1 %v7029_v0  ;;  %5125 = vmatprep.subr.bf16.mxu0 %v7029_v0 }
 0xb59   : > { %v1651_v2 = vpack.c.bf16 %v5613_v60, %v5612_v61  ;;  %v1652_v4 = vpack.c.bf16 %v5618_v63, %v5617_v1 }
 0xb5a   : > { %v5621_v3 = vpop.permute.xlu0 %5620  ;;  %v5626_v7 = vpop.permute.xlu1 %5625 }
 0xb5b   : > { %5088 = vmatpush3.bf16.msra.mxu1 %v1650_v59  ;;  %v5623_v5 = vunpack.i.h.bf16 %v5621_v3  ;;  %v5622_v6 = vunpack.i.l.bf16 %v5621_v3  ;;  %v5628_v8 = vunpack.i.h.bf16 %v5626_v7  ;;  %v5627_v9 = vunpack.i.l.bf16 %v5626_v7  ;;  %5126 = vmatpush3.bf16.msra.mxu0 %v6393_v56 }
 0xb5c   : > { %5089 = vmatprep.subr.bf16.mxu1 %v7029_v0  ;;  %5131 = vmatprep.subr.bf16.mxu0 %v7029_v0 }
 0xb5d   : > { %v1653_v10 = vpack.c.bf16 %v5623_v5, %v5622_v6  ;;  %v1654_v11 = vpack.c.bf16 %v5628_v8, %v5627_v9 }
 0xb5f   : > { %5090 = vmatpush3.bf16.msra.mxu1 %v1651_v2 }
 0xb60   : > { %5091 = vmatprep.subr.bf16.mxu1 %v7029_v0 }
 0xb63   : > { %5092 = vmatpush3.bf16.msra.mxu1 %v1652_v4 }
 0xb64   : > { %5093 = vmatprep.subr.bf16.mxu1 %v7029_v0 }
 0xb67   : > { %5094 = vmatpush3.bf16.msra.mxu1 %v1653_v10 }
 0xb68   : > { %5095 = vmatprep.subr.bf16.mxu1 %v7029_v0 }
 0xb6b   : > { %5096 = vmatpush3.bf16.msra.mxu1 %v1654_v11 }
 0xb6c   : > { %5101 = vmatprep.subr.bf16.mxu1 %v7029_v0 }
 0xb6e   : > { %5098 = vmatmul.mubr.msk.bf16.vlgmr.msra.gmra.mrb[8].mxu1 %vm1660_vm14, %v6388_v12 }
 0xb6f   : > { %5115 = vmatprep.mubr.msk.bf16.mxu1 %vm7035_vm3, %v7029_v0 }
 0xc41   : > { %v1698_v13 = vpop.f32.mrb[8].mxu1 }
 0xc42   : > { %v1705_v14 = vmax.f32 %v1698_v13, 0.0  ;;  %v5099_v16 = vpop.f32.mrb[9].mxu1 }
 0xc43   : > { %v1701_v17 = vpop.f32.mrb[10].mxu1 }
 0xc44   : > { %v1706_v18 = vmax.f32 %v1701_v17, 0.0  ;;  %1713 = vrot.lane.b32.xlu0 %v1705_v14, %s8638_s0  ;;  %v5100_v19 = vpop.f32.mrb[11].mxu1 }
 0xc46   : > { %1715 = vrot.lane.b32.xlu1 %v1706_v18, %s8638_s0 }
 0xcb6   : > { %v1714_v20 = vpop.permute.xlu0 %1713 }
 0xcb7   : > { %1719 = vst.msk [vmem:[#allocation2] sm:$0xff] %vm1605_vm13, %v1714_v20 }
 0xcb8   : > { %v1716_v21 = vpop.permute.xlu1 %1715 }
 0xcb9   : > { %1720 = vst.msk [vmem:[#allocation2 + $0x10] sm:$0xff] %vm1605_vm13, %v1716_v21 }
 0xcbe   : > { %v1721_v22 = vld [vmem:[#allocation2] sm:$0xff] }
 0xcbf   : > { %1900 = vst.msk [vmem:[#allocation2] sm:$0xff] %vm1899_vm11, %v7029_v0 }
 0xcc0   : > { %v1722_v23 = vld [vmem:[#allocation2 + $0x10] sm:$0xff] }
 0xcc1   : > { %v5634_v24 = vpack.i.bf16 %v1722_v23, %v1721_v22  ;;  %v1761_v25 = vpack.c.bf16 %v1722_v23, %v1721_v22  ;;  %1901 = vst.msk [vmem:[#allocation2 + $0x10] sm:$0xff] %vm1899_vm11, %v7029_v0 }
 0xcc3   : > { %5635 = vrot.lane.b32.xlu1 %v5634_v24, %s8627_s20  ;;  %5630 = vrot.lane.b32.xlu0 %v5634_v24, %s8728_s1  ;;  %s8732_s20 = smov 126  }
 0xcc4   : > { %5102 = vmatpush3.bf16.msra.mxu1 %v1761_v25 }
 0xcc5   : > { %5103 = vmatprep.subr.bf16.mxu1 %v7029_v0 }
 0xcc7   : > { %5645 = vrot.lane.b32.xlu1 %v5634_v24, %s8729_s16  ;;  %5640 = vrot.lane.b32.xlu0 %v5634_v24, %s8633_s17 }
 0xccb   : > { %5655 = vrot.lane.b32.xlu1 %v5634_v24, %s8631_s6  ;;  %5650 = vrot.lane.b32.xlu0 %v5634_v24, %s8730_s7 }
 0xd35   : > { %v5636_v28 = vpop.permute.xlu1 %5635  ;;  %v5631_v29 = vpop.permute.xlu0 %5630 }
 0xd36   : > { %v5633_v30 = vunpack.i.h.bf16 %v5631_v29  ;;  %v5632_v31 = vunpack.i.l.bf16 %v5631_v29  ;;  %v5638_v32 = vunpack.i.h.bf16 %v5636_v28  ;;  %v5637_v33 = vunpack.i.l.bf16 %v5636_v28 }
 0xd38   : > { %v1762_v34 = vpack.c.bf16 %v5633_v30, %v5632_v31  ;;  %v1763_v36 = vpack.c.bf16 %v5638_v32, %v5637_v33 }
 0xd39   : > { %v5641_v35 = vpop.permute.xlu0 %5640  ;;  %v5646_v39 = vpop.permute.xlu1 %5645 }
 0xd3a   : > { %5104 = vmatpush3.bf16.msra.mxu1 %v1762_v34  ;;  %v5643_v37 = vunpack.i.h.bf16 %v5641_v35  ;;  %v5642_v38 = vunpack.i.l.bf16 %v5641_v35  ;;  %v5648_v40 = vunpack.i.h.bf16 %v5646_v39  ;;  %v5647_v41 = vunpack.i.l.bf16 %v5646_v39 }
 0xd3b   : > { %5105 = vmatprep.subr.bf16.mxu1 %v7029_v0 }
 0xd3c   : > { %v1764_v42 = vpack.c.bf16 %v5643_v37, %v5642_v38  ;;  %v1765_v44 = vpack.c.bf16 %v5648_v40, %v5647_v41 }
 0xd3d   : > { %v5651_v43 = vpop.permute.xlu0 %5650  ;;  %v5656_v49 = vpop.permute.xlu1 %5655 }
 0xd3e   : > { %5106 = vmatpush3.bf16.msra.mxu1 %v1763_v36  ;;  %v5653_v47 = vunpack.i.h.bf16 %v5651_v43  ;;  %v5652_v48 = vunpack.i.l.bf16 %v5651_v43  ;;  %v5658_v50 = vunpack.i.h.bf16 %v5656_v49  ;;  %v5657_v51 = vunpack.i.l.bf16 %v5656_v49  ;;  %v6394_v36 = vld [vmem:[#allocation15] sm:$0xff]  }
 0xd3f   : > { %5107 = vmatprep.subr.bf16.mxu1 %v7029_v0 }
 0xd40   : > { %v1766_v52 = vpack.c.bf16 %v5653_v47, %v5652_v48  ;;  %v1767_v53 = vpack.c.bf16 %v5658_v50, %v5657_v51  ;;  %v6395_v51 = vld [vmem:[#allocation17] sm:$0xff]  }
 0xd42   : > { %5108 = vmatpush3.bf16.msra.mxu1 %v1764_v42 }
 0xd43   : > { %5109 = vmatprep.subr.bf16.mxu1 %v7029_v0 }
 0xd46   : > { %5110 = vmatpush3.bf16.msra.mxu1 %v1765_v44 }
 0xd47   : > { %5111 = vmatprep.subr.bf16.mxu1 %v7029_v0 }
 0xd4a   : > { %5112 = vmatpush3.bf16.msra.mxu1 %v1766_v52 }
 0xd4b   : > { %5113 = vmatprep.subr.bf16.mxu1 %v7029_v0 }
 0xd4e   : > { %5114 = vmatpush3.bf16.msra.mxu1 %v1767_v53 }
 0xd51   : > { %5116 = vmatmul.mubr.msk.bf16.vlgmr.msra.gmra.mrb[12].mxu1 %vm1660_vm14, %v6389_v54 }
 0xd52   : > { %5163 = vmatprep.mubr.msk.bf16.mxu1 %vm1660_vm14, %v6395_v51 }
 0xe24   : > { %v1810_v57 = vpop.f32.mrb[12].mxu1 }
 0xe25   : > { %v5117_v58 = vpop.f32.mrb[13].mxu1  ;;  %v1817_v60 = vmax.f32 %v1810_v57, 0.0 }
 0xe26   : > { %v1813_v59 = vpop.f32.mrb[14].mxu1 }
 0xe27   : > { %v1818_v61 = vmax.f32 %v1813_v59, 0.0  ;;  %v5118_v62 = vpop.f32.mrb[15].mxu1 }
 0xe29   : > { %v1819_v63 = vpack.c.bf16 %v1818_v61, %v1817_v60 }
 0xe2b   : > { %5128 = vmatmul.mubr.msk.bf16.vlgmr.msra.gmra.mrb[12].mxu0 %vm1852_vm15, %v1819_v63 }
 0xe2c   : > { %5145 = vmatprep.mubr.msk.bf16.mxu0 %vm7035_vm3, %v7029_v0 }
 0xefe   : > { %v1890_v1 = vpop.f32.mrb[12].mxu0 }
 0xeff   : > { %1904 = vrot.lane.b32.xlu0 %v1890_v1, %s8638_s0  ;;  %v5129_v2 = vpop.f32.mrb[13].mxu0 }
 0xf00   : > { %v1893_v3 = vpop.f32.mrb[14].mxu0 }
 0xf01   : > { %1906 = vrot.lane.b32.xlu1 %v1893_v3, %s8638_s0  ;;  %v5130_v4 = vpop.f32.mrb[15].mxu0 }
 0xf71   : > { %v7879_v5 = vpop.permute.xlu0 %1904 }
 0xf72   : > { %1911 = vst.msk [vmem:[#allocation2] sm:$0xff] %vm1910_vm9, %v7879_v5 }
 0xf73   : > { %v7883_v6 = vpop.permute.xlu1 %1906 }
 0xf74   : > { %1912 = vst.msk [vmem:[#allocation2 + $0x10] sm:$0xff] %vm1910_vm9, %v7883_v6 }
 0xf79   : > { %v1913_v7 = vld [vmem:[#allocation2] sm:$0xff] }
 0xf7a   : > { %2015 = vst.msk [vmem:[#allocation2] sm:$0xff] %vm1899_vm11, %v7029_v0 }
 0xf7b   : > { %v1914_v8 = vld [vmem:[#allocation2 + $0x10] sm:$0xff] }
 0xf7c   : > { %v5664_v9 = vpack.i.bf16 %v1914_v8, %v1913_v7  ;;  %2016 = vst.msk [vmem:[#allocation2 + $0x10] sm:$0xff] %vm1899_vm11, %v7029_v0  ;;  %v1953_v10 = vpack.c.bf16 %v1914_v8, %v1913_v7 }
 0xf7e   : > { %5665 = vrot.lane.b32.xlu1 %v5664_v9, %s8732_s20  ;;  %5660 = vrot.lane.b32.xlu0 %v5664_v9, %s8728_s1 }
 0xf7f   : > { %5132 = vmatpush3.bf16.msra.mxu0 %v1953_v10 }
 0xf80   : > { %5133 = vmatprep.subr.bf16.mxu0 %v7029_v0 }
 0xf82   : > { %5675 = vrot.lane.b32.xlu1 %v5664_v9, %s8729_s16  ;;  %5670 = vrot.lane.b32.xlu0 %v5664_v9, %s8633_s17 }
 0xf86   : > { %5685 = vrot.lane.b32.xlu1 %v5664_v9, %s8631_s6  ;;  %5680 = vrot.lane.b32.xlu0 %v5664_v9, %s8730_s7 }
 0xff0   : > { %v5666_v11 = vpop.permute.xlu1 %5665  ;;  %v5661_v12 = vpop.permute.xlu0 %5660 }
 0xff1   : > { %v5663_v13 = vunpack.i.h.bf16 %v5661_v12  ;;  %v5662_v14 = vunpack.i.l.bf16 %v5661_v12  ;;  %v5668_v16 = vunpack.i.h.bf16 %v5666_v11  ;;  %v5667_v17 = vunpack.i.l.bf16 %v5666_v11 }
 0xff3   : > { %v1954_v18 = vpack.c.bf16 %v5663_v13, %v5662_v14  ;;  %v1955_v20 = vpack.c.bf16 %v5668_v16, %v5667_v17  ;;  %v6396_v16 = vld [vmem:[#allocation17 + $0x8] sm:$0xff]  }
 0xff4   : > { %v5671_v19 = vpop.permute.xlu0 %5670  ;;  %v5676_v23 = vpop.permute.xlu1 %5675  ;;  %v6397_v17 = vld [vmem:[%s8733_s24] sm:$0xff]  }
 0xff5   : > { %5134 = vmatpush3.bf16.msra.mxu0 %v1954_v18  ;;  %v5673_v21 = vunpack.i.h.bf16 %v5671_v19  ;;  %v5672_v22 = vunpack.i.l.bf16 %v5671_v19  ;;  %v5678_v24 = vunpack.i.h.bf16 %v5676_v23  ;;  %v5677_v25 = vunpack.i.l.bf16 %v5676_v23  ;;  %v6398_v18 = vld [vmem:[%s8733_s24 + $0x8] sm:$0xff]  }
 0xff6   : > { %5135 = vmatprep.subr.bf16.mxu0 %v7029_v0 }
 0xff7   : > { %v1956_v26 = vpack.c.bf16 %v5673_v21, %v5672_v22  ;;  %v1957_v28 = vpack.c.bf16 %v5678_v24, %v5677_v25 }
 0xff8   : > { %v5681_v27 = vpop.permute.xlu0 %5680  ;;  %v5686_v31 = vpop.permute.xlu1 %5685 }
 0xff9   : > { %5136 = vmatpush3.bf16.msra.mxu0 %v1955_v20  ;;  %v5683_v29 = vunpack.i.h.bf16 %v5681_v27  ;;  %v5682_v30 = vunpack.i.l.bf16 %v5681_v27  ;;  %v5688_v32 = vunpack.i.h.bf16 %v5686_v31  ;;  %v5687_v33 = vunpack.i.l.bf16 %v5686_v31 }
 0xffa   : > { %5137 = vmatprep.subr.bf16.mxu0 %v7029_v0 }
 0xffb   : > { %v1958_v34 = vpack.c.bf16 %v5683_v29, %v5682_v30  ;;  %v1959_v35 = vpack.c.bf16 %v5688_v32, %v5687_v33  ;;  %v7038_v29 = vmov 0  }
 0xffd   : > { %5138 = vmatpush3.bf16.msra.mxu0 %v1956_v26 }
 0xffe   : > { %5139 = vmatprep.subr.bf16.mxu0 %v7029_v0 }
0x1001   : > { %5140 = vmatpush3.bf16.msra.mxu0 %v1957_v28 }
0x1002   : > { %5141 = vmatprep.subr.bf16.mxu0 %v7029_v0 }
0x1005   : > { %5142 = vmatpush3.bf16.msra.mxu0 %v1958_v34 }
0x1006   : > { %5143 = vmatprep.subr.bf16.mxu0 %v7029_v0 }
0x1009   : > { %5144 = vmatpush3.bf16.msra.mxu0 %v1959_v35 }
0x100a   : > { %5167 = vmatprep.subr.bf16.mxu0 %v6397_v17 }
0x100c   : > { %5146 = vmatmul.mubr.msk.bf16.vlgmr.msra.gmra.mrb[16].mxu0 %vm1660_vm14, %v6394_v36 }
0x100d   : > { %5168 = vmatpush3.bf16.msra.mxu0 %v6397_v17 }
0x100e   : > { %5169 = vmatprep.subr.bf16.mxu0 %v6398_v18 }
0x1011   : > { %5170 = vmatpush3.bf16.msra.mxu0 %v6398_v18 }
0x1012   : > { %2366 = vmatprep.subr.bf16.mxu0 %v7038_v29 }
0x10df   : > { %v2002_v37 = vpop.f32.mrb[16].mxu0 }
0x10e0   : > { %v2009_v38 = vmax.f32 %v2002_v37, 0.0  ;;  %v5147_v39 = vpop.f32.mrb[17].mxu0 }
0x10e1   : > { %v2005_v40 = vpop.f32.mrb[18].mxu0 }
0x10e2   : > { %v2010_v41 = vmax.f32 %v2005_v40, 0.0  ;;  %2019 = vrot.lane.b32.xlu0 %v2009_v38, %s8638_s0  ;;  %v5148_v42 = vpop.f32.mrb[19].mxu0 }
0x10e4   : > { %2021 = vrot.lane.b32.xlu1 %v2010_v41, %s8638_s0 }
0x1154   : > { %v2020_v43 = vpop.permute.xlu0 %2019 }
0x1155   : > { %2025 = vst.msk [vmem:[#allocation2] sm:$0xff] %vm1910_vm9, %v2020_v43 }
0x1156   : > { %v2022_v44 = vpop.permute.xlu1 %2021 }
0x1157   : > { %2026 = vst.msk [vmem:[#allocation2 + $0x10] sm:$0xff] %vm1910_vm9, %v2022_v44 }
0x115c   : > { %v2027_v47 = vld [vmem:[#allocation2] sm:$0xff] }
0x115d   : > { %2222 = vst.msk [vmem:[#allocation2] sm:$0xff] %vm2221_vm7, %v7029_v0 }
0x115e   : > { %v2028_v48 = vld [vmem:[#allocation2 + $0x10] sm:$0xff] }
0x115f   : > { %v5694_v49 = vpack.i.bf16 %v2028_v48, %v2027_v47  ;;  %v2067_v50 = vpack.c.bf16 %v2028_v48, %v2027_v47  ;;  %2223 = vst.msk [vmem:[#allocation2 + $0x10] sm:$0xff] %vm2221_vm7, %v7029_v0 }
0x1161   : > { %5695 = vrot.lane.b32.xlu1 %v5694_v49, %s8732_s20  ;;  %5690 = vrot.lane.b32.xlu0 %v5694_v49, %s8728_s1 }
0x1162   : > { %5149 = vmatprep.subr.bf16.mxu1 %v2067_v50 }
0x1163   : > { %5150 = vmatpush3.bf16.msra.mxu1 %v2067_v50 }
0x1165   : > { %5705 = vrot.lane.b32.xlu1 %v5694_v49, %s8729_s16  ;;  %5700 = vrot.lane.b32.xlu0 %v5694_v49, %s8633_s17  ;;  %s8734_s17 = smov 125  }
0x1169   : > { %5715 = vrot.lane.b32.xlu1 %v5694_v49, %s8631_s6  ;;  %5710 = vrot.lane.b32.xlu0 %v5694_v49, %s8730_s7  ;;  %s8735_s6 = smov 122  }
0x11d3   : > { %v5696_v52 = vpop.permute.xlu1 %5695  ;;  %v5691_v53 = vpop.permute.xlu0 %5690 }
0x11d4   : > { %v5698_v54 = vunpack.i.h.bf16 %v5696_v52  ;;  %v5697_v55 = vunpack.i.l.bf16 %v5696_v52  ;;  %v5693_v56 = vunpack.i.h.bf16 %v5691_v53  ;;  %v5692_v57 = vunpack.i.l.bf16 %v5691_v53 }
0x11d6   : > { %v2068_v58 = vpack.c.bf16 %v5693_v56, %v5692_v57  ;;  %v2069_v62 = vpack.c.bf16 %v5698_v54, %v5697_v55 }
0x11d7   : > { %v5701_v59 = vpop.permute.xlu0 %5700  ;;  %v5706_v63 = vpop.permute.xlu1 %5705 }
0x11d8   : > { %v5703_v60 = vunpack.i.h.bf16 %v5701_v59  ;;  %v5702_v61 = vunpack.i.l.bf16 %v5701_v59  ;;  %5151 = vmatprep.subr.bf16.mxu1 %v2068_v58  ;;  %v5708_v1 = vunpack.i.h.bf16 %v5706_v63  ;;  %v5707_v2 = vunpack.i.l.bf16 %v5706_v63 }
0x11d9   : > { %5152 = vmatpush3.bf16.msra.mxu1 %v2068_v58 }
0x11da   : > { %5153 = vmatprep.subr.bf16.mxu1 %v2069_v62  ;;  %v2070_v3 = vpack.c.bf16 %v5703_v60, %v5702_v61  ;;  %v2071_v9 = vpack.c.bf16 %v5708_v1, %v5707_v2 }
0x11db   : > { %v5711_v4 = vpop.permute.xlu0 %5710  ;;  %v5716_v10 = vpop.permute.xlu1 %5715 }
0x11dc   : > { %v5713_v7 = vunpack.i.h.bf16 %v5711_v4  ;;  %v5712_v8 = vunpack.i.l.bf16 %v5711_v4  ;;  %v5718_v11 = vunpack.i.h.bf16 %v5716_v10  ;;  %v5717_v12 = vunpack.i.l.bf16 %v5716_v10 }
0x11dd   : > { %5154 = vmatpush3.bf16.msra.mxu1 %v2069_v62 }
0x11de   : > { %5155 = vmatprep.subr.bf16.mxu1 %v2070_v3  ;;  %v2072_v13 = vpack.c.bf16 %v5713_v7, %v5712_v8  ;;  %v2073_v14 = vpack.c.bf16 %v5718_v11, %v5717_v12 }
0x11e1   : > { %5156 = vmatpush3.bf16.msra.mxu1 %v2070_v3 }
0x11e2   : > { %5157 = vmatprep.subr.bf16.mxu1 %v2071_v9 }
0x11e5   : > { %5158 = vmatpush3.bf16.msra.mxu1 %v2071_v9 }
0x11e6   : > { %5159 = vmatprep.subr.bf16.mxu1 %v2072_v13 }
0x11e9   : > { %5160 = vmatpush3.bf16.msra.mxu1 %v2072_v13 }
0x11ea   : > { %5161 = vmatprep.subr.bf16.mxu1 %v2073_v14 }
0x11ed   : > { %5162 = vmatpush3.bf16.msra.mxu1 %v2073_v14 }
0x11ee   : > { %2565 = vmatprep.subr.bf16.mxu1 %v7038_v29 }
0x11f0   : > { %5164 = vmatmul.mubr.msk.bf16.vlgmr.msra.gmra.mrb[16].mxu1 %vm1660_vm14, %v6396_v16 }
0x12c3   : > { %v5165_v19 = vpop.f32.mrb[16].mxu1 }
0x12c4   : > { %v2124_v20 = vpop.f32.mrb[17].mxu1  ;;  %v2141_v22 = vmax.f32 %v5165_v19, 0.0 }
0x12c5   : > { %v5166_v21 = vpop.f32.mrb[18].mxu1  ;;  %v2139_v25 = vmax.f32 %v2124_v20, 0.0 }
0x12c6   : > { %v2142_v23 = vmax.f32 %v5166_v21, 0.0  ;;  %v2127_v24 = vpop.f32.mrb[19].mxu1 }
0x12c7   : > { %v2140_v26 = vmax.f32 %v2127_v24, 0.0 }
0x12c8   : > { %v2144_v27 = vpack.c.bf16 %v2142_v23, %v2141_v22 }
0x12c9   : > { %v2143_v28 = vpack.c.bf16 %v2140_v26, %v2139_v25 }
0x12cb   : > { %5171 = vmatprep.mubr.msk.bf16.mxu0 %vm2161_vm8, %v2143_v28 }
0x12cc   : > { %5172 = vmatmul.mubr.msk.bf16.vlgmr.msra.gmra.mrb[20].mxu0 %vm2161_vm8, %v2144_v27 }
0x139f   : > { %v5173_v30 = vpop.f32.mrb[20].mxu0 }
0x13a0   : > { %v2202_v31 = vpop.f32.mrb[21].mxu0 }
0x13a1   : > { %2230 = vrot.lane.b32.xlu0 %v2202_v31, %s8638_s0  ;;  %v5174_v32 = vpop.f32.mrb[22].mxu0 }
0x13a2   : > { %v2205_v33 = vpop.f32.mrb[23].mxu0 }
0x13a3   : > { %2232 = vrot.lane.b32.xlu1 %v2205_v33, %s8638_s0 }
0x13a5   : > { %2234 = vrot.lane.b32.xlu0 %v5173_v30, %s8638_s0 }
0x13a7   : > { %2236 = vrot.lane.b32.xlu1 %v5174_v32, %s8638_s0  ;;  %s8736_s0 = sld [smem:[#allocation49_spill]] }
0x13ad   : > { %v6399_v54 = vld [vmem:[%s8736_s0 + $0x4] ss:$8 sps:$4 sm:$0xff]  }
0x13ae   : > { %4813 = vmatprep.mubr.msk.bf16.mxu0 %vm2359_vm5, %v6399_v54  ;;  %v6404_v54 = vld [vmem:[%s8736_s0 + $0x10] ss:$8 sps:$4 sm:$0xff]  }
0x1413   : > { %v2231_v34 = vpop.permute.xlu0 %2230 }
0x1414   : > { %2243 = vst.msk [vmem:[#allocation2] sm:$0xff] %vm2242_vm6, %v2231_v34  ;;  %2961 = vst.msk [vmem:[#allocation2 + $0x40] sm:$0xff] %vm2242_vm6, %v2231_v34 }
0x1415   : > { %v2233_v35 = vpop.permute.xlu1 %2232 }
0x1416   : > { %2244 = vst.msk [vmem:[#allocation2 + $0x10] sm:$0xff] %vm2242_vm6, %v2233_v35  ;;  %2962 = vst.msk [vmem:[#allocation2 + $0x50] sm:$0xff] %vm2242_vm6, %v2233_v35 }
0x1417   : > { %v2235_v36 = vpop.permute.xlu0 %2234 }
0x1418   : > { %2245 = vst.msk [vmem:[#allocation2 + $0x20] sm:$0xff] %vm2242_vm6, %v2235_v36  ;;  %2963 = vst.msk [vmem:[#allocation2 + $0x60] sm:$0xff] %vm2242_vm6, %v2235_v36 }
0x1419   : > { %v2237_v37 = vpop.permute.xlu1 %2236 }
0x141a   : > { %2246 = vst.msk [vmem:[#allocation2 + $0x30] sm:$0xff] %vm2242_vm6, %v2237_v37  ;;  %2964 = vst.msk [vmem:[#allocation2 + $0x70] sm:$0xff] %vm2242_vm6, %v2237_v37 }
0x141b   : > { %v2247_v38 = vld [vmem:[#allocation2] sm:$0xff] }
0x141c   : > { %2423 = vst.msk [vmem:[#allocation2] sm:$0xff] %vm2221_vm7, %v7029_v0  ;;  %v7963_v44 = vld [vmem:[#allocation2 + $0x40] sm:$0xff] }
0x141d   : > { %v2248_v39 = vld [vmem:[#allocation2 + $0x10] sm:$0xff] }
0x141e   : > { %v5719_v40 = vpack.i.bf16 %v2248_v39, %v2247_v38  ;;  %2424 = vst.msk [vmem:[#allocation2 + $0x10] sm:$0xff] %vm2221_vm7, %v7029_v0  ;;  %v2327_v41 = vpack.c.bf16 %v2248_v39, %v2247_v38  ;;  %v7958_v42 = vld [vmem:[#allocation2 + $0x50] sm:$0xff] }
0x141f   : > { %v2249_v43 = vld [vmem:[#allocation2 + $0x20] sm:$0xff]  ;;  %v3127_v48 = vpack.c.bf16 %v7958_v42, %v7963_v44 }
0x1420   : > { %5720 = vrot.lane.b32.xlu0 %v5719_v40, %s8728_s1  ;;  %2367 = vmatpush1.bf16.msra.mxu0 %v2327_v41  ;;  %2425 = vst.msk [vmem:[#allocation2 + $0x20] sm:$0xff] %vm2221_vm7, %v7029_v0  ;;  %v7974_v52 = vld [vmem:[#allocation2 + $0x60] sm:$0xff] }
0x1421   : > { %2368 = vmatprep.subr.bf16.mxu0 %v7038_v29  ;;  %v2250_v47 = vld [vmem:[#allocation2 + $0x30] sm:$0xff] }
0x1422   : > { %v5724_v49 = vpack.i.bf16 %v2250_v47, %v2249_v43  ;;  %2426 = vst.msk [vmem:[#allocation2 + $0x30] sm:$0xff] %vm2221_vm7, %v7029_v0  ;;  %v2328_v50 = vpack.c.bf16 %v2250_v47, %v2249_v43  ;;  %v7970_v51 = vld [vmem:[#allocation2 + $0x70] sm:$0xff] }
0x1423   : > { %v3128_v53 = vpack.c.bf16 %v7970_v51, %v7974_v52 }
0x1424   : > { %5730 = vrot.lane.b32.xlu0 %v5719_v40, %s8732_s20  ;;  %5725 = vrot.lane.b32.xlu1 %v5724_v49, %s8728_s1 }
0x1425   : > { %2369 = vmatpush1.bf16.msra.mxu0 %v2328_v50  ;;  %v6402_v50 = vld [vmem:[%s8736_s0 + $0x14] ss:$8 sps:$4 sm:$0xff]  }
0x1426   : > { %2370 = vmatprep.subr.bf16.mxu0 %v7038_v29 }
0x1428   : > { %5740 = vrot.lane.b32.xlu0 %v5719_v40, %s8734_s17  ;;  %5735 = vrot.lane.b32.xlu1 %v5724_v49, %s8732_s20 }
0x142c   : > { %5750 = vrot.lane.b32.xlu0 %v5719_v40, %s8729_s16  ;;  %5745 = vrot.lane.b32.xlu1 %v5724_v49, %s8734_s17 }
0x1430   : > { %5760 = vrot.lane.b32.xlu0 %v5719_v40, %s8730_s7  ;;  %5755 = vrot.lane.b32.xlu1 %v5724_v49, %s8729_s16 }
0x1434   : > { %5770 = vrot.lane.b32.xlu0 %v5719_v40, %s8735_s6  ;;  %5765 = vrot.lane.b32.xlu1 %v5724_v49, %s8730_s7 }
0x1438   : > { %5775 = vrot.lane.b32.xlu1 %v5724_v49, %s8735_s6  ;;  %v6401_v49 = vld [vmem:[%s8736_s0] ss:$8 sps:$4 sm:$0xff]   ;;  %s8744_s0 = sld [smem:[#allocation56_spill]] }
0x1492   : > { %v5721_v55 = vpop.permute.xlu0 %5720 }
0x1493   : > { %v5723_v56 = vunpack.i.h.bf16 %v5721_v55  ;;  %v5722_v57 = vunpack.i.l.bf16 %v5721_v55 }
0x1495   : > { %v2329_v58 = vpack.c.bf16 %v5723_v56, %v5722_v57 }
0x1496   : > { %v5731_v59 = vpop.permute.xlu0 %5730  ;;  %v5726_v60 = vpop.permute.xlu1 %5725 }
0x1497   : > { %v5728_v61 = vunpack.i.h.bf16 %v5726_v60  ;;  %v5727_v62 = vunpack.i.l.bf16 %v5726_v60  ;;  %2371 = vmatpush1.bf16.msra.mxu0 %v2329_v58  ;;  %v5733_v63 = vunpack.i.h.bf16 %v5731_v59  ;;  %v5732_v1 = vunpack.i.l.bf16 %v5731_v59 }
0x1498   : > { %2372 = vmatprep.subr.bf16.mxu0 %v7038_v29 }
0x1499   : > { %v2330_v2 = vpack.c.bf16 %v5728_v61, %v5727_v62  ;;  %v2331_v4 = vpack.c.bf16 %v5733_v63, %v5732_v1 }
0x149a   : > { %v5736_v3 = vpop.permute.xlu1 %5735  ;;  %v5741_v9 = vpop.permute.xlu0 %5740 }
0x149b   : > { %2373 = vmatpush1.bf16.msra.mxu0 %v2330_v2  ;;  %v5738_v7 = vunpack.i.h.bf16 %v5736_v3  ;;  %v5737_v8 = vunpack.i.l.bf16 %v5736_v3  ;;  %v5743_v10 = vunpack.i.h.bf16 %v5741_v9  ;;  %v5742_v11 = vunpack.i.l.bf16 %v5741_v9 }
0x149c   : > { %2374 = vmatprep.subr.bf16.mxu0 %v7038_v29 }
0x149d   : > { %v2332_v12 = vpack.c.bf16 %v5738_v7, %v5737_v8  ;;  %v2333_v14 = vpack.c.bf16 %v5743_v10, %v5742_v11 }
0x149e   : > { %v5746_v13 = vpop.permute.xlu1 %5745  ;;  %v5751_v18 = vpop.permute.xlu0 %5750 }
0x149f   : > { %2375 = vmatpush1.bf16.msra.mxu0 %v2331_v4  ;;  %v5748_v16 = vunpack.i.h.bf16 %v5746_v13  ;;  %v5747_v17 = vunpack.i.l.bf16 %v5746_v13  ;;  %v5753_v19 = vunpack.i.h.bf16 %v5751_v18  ;;  %v5752_v20 = vunpack.i.l.bf16 %v5751_v18 }
0x14a0   : > { %2376 = vmatprep.subr.bf16.mxu0 %v7038_v29 }
0x14a1   : > { %v2334_v21 = vpack.c.bf16 %v5748_v16, %v5747_v17  ;;  %v2335_v23 = vpack.c.bf16 %v5753_v19, %v5752_v20  ;;  %v6405_v19 = vld [vmem:[#allocation18 + $0x4] ss:$8 sps:$4 sm:$0xff]   ;;  %v6411_v20 = vld [vmem:[%s8738_s4] sm:$0xff]   ;;  %s8745_s4 = sld [smem:[#allocation67_spill]] }
0x14a2   : > { %v5756_v22 = vpop.permute.xlu1 %5755  ;;  %v5761_v26 = vpop.permute.xlu0 %5760  ;;  %4819 = vmatprep.mubr.msk.bf16.mxu1 %vm2359_vm5, %v6405_v19  ;;  %v6408_v19 = vld [vmem:[#allocation18 + $0x14] ss:$8 sps:$4 sm:$0xff]  }
0x14a3   : > { %2377 = vmatpush1.bf16.msra.mxu0 %v2332_v12  ;;  %v5758_v24 = vunpack.i.h.bf16 %v5756_v22  ;;  %v5757_v25 = vunpack.i.l.bf16 %v5756_v22  ;;  %v5763_v27 = vunpack.i.h.bf16 %v5761_v26  ;;  %v5762_v28 = vunpack.i.l.bf16 %v5761_v26 }
0x14a4   : > { %2378 = vmatprep.subr.bf16.mxu0 %v7038_v29 }
0x14a5   : > { %v2336_v30 = vpack.c.bf16 %v5758_v24, %v5757_v25  ;;  %v2337_v32 = vpack.c.bf16 %v5763_v27, %v5762_v28 }
0x14a6   : > { %v5766_v31 = vpop.permute.xlu1 %5765  ;;  %v5771_v35 = vpop.permute.xlu0 %5770 }
0x14a7   : > { %2379 = vmatpush1.bf16.msra.mxu0 %v2333_v14  ;;  %v5768_v33 = vunpack.i.h.bf16 %v5766_v31  ;;  %v5767_v34 = vunpack.i.l.bf16 %v5766_v31  ;;  %v5773_v36 = vunpack.i.h.bf16 %v5771_v35  ;;  %v5772_v37 = vunpack.i.l.bf16 %v5771_v35 }
0x14a8   : > { %2380 = vmatprep.subr.bf16.mxu0 %v7038_v29 }
0x14a9   : > { %v2338_v38 = vpack.c.bf16 %v5768_v33, %v5767_v34  ;;  %v2339_v40 = vpack.c.bf16 %v5773_v36, %v5772_v37 }
0x14aa   : > { %v5776_v39 = vpop.permute.xlu1 %5775 }
0x14ab   : > { %2381 = vmatpush1.bf16.msra.mxu0 %v2334_v21  ;;  %v5778_v41 = vunpack.i.h.bf16 %v5776_v39  ;;  %v5777_v43 = vunpack.i.l.bf16 %v5776_v39 }
0x14ac   : > { %2382 = vmatprep.subr.bf16.mxu0 %v7038_v29 }
0x14ad   : > { %v2340_v47 = vpack.c.bf16 %v5778_v41, %v5777_v43 }
0x14af   : > { %2383 = vmatpush1.bf16.msra.mxu0 %v2335_v23 }
0x14b0   : > { %2384 = vmatprep.subr.bf16.mxu0 %v7038_v29 }
0x14b3   : > { %2385 = vmatpush1.bf16.msra.mxu0 %v2336_v30 }
0x14b4   : > { %2386 = vmatprep.subr.bf16.mxu0 %v7038_v29 }
0x14b7   : > { %2387 = vmatpush1.bf16.msra.mxu0 %v2337_v32 }
0x14b8   : > { %2388 = vmatprep.subr.bf16.mxu0 %v7038_v29 }
0x14bb   : > { %2389 = vmatpush1.bf16.msra.mxu0 %v2338_v38 }
0x14bc   : > { %2390 = vmatprep.subr.bf16.mxu0 %v7038_v29 }
0x14bf   : > { %2391 = vmatpush1.bf16.msra.mxu0 %v2339_v40 }
0x14c0   : > { %2392 = vmatprep.subr.bf16.mxu0 %v7038_v29 }
0x14c3   : > { %2393 = vmatpush1.bf16.msra.mxu0 %v2340_v47 }
0x14c4   : > { %5175 = vmatprep.subr.bf16.mxu0 %v6411_v20 }
0x14c6   : > { %2399 = vmatmul.mubr.bf16.vlgmr.msra.gmra.mrb[24].mxu0 %v6401_v49 }
0x14c7   : > { %4814 = vmatprep.mubr.msk.bf16.mxu0 %vm2359_vm5, %v6402_v50  ;;  %5176 = vmatpush3.bf16.msra.mxu0 %v6411_v20  ;;  %v6410_v20 = vld [vmem:[#allocation18 + $0x10] ss:$8 sps:$4 sm:$0xff]  }
0x14c8   : > { %2872 = vmatprep.subr.bf16.mxu0 %v7038_v29 }
0x14ce   : > { %2407 = vmatmul.mubr.bf16.gmra.mrb[28].mxu0 %v6404_v54 }
0x1599   : > { %v2400_v55 = vpop.f32.mrb[24].mxu0 }
0x159a   : > { %v2415_v56 = vmax.f32 %v2400_v55, 0.0  ;;  %v2402_v57 = vpop.f32.mrb[25].mxu0 }
0x159b   : > { %v2403_v58 = vpop.f32.mrb[26].mxu0 }
0x159c   : > { %v2416_v59 = vmax.f32 %v2403_v58, 0.0  ;;  %2431 = vrot.lane.b32.xlu0 %v2415_v56, %s8737_s11  ;;  %v2405_v60 = vpop.f32.mrb[27].mxu0 }
0x159e   : > { %2433 = vrot.lane.b32.xlu1 %v2416_v59, %s8737_s11 }
0x15a1   : > { %v2408_v61 = vpop.f32.mrb[28].mxu0 }
0x15a2   : > { %v2417_v62 = vmax.f32 %v2408_v61, 0.0  ;;  %v2410_v63 = vpop.f32.mrb[29].mxu0 }
0x15a3   : > { %v2411_v1 = vpop.f32.mrb[30].mxu0 }
0x15a4   : > { %v2418_v2 = vmax.f32 %v2411_v1, 0.0  ;;  %2435 = vrot.lane.b32.xlu0 %v2417_v62, %s8737_s11  ;;  %v2413_v3 = vpop.f32.mrb[31].mxu0 }
0x15a6   : > { %2437 = vrot.lane.b32.xlu1 %v2418_v2, %s8737_s11 }
0x160e   : > { %v2432_v4 = vpop.permute.xlu0 %2431 }
0x160f   : > { %2443 = vst.msk [vmem:[#allocation2] sm:$0xff] %vm2242_vm6, %v2432_v4 }
0x1610   : > { %v2434_v7 = vpop.permute.xlu1 %2433 }
0x1611   : > { %2444 = vst.msk [vmem:[#allocation2 + $0x10] sm:$0xff] %vm2242_vm6, %v2434_v7 }
0x1616   : > { %v2436_v8 = vpop.permute.xlu0 %2435  ;;  %v2447_v10 = vld [vmem:[#allocation2] sm:$0xff] }
0x1617   : > { %2445 = vst.msk [vmem:[#allocation2 + $0x20] sm:$0xff] %vm2242_vm6, %v2436_v8 }
0x1618   : > { %v2438_v9 = vpop.permute.xlu1 %2437  ;;  %v2448_v11 = vld [vmem:[#allocation2 + $0x10] sm:$0xff] }
0x1619   : > { %2446 = vst.msk [vmem:[#allocation2 + $0x30] sm:$0xff] %vm2242_vm6, %v2438_v9  ;;  %v2527_v12 = vpack.c.bf16 %v2448_v11, %v2447_v10  ;;  %v5779_v13 = vpack.i.bf16 %v2448_v11, %v2447_v10 }
0x161b   : > { %2566 = vmatpush1.bf16.msra.mxu1 %v2527_v12  ;;  %5780 = vrot.lane.b32.xlu0 %v5779_v13, %s8728_s1 }
0x161c   : > { %2567 = vmatprep.subr.bf16.mxu1 %v7038_v29 }
0x161e   : > { %v2449_v14 = vld [vmem:[#allocation2 + $0x20] sm:$0xff] }
0x161f   : > { %5790 = vrot.lane.b32.xlu0 %v5779_v13, %s8732_s20 }
0x1620   : > { %v2450_v16 = vld [vmem:[#allocation2 + $0x30] sm:$0xff] }
0x1621   : > { %v5784_v17 = vpack.i.bf16 %v2450_v16, %v2449_v14  ;;  %v2528_v18 = vpack.c.bf16 %v2450_v16, %v2449_v14 }
0x1623   : > { %5800 = vrot.lane.b32.xlu0 %v5779_v13, %s8734_s17  ;;  %5785 = vrot.lane.b32.xlu1 %v5784_v17, %s8728_s1 }
0x1624   : > { %2568 = vmatpush1.bf16.msra.mxu1 %v2528_v18  ;;  %v6407_v18 = vld [vmem:[#allocation18] ss:$8 sps:$4 sm:$0xff]  }
0x1625   : > { %2569 = vmatprep.subr.bf16.mxu1 %v7038_v29 }
0x1627   : > { %5810 = vrot.lane.b32.xlu0 %v5779_v13, %s8729_s16  ;;  %5795 = vrot.lane.b32.xlu1 %v5784_v17, %s8732_s20 }
0x162b   : > { %5820 = vrot.lane.b32.xlu0 %v5779_v13, %s8730_s7  ;;  %5805 = vrot.lane.b32.xlu1 %v5784_v17, %s8734_s17 }
0x162f   : > { %5830 = vrot.lane.b32.xlu0 %v5779_v13, %s8735_s6  ;;  %5815 = vrot.lane.b32.xlu1 %v5784_v17, %s8729_s16 }
0x1633   : > { %5825 = vrot.lane.b32.xlu1 %v5784_v17, %s8730_s7 }
0x1637   : > { %5835 = vrot.lane.b32.xlu1 %v5784_v17, %s8735_s6 }
0x168d   : > { %v5781_v21 = vpop.permute.xlu0 %5780 }
0x168e   : > { %v5783_v22 = vunpack.i.h.bf16 %v5781_v21  ;;  %v5782_v23 = vunpack.i.l.bf16 %v5781_v21  ;;  %v2686_v21 = vld [vmem:[%s8739_s15] sm:$0xf] }
0x1690   : > { %v2529_v24 = vpack.c.bf16 %v5783_v22, %v5782_v23  ;;  %v2695_v22 = vsel %vm8645_vm10, %v2686_v21, 0 }
0x1691   : > { %v5791_v25 = vpop.permute.xlu0 %5790 }
0x1692   : > { %2570 = vmatpush1.bf16.msra.mxu1 %v2529_v24  ;;  %v5793_v30 = vunpack.i.h.bf16 %v5791_v25  ;;  %v5792_v31 = vunpack.i.l.bf16 %v5791_v25 }
0x1693   : > { %2571 = vmatprep.subr.bf16.mxu1 %v7038_v29 }
0x1694   : > { %v2531_v34 = vpack.c.bf16 %v5793_v30, %v5792_v31 }
0x1695   : > { %v5786_v26 = vpop.permute.xlu1 %5785  ;;  %v5801_v37 = vpop.permute.xlu0 %5800 }
0x1696   : > { %v5788_v27 = vunpack.i.h.bf16 %v5786_v26  ;;  %v5787_v28 = vunpack.i.l.bf16 %v5786_v26  ;;  %v5803_v38 = vunpack.i.h.bf16 %v5801_v37  ;;  %v5802_v39 = vunpack.i.l.bf16 %v5801_v37 }
0x1698   : > { %v2530_v32 = vpack.c.bf16 %v5788_v27, %v5787_v28  ;;  %v2533_v43 = vpack.c.bf16 %v5803_v38, %v5802_v39 }
0x1699   : > { %v5796_v33 = vpop.permute.xlu1 %5795  ;;  %v5811_v50 = vpop.permute.xlu0 %5810 }
0x169a   : > { %2572 = vmatpush1.bf16.msra.mxu1 %v2530_v32  ;;  %v5798_v35 = vunpack.i.h.bf16 %v5796_v33  ;;  %v5797_v36 = vunpack.i.l.bf16 %v5796_v33  ;;  %v5813_v54 = vunpack.i.h.bf16 %v5811_v50  ;;  %v5812_v55 = vunpack.i.l.bf16 %v5811_v50 }
0x169b   : > { %2573 = vmatprep.subr.bf16.mxu1 %v7038_v29 }
0x169c   : > { %v2532_v40 = vpack.c.bf16 %v5798_v35, %v5797_v36  ;;  %v2535_v58 = vpack.c.bf16 %v5813_v54, %v5812_v55 }
0x169d   : > { %v5806_v41 = vpop.permute.xlu1 %5805  ;;  %v5821_v61 = vpop.permute.xlu0 %5820 }
0x169e   : > { %2574 = vmatpush1.bf16.msra.mxu1 %v2531_v34  ;;  %v5808_v47 = vunpack.i.h.bf16 %v5806_v41  ;;  %v5807_v49 = vunpack.i.l.bf16 %v5806_v41  ;;  %v5823_v62 = vunpack.i.h.bf16 %v5821_v61  ;;  %v5822_v63 = vunpack.i.l.bf16 %v5821_v61 }
0x169f   : > { %2575 = vmatprep.subr.bf16.mxu1 %v7038_v29 }
0x16a0   : > { %v2534_v56 = vpack.c.bf16 %v5808_v47, %v5807_v49  ;;  %v2537_v3 = vpack.c.bf16 %v5823_v62, %v5822_v63 }
0x16a1   : > { %v5816_v57 = vpop.permute.xlu1 %5815  ;;  %v5831_v8 = vpop.permute.xlu0 %5830 }
0x16a2   : > { %2576 = vmatpush1.bf16.msra.mxu1 %v2532_v40  ;;  %v5818_v59 = vunpack.i.h.bf16 %v5816_v57  ;;  %v5817_v60 = vunpack.i.l.bf16 %v5816_v57  ;;  %v5833_v9 = vunpack.i.h.bf16 %v5831_v8  ;;  %v5832_v10 = vunpack.i.l.bf16 %v5831_v8 }
0x16a3   : > { %2577 = vmatprep.subr.bf16.mxu1 %v7038_v29 }
0x16a4   : > { %v2536_v1 = vpack.c.bf16 %v5818_v59, %v5817_v60  ;;  %v2539_v13 = vpack.c.bf16 %v5833_v9, %v5832_v10 }
0x16a5   : > { %v5826_v2 = vpop.permute.xlu1 %5825 }
0x16a6   : > { %2578 = vmatpush1.bf16.msra.mxu1 %v2533_v43  ;;  %v5828_v4 = vunpack.i.h.bf16 %v5826_v2  ;;  %v5827_v7 = vunpack.i.l.bf16 %v5826_v2 }
0x16a7   : > { %2579 = vmatprep.subr.bf16.mxu1 %v7038_v29 }
0x16a8   : > { %v2538_v11 = vpack.c.bf16 %v5828_v4, %v5827_v7 }
0x16a9   : > { %v5836_v12 = vpop.permute.xlu1 %5835 }
0x16aa   : > { %2580 = vmatpush1.bf16.msra.mxu1 %v2534_v56  ;;  %v5838_v14 = vunpack.i.h.bf16 %v5836_v12  ;;  %v5837_v16 = vunpack.i.l.bf16 %v5836_v12 }
0x16ab   : > { %2581 = vmatprep.subr.bf16.mxu1 %v7038_v29 }
0x16ac   : > { %v2540_v17 = vpack.c.bf16 %v5838_v14, %v5837_v16 }
0x16ae   : > { %2582 = vmatpush1.bf16.msra.mxu1 %v2535_v58 }
0x16af   : > { %2583 = vmatprep.subr.bf16.mxu1 %v7038_v29 }
0x16b2   : > { %2584 = vmatpush1.bf16.msra.mxu1 %v2536_v1  ;;  %v6412_v1 = vld [vmem:[#allocation20 + $0x4] ss:$8 sps:$4 sm:$0xff]  }
0x16b3   : > { %2585 = vmatprep.subr.bf16.mxu1 %v7038_v29 }
0x16b6   : > { %2586 = vmatpush1.bf16.msra.mxu1 %v2537_v3 }
0x16b7   : > { %2587 = vmatprep.subr.bf16.mxu1 %v7038_v29 }
0x16ba   : > { %2588 = vmatpush1.bf16.msra.mxu1 %v2538_v11 }
0x16bb   : > { %2589 = vmatprep.subr.bf16.mxu1 %v7038_v29 }
0x16be   : > { %2590 = vmatpush1.bf16.msra.mxu1 %v2539_v13 }
0x16bf   : > { %2591 = vmatprep.subr.bf16.mxu1 %v7038_v29 }
0x16c2   : > { %2592 = vmatpush1.bf16.msra.mxu1 %v2540_v17 }
0x16c3   : > { %5267 = vmatprep.subr.msk.bf16.mxu1 %vm8645_vm10, %v2686_v21  ;;  %vm2687_vm10 = vcmask 64512  }
0x16c5   : > { %2598 = vmatmul.mubr.bf16.vlgmr.msra.gmra.mrb[20].mxu1 %v6407_v18 }
0x16c6   : > { %4820 = vmatprep.mubr.msk.bf16.mxu1 %vm2359_vm5, %v6408_v19  ;;  %5182 = vmatpush3.bf16.msra.mxu1 %v2695_v22 }
0x16cd   : > { %2606 = vmatmul.mubr.bf16.gmra.mrb[24].mxu1 %v6410_v20 }
0x1798   : > { %v2599_v23 = vpop.f32.mrb[20].mxu1 }
0x1799   : > { %v2601_v24 = vpop.f32.mrb[21].mxu1  ;;  %v2614_v26 = vmax.f32 %v2599_v23, 0.0 }
0x179a   : > { %v2602_v25 = vpop.f32.mrb[22].mxu1 }
0x179b   : > { %v2615_v27 = vmax.f32 %v2602_v25, 0.0  ;;  %v2604_v28 = vpop.f32.mrb[23].mxu1 }
0x179d   : > { %v2618_v30 = vpack.c.bf16 %v2615_v27, %v2614_v26 }
0x179f   : > { %5177 = vmatprep.mubr.msk.bf16.mxu0 %vm2628_vm4, %v2618_v30 }
0x17a0   : > { %v2607_v31 = vpop.f32.mrb[24].mxu1 }
0x17a1   : > { %v2609_v32 = vpop.f32.mrb[25].mxu1  ;;  %v2616_v34 = vmax.f32 %v2607_v31, 0.0 }
0x17a2   : > { %v2610_v33 = vpop.f32.mrb[26].mxu1 }
0x17a3   : > { %v2617_v35 = vmax.f32 %v2610_v33, 0.0  ;;  %v2612_v36 = vpop.f32.mrb[27].mxu1 }
0x17a5   : > { %v2619_v37 = vpack.c.bf16 %v2617_v35, %v2616_v34 }
0x17a7   : > { %5178 = vmatmul.mubr.msk.bf16.vlgmr.msra.gmra.mrb[32].mxu0 %vm2628_vm4, %v2619_v37 }
0x17a8   : > { %4830 = vmatprep.mubr.msk.bf16.mxu0 %vm2359_vm5, %v6412_v1  ;;  %v6417_v1 = vld [vmem:[#allocation20 + $0x10] ss:$8 sps:$4 sm:$0xff]  }
0x187a   : > { %v5179_v38 = vpop.f32.mrb[32].mxu0 }
0x187b   : > { %v2669_v39 = vpop.f32.mrb[33].mxu0 }
0x187c   : > { %v5180_v40 = vpop.f32.mrb[34].mxu0 }
0x187d   : > { %v2685_v41 = vpack.c.bf16 %v5180_v40, %v5179_v38  ;;  %v2672_v43 = vpop.f32.mrb[35].mxu0 }
0x187e   : > { %v2684_v47 = vpack.c.bf16 %v2672_v43, %v2669_v39 }
0x1880   : > { %5183 = vmatprep.mubr.msk.bf16.mxu1 %vm2687_vm10, %v2684_v47 }
0x1881   : > { %5184 = vmatmul.mubr.msk.bf16.vlgmr.msra.gmra.mrb[28].mxu1 %vm2687_vm10, %v2685_v41  ;;  %vm8752_vm10 = vcmask 1014784  }
0x1954   : > { %v5185_v49 = vpop.f32.mrb[28].mxu1 }
0x1955   : > { %2752 = vst.msk [vmem:[#allocation2 + $0x20] sm:$0xff] %vm2221_vm7, %v5185_v49  ;;  %v2731_v50 = vpop.f32.mrb[29].mxu1 }
0x1956   : > { %2750 = vst.msk [vmem:[#allocation2] sm:$0xff] %vm2221_vm7, %v2731_v50  ;;  %v5186_v54 = vpop.f32.mrb[30].mxu1 }
0x1957   : > { %2753 = vst.msk [vmem:[#allocation2 + $0x30] sm:$0xff] %vm2221_vm7, %v5186_v54  ;;  %v2734_v55 = vpop.f32.mrb[31].mxu1 }
0x1958   : > { %2751 = vst.msk [vmem:[#allocation2 + $0x10] sm:$0xff] %vm2221_vm7, %v2734_v55 }
0x195c   : > { %v2756_v56 = vld [vmem:[#allocation2 + $0x20] sm:$0xff] }
0x195d   : > { %2935 = vst.msk [vmem:[#allocation2 + $0x20] sm:$0xff] %vm2221_vm7, %v7029_v0  ;;  %v2754_v57 = vld [vmem:[#allocation2] sm:$0xff] }
0x195e   : > { %v2757_v58 = vld [vmem:[#allocation2 + $0x30] sm:$0xff]  ;;  %2933 = vst.msk [vmem:[#allocation2] sm:$0xff] %vm2221_vm7, %v7029_v0 }
0x195f   : > { %v5844_v59 = vpack.i.bf16 %v2757_v58, %v2756_v56  ;;  %2936 = vst.msk [vmem:[#allocation2 + $0x30] sm:$0xff] %vm2221_vm7, %v7029_v0  ;;  %v2755_v60 = vld [vmem:[#allocation2 + $0x10] sm:$0xff]  ;;  %v2835_v63 = vpack.c.bf16 %v2757_v58, %v2756_v56 }
0x1960   : > { %v5839_v61 = vpack.i.bf16 %v2755_v60, %v2754_v57  ;;  %2934 = vst.msk [vmem:[#allocation2 + $0x10] sm:$0xff] %vm2221_vm7, %v7029_v0  ;;  %v2834_v62 = vpack.c.bf16 %v2755_v60, %v2754_v57 }
0x1961   : > { %5845 = vrot.lane.b32.xlu1 %v5844_v59, %s8728_s1 }
0x1962   : > { %5840 = vrot.lane.b32.xlu0 %v5839_v61, %s8728_s1  ;;  %2873 = vmatpush1.bf16.msra.mxu0 %v2834_v62  ;;  %v6414_v62 = vld [vmem:[#allocation20] ss:$8 sps:$4 sm:$0xff]  }
0x1963   : > { %2874 = vmatprep.subr.bf16.mxu0 %v7038_v29 }
0x1965   : > { %5855 = vrot.lane.b32.xlu1 %v5844_v59, %s8732_s20 }
0x1966   : > { %5850 = vrot.lane.b32.xlu0 %v5839_v61, %s8732_s20  ;;  %2875 = vmatpush1.bf16.msra.mxu0 %v2835_v63  ;;  %v6415_v63 = vld [vmem:[#allocation20 + $0x14] ss:$8 sps:$4 sm:$0xff]  }
0x1967   : > { %2876 = vmatprep.subr.bf16.mxu0 %v7038_v29 }
0x1969   : > { %5865 = vrot.lane.b32.xlu1 %v5844_v59, %s8734_s17 }
0x196a   : > { %5860 = vrot.lane.b32.xlu0 %v5839_v61, %s8734_s17 }
0x196d   : > { %5875 = vrot.lane.b32.xlu1 %v5844_v59, %s8729_s16 }
0x196e   : > { %5870 = vrot.lane.b32.xlu0 %v5839_v61, %s8729_s16 }
0x1971   : > { %5885 = vrot.lane.b32.xlu1 %v5844_v59, %s8730_s7 }
0x1972   : > { %5880 = vrot.lane.b32.xlu0 %v5839_v61, %s8730_s7 }
0x1975   : > { %5895 = vrot.lane.b32.xlu1 %v5844_v59, %s8735_s6 }
0x1976   : > { %5890 = vrot.lane.b32.xlu0 %v5839_v61, %s8735_s6 }
0x19d3   : > { %v5846_v2 = vpop.permute.xlu1 %5845 }
0x19d4   : > { %v5841_v3 = vpop.permute.xlu0 %5840  ;;  %v5848_v8 = vunpack.i.h.bf16 %v5846_v2  ;;  %v5847_v9 = vunpack.i.l.bf16 %v5846_v2 }
0x19d5   : > { %v5843_v4 = vunpack.i.h.bf16 %v5841_v3  ;;  %v5842_v7 = vunpack.i.l.bf16 %v5841_v3 }
0x19d6   : > { %v2837_v12 = vpack.c.bf16 %v5848_v8, %v5847_v9 }
0x19d7   : > { %v2836_v10 = vpack.c.bf16 %v5843_v4, %v5842_v7  ;;  %v5856_v16 = vpop.permute.xlu1 %5855 }
0x19d8   : > { %v5851_v11 = vpop.permute.xlu0 %5850  ;;  %v5858_v17 = vunpack.i.h.bf16 %v5856_v16  ;;  %v5857_v18 = vunpack.i.l.bf16 %v5856_v16 }
0x19d9   : > { %2877 = vmatpush1.bf16.msra.mxu0 %v2836_v10  ;;  %v5853_v13 = vunpack.i.h.bf16 %v5851_v11  ;;  %v5852_v14 = vunpack.i.l.bf16 %v5851_v11 }
0x19da   : > { %2878 = vmatprep.subr.bf16.mxu0 %v7038_v29  ;;  %v2839_v21 = vpack.c.bf16 %v5858_v17, %v5857_v18 }
0x19db   : > { %v2838_v19 = vpack.c.bf16 %v5853_v13, %v5852_v14  ;;  %v5866_v24 = vpop.permute.xlu1 %5865 }
0x19dc   : > { %v5861_v20 = vpop.permute.xlu0 %5860  ;;  %v5868_v25 = vunpack.i.h.bf16 %v5866_v24  ;;  %v5867_v26 = vunpack.i.l.bf16 %v5866_v24  ;;  %v5909_v24 = vpack.i.bf16 %v7958_v42, %v7963_v44 }
0x19dd   : > { %2879 = vmatpush1.bf16.msra.mxu0 %v2837_v12  ;;  %v5863_v22 = vunpack.i.h.bf16 %v5861_v20  ;;  %v5862_v23 = vunpack.i.l.bf16 %v5861_v20 }
0x19de   : > { %2880 = vmatprep.subr.bf16.mxu0 %v7038_v29  ;;  %v2841_v30 = vpack.c.bf16 %v5868_v25, %v5867_v26 }
0x19df   : > { %v2840_v27 = vpack.c.bf16 %v5863_v22, %v5862_v23  ;;  %v5876_v33 = vpop.permute.xlu1 %5875 }
0x19e0   : > { %v5871_v28 = vpop.permute.xlu0 %5870  ;;  %v5878_v34 = vunpack.i.h.bf16 %v5876_v33  ;;  %v5877_v35 = vunpack.i.l.bf16 %v5876_v33 }
0x19e1   : > { %2881 = vmatpush1.bf16.msra.mxu0 %v2838_v19  ;;  %v5873_v31 = vunpack.i.h.bf16 %v5871_v28  ;;  %v5872_v32 = vunpack.i.l.bf16 %v5871_v28  ;;  %v5914_v28 = vpack.i.bf16 %v7970_v51, %v7974_v52 }
0x19e2   : > { %2882 = vmatprep.subr.bf16.mxu0 %v7038_v29  ;;  %v2843_v38 = vpack.c.bf16 %v5878_v34, %v5877_v35 }
0x19e3   : > { %v2842_v36 = vpack.c.bf16 %v5873_v31, %v5872_v32  ;;  %v5886_v41 = vpop.permute.xlu1 %5885 }
0x19e4   : > { %v5881_v37 = vpop.permute.xlu0 %5880  ;;  %v5888_v43 = vunpack.i.h.bf16 %v5886_v41  ;;  %v5887_v47 = vunpack.i.l.bf16 %v5886_v41 }
0x19e5   : > { %2883 = vmatpush1.bf16.msra.mxu0 %v2839_v21  ;;  %v5883_v39 = vunpack.i.h.bf16 %v5881_v37  ;;  %v5882_v40 = vunpack.i.l.bf16 %v5881_v37 }
0x19e6   : > { %2884 = vmatprep.subr.bf16.mxu0 %v7038_v29  ;;  %v2845_v54 = vpack.c.bf16 %v5888_v43, %v5887_v47 }
0x19e7   : > { %v2844_v49 = vpack.c.bf16 %v5883_v39, %v5882_v40  ;;  %v5896_v57 = vpop.permute.xlu1 %5895 }
0x19e8   : > { %v5891_v50 = vpop.permute.xlu0 %5890  ;;  %v5898_v58 = vunpack.i.h.bf16 %v5896_v57  ;;  %v5897_v59 = vunpack.i.l.bf16 %v5896_v57 }
0x19e9   : > { %2885 = vmatpush1.bf16.msra.mxu0 %v2840_v27  ;;  %v5893_v55 = vunpack.i.h.bf16 %v5891_v50  ;;  %v5892_v56 = vunpack.i.l.bf16 %v5891_v50 }
0x19ea   : > { %2886 = vmatprep.subr.bf16.mxu0 %v7038_v29  ;;  %v2847_v61 = vpack.c.bf16 %v5898_v58, %v5897_v59 }
0x19eb   : > { %v2846_v60 = vpack.c.bf16 %v5893_v55, %v5892_v56 }
0x19ed   : > { %2887 = vmatpush1.bf16.msra.mxu0 %v2841_v30  ;;  %v6420_v30 = vld [vmem:[%s8740_s12 + $0x4] ss:$16 sps:$4 sm:$0xff]  }
0x19ee   : > { %2888 = vmatprep.subr.bf16.mxu0 %v7038_v29  ;;  %3229 = vmatprep.mubr.bf16.mxu1 %v6420_v30 }
0x19f1   : > { %2889 = vmatpush1.bf16.msra.mxu0 %v2842_v36 }
0x19f2   : > { %2890 = vmatprep.subr.bf16.mxu0 %v7038_v29 }
0x19f5   : > { %2891 = vmatpush1.bf16.msra.mxu0 %v2843_v38 }
0x19f6   : > { %2892 = vmatprep.subr.bf16.mxu0 %v7038_v29 }
0x19f9   : > { %2893 = vmatpush1.bf16.msra.mxu0 %v2844_v49 }
0x19fa   : > { %2894 = vmatprep.subr.bf16.mxu0 %v7038_v29 }
0x19fd   : > { %2895 = vmatpush1.bf16.msra.mxu0 %v2845_v54 }
0x19fe   : > { %2896 = vmatprep.subr.bf16.mxu0 %v7038_v29 }
0x1a01   : > { %2897 = vmatpush1.bf16.msra.mxu0 %v2846_v60 }
0x1a02   : > { %2898 = vmatprep.subr.bf16.mxu0 %v7038_v29 }
0x1a05   : > { %2899 = vmatpush1.bf16.msra.mxu0 %v2847_v61 }
0x1a08   : > { %2905 = vmatmul.mubr.bf16.vlgmr.msra.gmra.mrb[36].mxu0 %v6414_v62 }
0x1a09   : > { %4831 = vmatprep.mubr.msk.bf16.mxu0 %vm2359_vm5, %v6415_v63 }
0x1a10   : > { %2913 = vmatmul.mubr.bf16.gmra.mrb[40].mxu0 %v6417_v1 }
0x1adb   : > { %v2906_v2 = vpop.f32.mrb[36].mxu0 }
0x1adc   : > { %v2921_v3 = vmax.f32 %v2906_v2, 0.0  ;;  %v2908_v4 = vpop.f32.mrb[37].mxu0 }
0x1add   : > { %v2909_v7 = vpop.f32.mrb[38].mxu0 }
0x1ade   : > { %v2922_v8 = vmax.f32 %v2909_v7, 0.0  ;;  %2945 = vrot.lane.b32.xlu0 %v2921_v3, %s8737_s11  ;;  %v2911_v9 = vpop.f32.mrb[39].mxu0 }
0x1ae0   : > { %2947 = vrot.lane.b32.xlu1 %v2922_v8, %s8737_s11 }
0x1ae3   : > { %v2914_v10 = vpop.f32.mrb[40].mxu0 }
0x1ae4   : > { %v2923_v11 = vmax.f32 %v2914_v10, 0.0  ;;  %v2916_v12 = vpop.f32.mrb[41].mxu0 }
0x1ae5   : > { %v2917_v13 = vpop.f32.mrb[42].mxu0 }
0x1ae6   : > { %v2924_v14 = vmax.f32 %v2917_v13, 0.0  ;;  %2949 = vrot.lane.b32.xlu0 %v2923_v11, %s8737_s11  ;;  %v2919_v16 = vpop.f32.mrb[43].mxu0 }
0x1ae8   : > { %2951 = vrot.lane.b32.xlu1 %v2924_v14, %s8737_s11 }
0x1b50   : > { %v2946_v17 = vpop.permute.xlu0 %2945 }
0x1b51   : > { %2957 = vst.msk [vmem:[#allocation2] sm:$0xff] %vm2242_vm6, %v2946_v17 }
0x1b52   : > { %v2948_v18 = vpop.permute.xlu1 %2947 }
0x1b53   : > { %2958 = vst.msk [vmem:[#allocation2 + $0x10] sm:$0xff] %vm2242_vm6, %v2948_v18 }
0x1b58   : > { %v2950_v19 = vpop.permute.xlu0 %2949  ;;  %v2965_v21 = vld [vmem:[#allocation2] sm:$0xff] }
0x1b59   : > { %2959 = vst.msk [vmem:[#allocation2 + $0x20] sm:$0xff] %vm2242_vm6, %v2950_v19 }
0x1b5a   : > { %v2952_v20 = vpop.permute.xlu1 %2951  ;;  %v2966_v22 = vld [vmem:[#allocation2 + $0x10] sm:$0xff] }
0x1b5b   : > { %2960 = vst.msk [vmem:[#allocation2 + $0x30] sm:$0xff] %vm2242_vm6, %v2952_v20  ;;  %v5899_v23 = vpack.i.bf16 %v2966_v22, %v2965_v21  ;;  %v3125_v36 = vpack.c.bf16 %v2966_v22, %v2965_v21  ;;  %vm8748_vm6 = vcmask 1031168  }
0x1b5c   : > { %vm8749_vm7 = vmmov %vm8748_vm6 }
0x1b5d   : > { %5900 = vrot.lane.b32.xlu0 %v5899_v23, %s8732_s20 }
0x1b60   : > { %v2967_v25 = vld [vmem:[#allocation2 + $0x20] sm:$0xff] }
0x1b61   : > { %5910 = vrot.lane.b32.xlu0 %v5909_v24, %s8732_s20 }
0x1b62   : > { %v2968_v26 = vld [vmem:[#allocation2 + $0x30] sm:$0xff] }
0x1b63   : > { %v5904_v27 = vpack.i.bf16 %v2968_v26, %v2967_v25  ;;  %v3126_v50 = vpack.c.bf16 %v2968_v26, %v2967_v25 }
0x1b65   : > { %5920 = vrot.lane.b32.xlu0 %v5899_v23, %s8734_s17  ;;  %5905 = vrot.lane.b32.xlu1 %v5904_v27, %s8732_s20 }
0x1b69   : > { %5930 = vrot.lane.b32.xlu0 %v5904_v27, %s8734_s17  ;;  %5915 = vrot.lane.b32.xlu1 %v5914_v28, %s8732_s20 }
0x1b6d   : > { %5935 = vrot.lane.b32.xlu0 %v5909_v24, %s8734_s17  ;;  %5925 = vrot.lane.b32.xlu1 %v5899_v23, %s8728_s1 }
0x1b71   : > { %5950 = vrot.lane.b32.xlu0 %v5914_v28, %s8734_s17  ;;  %5940 = vrot.lane.b32.xlu1 %v5904_v27, %s8728_s1 }
0x1b75   : > { %5960 = vrot.lane.b32.xlu0 %v5899_v23, %s8729_s16  ;;  %5945 = vrot.lane.b32.xlu1 %v5909_v24, %s8728_s1 }
0x1b79   : > { %5970 = vrot.lane.b32.xlu0 %v5909_v24, %s8729_s16  ;;  %5955 = vrot.lane.b32.xlu1 %v5914_v28, %s8728_s1 }
0x1b7d   : > { %5980 = vrot.lane.b32.xlu0 %v5899_v23, %s8730_s7  ;;  %5965 = vrot.lane.b32.xlu1 %v5904_v27, %s8729_s16 }
0x1b81   : > { %5990 = vrot.lane.b32.xlu0 %v5909_v24, %s8730_s7  ;;  %5975 = vrot.lane.b32.xlu1 %v5914_v28, %s8729_s16 }
0x1b85   : > { %6000 = vrot.lane.b32.xlu0 %v5899_v23, %s8735_s6  ;;  %5985 = vrot.lane.b32.xlu1 %v5904_v27, %s8730_s7 }
0x1b89   : > { %6010 = vrot.lane.b32.xlu0 %v5909_v24, %s8735_s6  ;;  %5995 = vrot.lane.b32.xlu1 %v5914_v28, %s8730_s7 }
0x1b8d   : > { %6005 = vrot.lane.b32.xlu1 %v5904_v27, %s8735_s6  ;;  %v6418_v27 = vld [vmem:[%s8740_s12] ss:$16 sps:$4 sm:$0xff]  }
0x1b91   : > { %6015 = vrot.lane.b32.xlu1 %v5914_v28, %s8735_s6  ;;  %v6421_v28 = vld [vmem:[%s8740_s12 + $0x24] ss:$16 sps:$4 sm:$0xff]  }
0x1bcf   : > { %v5901_v31 = vpop.permute.xlu0 %5900 }
0x1bd0   : > { %v5903_v32 = vunpack.i.h.bf16 %v5901_v31  ;;  %v5902_v33 = vunpack.i.l.bf16 %v5901_v31 }
0x1bd2   : > { %v3133_v34 = vpack.c.bf16 %v5903_v32, %v5902_v33 }
0x1bd3   : > { %v5911_v35 = vpop.permute.xlu0 %5910 }
0x1bd4   : > { %4952 = vmatprep.subr.bf16.mxu1 %v3133_v34  ;;  %v5913_v39 = vunpack.i.h.bf16 %v5911_v35  ;;  %v5912_v40 = vunpack.i.l.bf16 %v5911_v35 }
0x1bd5   : > { %4953 = vmatpush3.bf16.msra.mxu1 %v3125_v36 }
0x1bd6   : > { %v3135_v56 = vpack.c.bf16 %v5913_v39, %v5912_v40  ;;  %v6426_v39 = vld [vmem:[%s8740_s12 + $0xc] ss:$16 sps:$4 sm:$0xff]  }
0x1bd7   : > { %v5921_v37 = vpop.permute.xlu0 %5920  ;;  %v5906_v38 = vpop.permute.xlu1 %5905 }
0x1bd8   : > { %v5908_v41 = vunpack.i.h.bf16 %v5906_v38  ;;  %v5907_v43 = vunpack.i.l.bf16 %v5906_v38  ;;  %v5923_v59 = vunpack.i.h.bf16 %v5921_v37  ;;  %v5922_v60 = vunpack.i.l.bf16 %v5921_v37  ;;  %v6423_v38 = vld [vmem:[%s8740_s12 + $0x20] ss:$16 sps:$4 sm:$0xff]  }
0x1bda   : > { %v3134_v47 = vpack.c.bf16 %v5908_v41, %v5907_v43  ;;  %v3137_v3 = vpack.c.bf16 %v5923_v59, %v5922_v60 }
0x1bdb   : > { %v5916_v49 = vpop.permute.xlu1 %5915  ;;  %v5931_v57 = vpop.permute.xlu0 %5930 }
0x1bdc   : > { %v5918_v54 = vunpack.i.h.bf16 %v5916_v49  ;;  %v5917_v55 = vunpack.i.l.bf16 %v5916_v49  ;;  %4954 = vmatprep.subr.bf16.mxu1 %v3134_v47  ;;  %v5933_v4 = vunpack.i.h.bf16 %v5931_v57  ;;  %v5932_v7 = vunpack.i.l.bf16 %v5931_v57 }
0x1bdd   : > { %4955 = vmatpush3.bf16.msra.mxu1 %v3126_v50 }
0x1bde   : > { %4956 = vmatprep.subr.bf16.mxu1 %v3135_v56  ;;  %v3136_v61 = vpack.c.bf16 %v5918_v54, %v5917_v55  ;;  %v3138_v12 = vpack.c.bf16 %v5933_v4, %v5932_v7 }
0x1bdf   : > { %v5926_v58 = vpop.permute.xlu1 %5925  ;;  %v5936_v62 = vpop.permute.xlu0 %5935 }
0x1be0   : > { %v5928_v63 = vunpack.i.h.bf16 %v5926_v58  ;;  %v5927_v1 = vunpack.i.l.bf16 %v5926_v58  ;;  %v5938_v42 = vunpack.i.h.bf16 %v5936_v62  ;;  %v5937_v44 = vunpack.i.l.bf16 %v5936_v62 }
0x1be1   : > { %4957 = vmatpush3.bf16.msra.mxu1 %v3127_v48 }
0x1be2   : > { %4958 = vmatprep.subr.bf16.mxu1 %v3136_v61  ;;  %v3129_v8 = vpack.c.bf16 %v5928_v63, %v5927_v1  ;;  %v3139_v17 = vpack.c.bf16 %v5938_v42, %v5937_v44 }
0x1be3   : > { %v5941_v2 = vpop.permute.xlu1 %5940  ;;  %v5951_v48 = vpop.permute.xlu0 %5950 }
0x1be4   : > { %v5943_v9 = vunpack.i.h.bf16 %v5941_v2  ;;  %v5942_v10 = vunpack.i.l.bf16 %v5941_v2  ;;  %v5953_v18 = vunpack.i.h.bf16 %v5951_v48  ;;  %v5952_v19 = vunpack.i.l.bf16 %v5951_v48 }
0x1be5   : > { %4959 = vmatpush3.bf16.msra.mxu1 %v3128_v53 }
0x1be6   : > { %4960 = vmatprep.subr.bf16.mxu1 %v3137_v3  ;;  %v3130_v13 = vpack.c.bf16 %v5943_v9, %v5942_v10  ;;  %v3140_v21 = vpack.c.bf16 %v5953_v18, %v5952_v19 }
0x1be7   : > { %v5946_v11 = vpop.permute.xlu1 %5945  ;;  %v5961_v22 = vpop.permute.xlu0 %5960 }
0x1be8   : > { %v5948_v14 = vunpack.i.h.bf16 %v5946_v11  ;;  %v5947_v16 = vunpack.i.l.bf16 %v5946_v11  ;;  %v5963_v23 = vunpack.i.h.bf16 %v5961_v22  ;;  %v5962_v24 = vunpack.i.l.bf16 %v5961_v22 }
0x1be9   : > { %4961 = vmatpush3.bf16.msra.mxu1 %v3129_v8 }
0x1bea   : > { %4962 = vmatprep.subr.bf16.mxu1 %v3138_v12  ;;  %v3131_v51 = vpack.c.bf16 %v5948_v14, %v5947_v16  ;;  %v3141_v30 = vpack.c.bf16 %v5963_v23, %v5962_v24 }
0x1beb   : > { %v5956_v20 = vpop.permute.xlu1 %5955  ;;  %v5971_v33 = vpop.permute.xlu0 %5970 }
0x1bec   : > { %v5958_v52 = vunpack.i.h.bf16 %v5956_v20  ;;  %v5957_v53 = vunpack.i.l.bf16 %v5956_v20  ;;  %v5973_v34 = vunpack.i.h.bf16 %v5971_v33  ;;  %v5972_v35 = vunpack.i.l.bf16 %v5971_v33 }
0x1bed   : > { %4963 = vmatpush3.bf16.msra.mxu1 %v3130_v13 }
0x1bee   : > { %4964 = vmatprep.subr.bf16.mxu1 %v3139_v17  ;;  %v3132_v25 = vpack.c.bf16 %v5958_v52, %v5957_v53  ;;  %v3143_v40 = vpack.c.bf16 %v5973_v34, %v5972_v35  ;;  %v6427_v52 = vld [vmem:[%s8740_s12 + $0x2c] ss:$16 sps:$4 sm:$0xff]   ;;  %v6429_v53 = vld [vmem:[%s8740_s12 + $0x28] ss:$16 sps:$4 sm:$0xff]  }
0x1bef   : > { %v5966_v26 = vpop.permute.xlu1 %5965  ;;  %v5981_v47 = vpop.permute.xlu0 %5980 }
0x1bf0   : > { %v5968_v31 = vunpack.i.h.bf16 %v5966_v26  ;;  %v5967_v32 = vunpack.i.l.bf16 %v5966_v26  ;;  %v5983_v49 = vunpack.i.h.bf16 %v5981_v47  ;;  %v5982_v50 = vunpack.i.l.bf16 %v5981_v47 }
0x1bf1   : > { %4965 = vmatpush3.bf16.msra.mxu1 %v3131_v51  ;;  %v6424_v51 = vld [vmem:[%s8740_s12 + $0x8] ss:$16 sps:$4 sm:$0xff]  }
0x1bf2   : > { %4966 = vmatprep.subr.bf16.mxu1 %v3140_v21  ;;  %v3142_v36 = vpack.c.bf16 %v5968_v31, %v5967_v32  ;;  %v3145_v56 = vpack.c.bf16 %v5983_v49, %v5982_v50  ;;  %v6430_v21 = vld [vmem:[%s8741_s22] sm:$0xff]   ;;  %s8742_s22 = sld [smem:[#allocation53_spill]] }
0x1bf3   : > { %v5976_v37 = vpop.permute.xlu1 %5975  ;;  %v5991_v59 = vpop.permute.xlu0 %5990  ;;  %5187 = vmatprep.subr.bf16.mxu0 %v6430_v21 }
0x1bf4   : > { %v5978_v41 = vunpack.i.h.bf16 %v5976_v37  ;;  %v5977_v43 = vunpack.i.l.bf16 %v5976_v37  ;;  %v5993_v60 = vunpack.i.h.bf16 %v5991_v59  ;;  %v5992_v61 = vunpack.i.l.bf16 %v5991_v59  ;;  %5188 = vmatpush3.bf16.msra.mxu0 %v6430_v21 }
0x1bf5   : > { %4967 = vmatpush3.bf16.msra.mxu1 %v3132_v25  ;;  %3476 = vmatprep.subr.bf16.mxu0 %v7038_v29 }
0x1bf6   : > { %3246 = vmatprep.subr.bf16.mxu1 %v7038_v29  ;;  %v3144_v54 = vpack.c.bf16 %v5978_v41, %v5977_v43  ;;  %v3147_v1 = vpack.c.bf16 %v5993_v60, %v5992_v61 }
0x1bf7   : > { %v5986_v55 = vpop.permute.xlu1 %5985  ;;  %v6001_v4 = vpop.permute.xlu0 %6000 }
0x1bf8   : > { %3230 = vmatmul.mubr.bf16.vlgmr.msra.gmra.mrb[32].mxu1 %v6418_v27  ;;  %v5988_v57 = vunpack.i.h.bf16 %v5986_v55  ;;  %v5987_v58 = vunpack.i.l.bf16 %v5986_v55  ;;  %v6003_v7 = vunpack.i.h.bf16 %v6001_v4  ;;  %v6002_v8 = vunpack.i.l.bf16 %v6001_v4 }
0x1bf9   : > { %3247 = vmatpush1.bf16.msra.mxu1 %v3141_v30  ;;  %3237 = vmatprep.mubr.bf16.mxu1 %v6421_v28 }
0x1bfa   : > { %3248 = vmatprep.subr.bf16.mxu1 %v7038_v29  ;;  %v3146_v62 = vpack.c.bf16 %v5988_v57, %v5987_v58  ;;  %v3149_v11 = vpack.c.bf16 %v6003_v7, %v6002_v8 }
0x1bfb   : > { %v5996_v63 = vpop.permute.xlu1 %5995  ;;  %v6011_v44 = vpop.permute.xlu0 %6010 }
0x1bfc   : > { %v5998_v2 = vunpack.i.h.bf16 %v5996_v63  ;;  %v5997_v3 = vunpack.i.l.bf16 %v5996_v63  ;;  %v6013_v48 = vunpack.i.h.bf16 %v6011_v44  ;;  %v6012_v13 = vunpack.i.l.bf16 %v6011_v44 }
0x1bfd   : > { %3249 = vmatpush1.bf16.msra.mxu1 %v3142_v36 }
0x1bfe   : > { %3250 = vmatprep.subr.bf16.mxu1 %v7038_v29  ;;  %v3148_v9 = vpack.c.bf16 %v5998_v2, %v5997_v3  ;;  %v3151_v17 = vpack.c.bf16 %v6013_v48, %v6012_v13  ;;  %v6431_v48 = vld [vmem:[%s8742_s22 + $0x4] ss:$8 sps:$4 sm:$0xff]  }
0x1bff   : > { %v6006_v10 = vpop.permute.xlu1 %6005 }
0x1c00   : > { %3238 = vmatmul.mubr.bf16.gmra.mrb[36].mxu1 %v6423_v38  ;;  %v6008_v12 = vunpack.i.h.bf16 %v6006_v10  ;;  %v6007_v42 = vunpack.i.l.bf16 %v6006_v10 }
0x1c01   : > { %3251 = vmatpush1.bf16.msra.mxu1 %v3143_v40  ;;  %4840 = vmatprep.mubr.msk.bf16.mxu1 %vm1852_vm15, %v6426_v39 }
0x1c02   : > { %3252 = vmatprep.subr.bf16.mxu1 %v7038_v29  ;;  %v3150_v14 = vpack.c.bf16 %v6008_v12, %v6007_v42 }
0x1c03   : > { %v6016_v16 = vpop.permute.xlu1 %6015 }
0x1c04   : > { %v6018_v18 = vunpack.i.h.bf16 %v6016_v16  ;;  %v6017_v19 = vunpack.i.l.bf16 %v6016_v16 }
0x1c05   : > { %3253 = vmatpush1.bf16.msra.mxu1 %v3144_v54 }
0x1c06   : > { %3254 = vmatprep.subr.bf16.mxu1 %v7038_v29  ;;  %v3152_v20 = vpack.c.bf16 %v6018_v18, %v6017_v19 }
0x1c09   : > { %3255 = vmatpush1.bf16.msra.mxu1 %v3145_v56 }
0x1c0a   : > { %3256 = vmatprep.subr.bf16.mxu1 %v7038_v29 }
0x1c0d   : > { %3257 = vmatpush1.bf16.msra.mxu1 %v3146_v62 }
0x1c0e   : > { %3258 = vmatprep.subr.bf16.mxu1 %v7038_v29 }
0x1c11   : > { %3259 = vmatpush1.bf16.msra.mxu1 %v3147_v1 }
0x1c12   : > { %3260 = vmatprep.subr.bf16.mxu1 %v7038_v29 }
0x1c15   : > { %3261 = vmatpush1.bf16.msra.mxu1 %v3148_v9 }
0x1c16   : > { %3262 = vmatprep.subr.bf16.mxu1 %v7038_v29 }
0x1c19   : > { %3263 = vmatpush1.bf16.msra.mxu1 %v3149_v11 }
0x1c1a   : > { %3264 = vmatprep.subr.bf16.mxu1 %v7038_v29 }
0x1c1d   : > { %3265 = vmatpush1.bf16.msra.mxu1 %v3150_v14 }
0x1c1e   : > { %3266 = vmatprep.subr.bf16.mxu1 %v7038_v29 }
0x1c21   : > { %3267 = vmatpush1.bf16.msra.mxu1 %v3151_v17 }
0x1c22   : > { %3268 = vmatprep.subr.bf16.mxu1 %v7038_v29 }
0x1c25   : > { %3269 = vmatpush1.bf16.msra.mxu1 %v3152_v20 }
0x1c26   : > { %3643 = vmatprep.subr.bf16.mxu1 %v7038_v29 }
0x1c28   : > { %3279 = vmatmul.mubr.bf16.vlgmr.msra.gmra.mrb[40].mxu1 %v6424_v51 }
0x1c29   : > { %4841 = vmatprep.mubr.msk.bf16.mxu1 %vm1852_vm15, %v6427_v52 }
0x1c30   : > { %3287 = vmatmul.mubr.bf16.gmra.mrb[44].mxu1 %v6429_v53 }
0x1ccb   : > { %v4968_v22 = vpop.f32.mrb[32].mxu1 }
0x1ccc   : > { %v4969_v23 = vpop.f32.mrb[33].mxu1 }
0x1ccd   : > { %v4970_v24 = vadd.f32 %v4969_v23, %v4968_v22  ;;  %v4971_v25 = vpop.f32.mrb[34].mxu1 }
0x1cce   : > { %v4972_v26 = vpop.f32.mrb[35].mxu1 }
0x1ccf   : > { %v4973_v27 = vadd.f32 %v4972_v26, %v4971_v25 }
0x1cd3   : > { %v4974_v28 = vpop.f32.mrb[36].mxu1 }
0x1cd4   : > { %v4975_v30 = vpop.f32.mrb[37].mxu1 }
0x1cd5   : > { %v4976_v31 = vadd.f32 %v4975_v30, %v4974_v28  ;;  %v4977_v32 = vpop.f32.mrb[38].mxu1 }
0x1cd6   : > { %v4978_v33 = vpop.f32.mrb[39].mxu1 }
0x1cd7   : > { %v4979_v34 = vadd.f32 %v4978_v33, %v4977_v32 }
0x1cfb   : > { %v3280_v35 = vpop.f32.mrb[40].mxu1 }
0x1cfc   : > { %v3281_v36 = vadd.f32 %v4970_v24, %v3280_v35  ;;  %v3282_v37 = vpop.f32.mrb[41].mxu1 }
0x1cfd   : > { %v3283_v38 = vpop.f32.mrb[42].mxu1 }
0x1cfe   : > { %v3284_v39 = vadd.f32 %v4973_v27, %v3283_v38  ;;  %v3285_v40 = vpop.f32.mrb[43].mxu1  ;;  %v3295_v41 = vmax.f32 %v3281_v36, 0.0 }
0x1d00   : > { %v3296_v43 = vmax.f32 %v3284_v39, 0.0 }
0x1d02   : > { %v3299_v47 = vpack.c.bf16 %v3296_v43, %v3295_v41 }
0x1d03   : > { %v3288_v49 = vpop.f32.mrb[44].mxu1 }
0x1d04   : > { %v3289_v50 = vadd.f32 %v4976_v31, %v3288_v49  ;;  %v3290_v54 = vpop.f32.mrb[45].mxu1  ;;  %5189 = vmatprep.mubr.msk.bf16.mxu0 %vm2628_vm4, %v3299_v47 }
0x1d05   : > { %v3291_v55 = vpop.f32.mrb[46].mxu1 }
0x1d06   : > { %v3292_v56 = vadd.f32 %v4979_v34, %v3291_v55  ;;  %v3293_v57 = vpop.f32.mrb[47].mxu1  ;;  %v3297_v58 = vmax.f32 %v3289_v50, 0.0 }
0x1d08   : > { %v3298_v59 = vmax.f32 %v3292_v56, 0.0 }
0x1d0a   : > { %v3300_v60 = vpack.c.bf16 %v3298_v59, %v3297_v58 }
0x1d0c   : > { %5190 = vmatmul.mubr.msk.bf16.vlgmr.msra.gmra.mrb[44].mxu0 %vm2628_vm4, %v3300_v60  ;;  %vm8746_vm4 = vcmask 1039360  }
0x1d0d   : > { %4847 = vmatprep.mubr.msk.bf16.mxu0 %vm2359_vm5, %v6431_v48 }
0x1ddf   : > { %v5191_v61 = vpop.f32.mrb[44].mxu0 }
0x1de0   : > { %3368 = vst.msk [vmem:[#allocation2 + $0x20] sm:$0xff] %vm1899_vm11, %v5191_v61  ;;  %v3349_v62 = vpop.f32.mrb[45].mxu0 }
0x1de1   : > { %3366 = vst.msk [vmem:[#allocation2] sm:$0xff] %vm1899_vm11, %v3349_v62  ;;  %v5192_v63 = vpop.f32.mrb[46].mxu0 }
0x1de2   : > { %3369 = vst.msk [vmem:[#allocation2 + $0x30] sm:$0xff] %vm1899_vm11, %v5192_v63  ;;  %v3352_v1 = vpop.f32.mrb[47].mxu0 }
0x1de3   : > { %3367 = vst.msk [vmem:[#allocation2 + $0x10] sm:$0xff] %vm1899_vm11, %v3352_v1 }
0x1de7   : > { %v3372_v2 = vld [vmem:[#allocation2 + $0x20] sm:$0xff] }
0x1de8   : > { %3523 = vst.msk [vmem:[#allocation2 + $0x20] sm:$0xff] %vm1899_vm11, %v7029_v0  ;;  %v3370_v3 = vld [vmem:[#allocation2] sm:$0xff] }
0x1de9   : > { %3535 = vst.msk [vmem:[#allocation2 + $0x20] sm:$0xff] %vm1910_vm9, %v7879_v5  ;;  %v3373_v4 = vld [vmem:[#allocation2 + $0x30] sm:$0xff] }
0x1dea   : > { %3521 = vst.msk [vmem:[#allocation2] sm:$0xff] %vm1899_vm11, %v7029_v0  ;;  %3524 = vst.msk [vmem:[#allocation2 + $0x30] sm:$0xff] %vm1899_vm11, %v7029_v0  ;;  %v6024_v7 = vpack.i.bf16 %v3373_v4, %v3372_v2  ;;  %v3371_v8 = vld [vmem:[#allocation2 + $0x10] sm:$0xff]  ;;  %v3451_v5 = vpack.c.bf16 %v3373_v4, %v3372_v2 }
0x1deb   : > { %3536 = vst.msk [vmem:[#allocation2 + $0x30] sm:$0xff] %vm1910_vm9, %v7883_v6  ;;  %v6019_v9 = vpack.i.bf16 %v3371_v8, %v3370_v3  ;;  %v3450_v10 = vpack.c.bf16 %v3371_v8, %v3370_v3 }
0x1dec   : > { %3522 = vst.msk [vmem:[#allocation2 + $0x10] sm:$0xff] %vm1899_vm11, %v7029_v0  ;;  %6025 = vrot.lane.b32.xlu1 %v6024_v7, %s8728_s1  ;;  %vm8753_vm11 = vmmov %vm8752_vm10 }
0x1ded   : > { %6020 = vrot.lane.b32.xlu0 %v6019_v9, %s8728_s1  ;;  %3477 = vmatpush1.bf16.msra.mxu0 %v3450_v10 }
0x1dee   : > { %3478 = vmatprep.subr.bf16.mxu0 %v7038_v29 }
0x1df0   : > { %v8204_v11 = vld [vmem:[#allocation2 + $0x20] sm:$0xff]  ;;  %6035 = vrot.lane.b32.xlu1 %v6024_v7, %s8732_s20 }
0x1df1   : > { %3853 = vst.msk [vmem:[#allocation2 + $0x20] sm:$0xff] %vm1594_vm12, %v7029_v0  ;;  %6030 = vrot.lane.b32.xlu0 %v6019_v9, %s8732_s20  ;;  %3479 = vmatpush1.bf16.msra.mxu0 %v3451_v5 }
0x1df2   : > { %3865 = vst.msk [vmem:[#allocation2 + $0x20] sm:$0xff] %vm1605_vm13, %v7809_v45  ;;  %v8212_v6 = vld [vmem:[#allocation2 + $0x30] sm:$0xff]  ;;  %3480 = vmatprep.subr.bf16.mxu0 %v7038_v29 }
0x1df3   : > { %3854 = vst.msk [vmem:[#allocation2 + $0x30] sm:$0xff] %vm1594_vm12, %v7029_v0  ;;  %v8219_v12 = vpack.i.bf16 %v8212_v6, %v8204_v11  ;;  %v3618_v42 = vpack.c.bf16 %v8212_v6, %v8204_v11 }
0x1df4   : > { %3866 = vst.msk [vmem:[#allocation2 + $0x30] sm:$0xff] %vm1605_vm13, %v7813_v46  ;;  %6045 = vrot.lane.b32.xlu1 %v6024_v7, %s8734_s17 }
0x1df5   : > { %6040 = vrot.lane.b32.xlu0 %v6019_v9, %s8734_s17 }
0x1df8   : > { %6055 = vrot.lane.b32.xlu1 %v6024_v7, %s8729_s16 }
0x1df9   : > { %6050 = vrot.lane.b32.xlu0 %v6019_v9, %s8729_s16  ;;  %v8232_v44 = vld [vmem:[#allocation2 + $0x20] sm:$0xff] }
0x1dfb   : > { %v8229_v45 = vld [vmem:[#allocation2 + $0x30] sm:$0xff] }
0x1dfc   : > { %6065 = vrot.lane.b32.xlu1 %v6024_v7, %s8730_s7  ;;  %v3948_v46 = vpack.c.bf16 %v8229_v45, %v8232_v44 }
0x1dfd   : > { %6060 = vrot.lane.b32.xlu0 %v6019_v9, %s8730_s7 }
0x1e00   : > { %6075 = vrot.lane.b32.xlu1 %v6024_v7, %s8735_s6  ;;  %v6433_v7 = vld [vmem:[%s8742_s22] ss:$8 sps:$4 sm:$0xff]  }
0x1e01   : > { %6070 = vrot.lane.b32.xlu0 %v6019_v9, %s8735_s6 }
0x1e5e   : > { %v6026_v13 = vpop.permute.xlu1 %6025 }
0x1e5f   : > { %v6021_v14 = vpop.permute.xlu0 %6020  ;;  %v6028_v18 = vunpack.i.h.bf16 %v6026_v13  ;;  %v6027_v19 = vunpack.i.l.bf16 %v6026_v13 }
0x1e60   : > { %v6023_v16 = vunpack.i.h.bf16 %v6021_v14  ;;  %v6022_v17 = vunpack.i.l.bf16 %v6021_v14 }
0x1e61   : > { %v3453_v52 = vpack.c.bf16 %v6028_v18, %v6027_v19 }
0x1e62   : > { %v3452_v20 = vpack.c.bf16 %v6023_v16, %v6022_v17  ;;  %v6036_v22 = vpop.permute.xlu1 %6035 }
0x1e63   : > { %v6031_v51 = vpop.permute.xlu0 %6030  ;;  %v6038_v23 = vunpack.i.h.bf16 %v6036_v22  ;;  %v6037_v24 = vunpack.i.l.bf16 %v6036_v22 }
0x1e64   : > { %3481 = vmatpush1.bf16.msra.mxu0 %v3452_v20  ;;  %v6033_v53 = vunpack.i.h.bf16 %v6031_v51  ;;  %v6032_v21 = vunpack.i.l.bf16 %v6031_v51  ;;  %v6437_v51 = vld [vmem:[%s8743_s13] sm:$0xff]  }
0x1e65   : > { %3482 = vmatprep.subr.bf16.mxu0 %v7038_v29  ;;  %v3455_v27 = vpack.c.bf16 %v6038_v23, %v6037_v24 }
0x1e66   : > { %v3454_v25 = vpack.c.bf16 %v6033_v53, %v6032_v21  ;;  %v6046_v31 = vpop.permute.xlu1 %6045 }
0x1e67   : > { %v6041_v26 = vpop.permute.xlu0 %6040  ;;  %v6048_v32 = vunpack.i.h.bf16 %v6046_v31  ;;  %v6047_v33 = vunpack.i.l.bf16 %v6046_v31 }
0x1e68   : > { %3483 = vmatpush1.bf16.msra.mxu0 %v3453_v52  ;;  %v6043_v28 = vunpack.i.h.bf16 %v6041_v26  ;;  %v6042_v30 = vunpack.i.l.bf16 %v6041_v26 }
0x1e69   : > { %3484 = vmatprep.subr.bf16.mxu0 %v7038_v29  ;;  %v3457_v36 = vpack.c.bf16 %v6048_v32, %v6047_v33 }
0x1e6a   : > { %v3456_v34 = vpack.c.bf16 %v6043_v28, %v6042_v30  ;;  %v6056_v39 = vpop.permute.xlu1 %6055 }
0x1e6b   : > { %v6051_v35 = vpop.permute.xlu0 %6050  ;;  %v6058_v40 = vunpack.i.h.bf16 %v6056_v39  ;;  %v6057_v41 = vunpack.i.l.bf16 %v6056_v39 }
0x1e6c   : > { %3485 = vmatpush1.bf16.msra.mxu0 %v3454_v25  ;;  %v6053_v37 = vunpack.i.h.bf16 %v6051_v35  ;;  %v6052_v38 = vunpack.i.l.bf16 %v6051_v35 }
0x1e6d   : > { %3486 = vmatprep.subr.bf16.mxu0 %v7038_v29  ;;  %v3459_v49 = vpack.c.bf16 %v6058_v40, %v6057_v41 }
0x1e6e   : > { %v3458_v43 = vpack.c.bf16 %v6053_v37, %v6052_v38  ;;  %v6066_v55 = vpop.permute.xlu1 %6065 }
0x1e6f   : > { %v6061_v47 = vpop.permute.xlu0 %6060  ;;  %v6068_v56 = vunpack.i.h.bf16 %v6066_v55  ;;  %v6067_v57 = vunpack.i.l.bf16 %v6066_v55 }
0x1e70   : > { %3487 = vmatpush1.bf16.msra.mxu0 %v3455_v27  ;;  %v6063_v50 = vunpack.i.h.bf16 %v6061_v47  ;;  %v6062_v54 = vunpack.i.l.bf16 %v6061_v47 }
0x1e71   : > { %3488 = vmatprep.subr.bf16.mxu0 %v7038_v29  ;;  %v3461_v60 = vpack.c.bf16 %v6068_v56, %v6067_v57 }
0x1e72   : > { %v3460_v58 = vpack.c.bf16 %v6063_v50, %v6062_v54  ;;  %v6076_v63 = vpop.permute.xlu1 %6075 }
0x1e73   : > { %v6071_v59 = vpop.permute.xlu0 %6070  ;;  %v6078_v1 = vunpack.i.h.bf16 %v6076_v63  ;;  %v6077_v2 = vunpack.i.l.bf16 %v6076_v63 }
0x1e74   : > { %3489 = vmatpush1.bf16.msra.mxu0 %v3456_v34  ;;  %v6073_v61 = vunpack.i.h.bf16 %v6071_v59  ;;  %v6072_v62 = vunpack.i.l.bf16 %v6071_v59 }
0x1e75   : > { %3490 = vmatprep.subr.bf16.mxu0 %v7038_v29  ;;  %v3463_v4 = vpack.c.bf16 %v6078_v1, %v6077_v2 }
0x1e76   : > { %v3462_v3 = vpack.c.bf16 %v6073_v61, %v6072_v62 }
0x1e78   : > { %3491 = vmatpush1.bf16.msra.mxu0 %v3457_v36 }
0x1e79   : > { %3492 = vmatprep.subr.bf16.mxu0 %v7038_v29 }
0x1e7c   : > { %3493 = vmatpush1.bf16.msra.mxu0 %v3458_v43 }
0x1e7d   : > { %3494 = vmatprep.subr.bf16.mxu0 %v7038_v29 }
0x1e80   : > { %3495 = vmatpush1.bf16.msra.mxu0 %v3459_v49 }
0x1e81   : > { %3496 = vmatprep.subr.bf16.mxu0 %v7038_v29 }
0x1e84   : > { %3497 = vmatpush1.bf16.msra.mxu0 %v3460_v58 }
0x1e85   : > { %3498 = vmatprep.subr.bf16.mxu0 %v7038_v29 }
0x1e88   : > { %3499 = vmatpush1.bf16.msra.mxu0 %v3461_v60 }
0x1e89   : > { %3500 = vmatprep.subr.bf16.mxu0 %v7038_v29 }
0x1e8c   : > { %3501 = vmatpush1.bf16.msra.mxu0 %v3462_v3 }
0x1e8d   : > { %3502 = vmatprep.subr.bf16.mxu0 %v7038_v29 }
0x1e90   : > { %3503 = vmatpush1.bf16.msra.mxu0 %v3463_v4 }
0x1e91   : > { %5193 = vmatprep.subr.bf16.mxu0 %v7029_v0 }
0x1e93   : > { %3509 = vmatmul.mubr.bf16.vlgmr.msra.gmra.mrb[48].mxu0 %v6433_v7 }
0x1e94   : > { %5197 = vmatprep.mubr.msk.bf16.mxu0 %vm7035_vm3, %v7029_v0  ;;  %5194 = vmatpush3.bf16.msra.mxu0 %v6437_v51 }
0x1e95   : > { %5195 = vmatprep.subr.bf16.mxu0 %v7029_v0 }
0x1f66   : > { %v3510_v8 = vpop.f32.mrb[48].mxu0 }
0x1f67   : > { %v3517_v9 = vmax.f32 %v3510_v8, 0.0  ;;  %v3512_v10 = vpop.f32.mrb[49].mxu0 }
0x1f68   : > { %v3513_v5 = vpop.f32.mrb[50].mxu0 }
0x1f69   : > { %v3518_v48 = vmax.f32 %v3513_v5, 0.0  ;;  %3527 = vrot.lane.b32.xlu0 %v3517_v9, %s8737_s11  ;;  %v3515_v13 = vpop.f32.mrb[51].mxu0 }
0x1f6a   : > { %v6438_v13 = vld [vmem:[%s8743_s13 + $0x8] sm:$0xff]  }
0x1f6b   : > { %3529 = vrot.lane.b32.xlu1 %v3518_v48, %s8737_s11  ;;  %v6434_v48 = vld [vmem:[#allocation21] ss:$8 sps:$4 sm:$0xff]   ;;  %5196 = vmatpush3.bf16.msra.mxu0 %v6438_v13 }
0x1f6c   : > { %5201 = vmatprep.subr.bf16.mxu0 %v7029_v0 }
0x1f6f   : > { %6085 = vrot.lane.b32.xlu1 %v8219_v12, %s8728_s1 }
0x1f73   : > { %6095 = vrot.lane.b32.xlu1 %v8219_v12, %s8732_s20 }
0x1f77   : > { %6105 = vrot.lane.b32.xlu1 %v8219_v12, %s8734_s17 }
0x1f7b   : > { %6115 = vrot.lane.b32.xlu1 %v8219_v12, %s8729_s16 }
0x1f7f   : > { %6125 = vrot.lane.b32.xlu1 %v8219_v12, %s8730_s7 }
0x1f83   : > { %6135 = vrot.lane.b32.xlu1 %v8219_v12, %s8735_s6  ;;  %v6436_v12 = vld [vmem:[#allocation21 + $0x4] ss:$8 sps:$4 sm:$0xff]  }
0x1f84   : > { %4850 = vmatprep.mubr.msk.bf16.mxu1 %vm2359_vm5, %v6436_v12 }
0x1fdb   : > { %v3528_v14 = vpop.permute.xlu0 %3527 }
0x1fdc   : > { %3533 = vst.msk [vmem:[#allocation2] sm:$0xff] %vm1910_vm9, %v3528_v14 }
0x1fdd   : > { %v3530_v16 = vpop.permute.xlu1 %3529 }
0x1fde   : > { %3534 = vst.msk [vmem:[#allocation2 + $0x10] sm:$0xff] %vm1910_vm9, %v3530_v16 }
0x1fe1   : > { %v6086_v11 = vpop.permute.xlu1 %6085 }
0x1fe2   : > { %v6088_v53 = vunpack.i.h.bf16 %v6086_v11  ;;  %v6087_v21 = vunpack.i.l.bf16 %v6086_v11 }
0x1fe3   : > { %v3537_v17 = vld [vmem:[#allocation2] sm:$0xff] }
0x1fe4   : > { %v3620_v24 = vpack.c.bf16 %v6088_v53, %v6087_v21 }
0x1fe5   : > { %v3538_v18 = vld [vmem:[#allocation2 + $0x10] sm:$0xff]  ;;  %v6096_v27 = vpop.permute.xlu1 %6095 }
0x1fe6   : > { %v6079_v19 = vpack.i.bf16 %v3538_v18, %v3537_v17  ;;  %v3617_v20 = vpack.c.bf16 %v3538_v18, %v3537_v17  ;;  %v6098_v28 = vunpack.i.h.bf16 %v6096_v27  ;;  %v6097_v30 = vunpack.i.l.bf16 %v6096_v27 }
0x1fe8   : > { %6080 = vrot.lane.b32.xlu0 %v6079_v19, %s8728_s1  ;;  %3644 = vmatpush1.bf16.msra.mxu1 %v3617_v20  ;;  %v3622_v33 = vpack.c.bf16 %v6098_v28, %v6097_v30 }
0x1fe9   : > { %3645 = vmatprep.subr.bf16.mxu1 %v7038_v29  ;;  %v6106_v36 = vpop.permute.xlu1 %6105 }
0x1fea   : > { %v6108_v37 = vunpack.i.h.bf16 %v6106_v36  ;;  %v6107_v38 = vunpack.i.l.bf16 %v6106_v36 }
0x1fec   : > { %6090 = vrot.lane.b32.xlu0 %v6079_v19, %s8732_s20  ;;  %3646 = vmatpush1.bf16.msra.mxu1 %v3618_v42  ;;  %v3624_v41 = vpack.c.bf16 %v6108_v37, %v6107_v38 }
0x1fed   : > { %3647 = vmatprep.subr.bf16.mxu1 %v7038_v29  ;;  %v6116_v49 = vpop.permute.xlu1 %6115 }
0x1fee   : > { %v6118_v50 = vunpack.i.h.bf16 %v6116_v49  ;;  %v6117_v54 = vunpack.i.l.bf16 %v6116_v49 }
0x1ff0   : > { %6100 = vrot.lane.b32.xlu0 %v6079_v19, %s8734_s17  ;;  %v3626_v57 = vpack.c.bf16 %v6118_v50, %v6117_v54 }
0x1ff1   : > { %v6126_v60 = vpop.permute.xlu1 %6125 }
0x1ff2   : > { %v6128_v61 = vunpack.i.h.bf16 %v6126_v60  ;;  %v6127_v62 = vunpack.i.l.bf16 %v6126_v60 }
0x1ff4   : > { %6110 = vrot.lane.b32.xlu0 %v6079_v19, %s8729_s16  ;;  %v3628_v2 = vpack.c.bf16 %v6128_v61, %v6127_v62 }
0x1ff5   : > { %v6136_v7 = vpop.permute.xlu1 %6135 }
0x1ff6   : > { %v6138_v8 = vunpack.i.h.bf16 %v6136_v7  ;;  %v6137_v9 = vunpack.i.l.bf16 %v6136_v7 }
0x1ff8   : > { %6120 = vrot.lane.b32.xlu0 %v6079_v19, %s8730_s7  ;;  %v3630_v5 = vpack.c.bf16 %v6138_v8, %v6137_v9  ;;  %v6440_v9 = vld [vmem:[%s8744_s0 + $0x4] ss:$8 sps:$4 sm:$0xff]  }
0x1ffc   : > { %6130 = vrot.lane.b32.xlu0 %v6079_v19, %s8735_s6 }
0x205a   : > { %v6081_v6 = vpop.permute.xlu0 %6080 }
0x205b   : > { %v6083_v42 = vunpack.i.h.bf16 %v6081_v6  ;;  %v6082_v52 = vunpack.i.l.bf16 %v6081_v6 }
0x205d   : > { %v3619_v22 = vpack.c.bf16 %v6083_v42, %v6082_v52 }
0x205e   : > { %v6091_v23 = vpop.permute.xlu0 %6090 }
0x205f   : > { %3648 = vmatpush1.bf16.msra.mxu1 %v3619_v22  ;;  %v6093_v25 = vunpack.i.h.bf16 %v6091_v23  ;;  %v6092_v26 = vunpack.i.l.bf16 %v6091_v23 }
0x2060   : > { %3649 = vmatprep.subr.bf16.mxu1 %v7038_v29 }
0x2061   : > { %v3621_v31 = vpack.c.bf16 %v6093_v25, %v6092_v26 }
0x2062   : > { %v6101_v32 = vpop.permute.xlu0 %6100 }
0x2063   : > { %3650 = vmatpush1.bf16.msra.mxu1 %v3620_v24  ;;  %v6103_v34 = vunpack.i.h.bf16 %v6101_v32  ;;  %v6102_v35 = vunpack.i.l.bf16 %v6101_v32 }
0x2064   : > { %3651 = vmatprep.subr.bf16.mxu1 %v7038_v29 }
0x2065   : > { %v3623_v39 = vpack.c.bf16 %v6103_v34, %v6102_v35 }
0x2066   : > { %v6111_v40 = vpop.permute.xlu0 %6110 }
0x2067   : > { %3652 = vmatpush1.bf16.msra.mxu1 %v3621_v31  ;;  %v6113_v43 = vunpack.i.h.bf16 %v6111_v40  ;;  %v6112_v47 = vunpack.i.l.bf16 %v6111_v40 }
0x2068   : > { %3653 = vmatprep.subr.bf16.mxu1 %v7038_v29 }
0x2069   : > { %v3625_v55 = vpack.c.bf16 %v6113_v43, %v6112_v47 }
0x206a   : > { %v6121_v56 = vpop.permute.xlu0 %6120 }
0x206b   : > { %3654 = vmatpush1.bf16.msra.mxu1 %v3622_v33  ;;  %v6123_v58 = vunpack.i.h.bf16 %v6121_v56  ;;  %v6122_v59 = vunpack.i.l.bf16 %v6121_v56  ;;  %v6439_v56 = vld [vmem:[#allocation23] sm:$0xff]  }
0x206c   : > { %3655 = vmatprep.subr.bf16.mxu1 %v7038_v29 }
0x206d   : > { %v3627_v63 = vpack.c.bf16 %v6123_v58, %v6122_v59 }
0x206e   : > { %v6131_v1 = vpop.permute.xlu0 %6130 }
0x206f   : > { %3656 = vmatpush1.bf16.msra.mxu1 %v3623_v39  ;;  %v6133_v3 = vunpack.i.h.bf16 %v6131_v1  ;;  %v6132_v4 = vunpack.i.l.bf16 %v6131_v1 }
0x2070   : > { %3657 = vmatprep.subr.bf16.mxu1 %v7038_v29 }
0x2071   : > { %v3629_v10 = vpack.c.bf16 %v6133_v3, %v6132_v4 }
0x2073   : > { %3658 = vmatpush1.bf16.msra.mxu1 %v3624_v41 }
0x2074   : > { %3659 = vmatprep.subr.bf16.mxu1 %v7038_v29 }
0x2077   : > { %3660 = vmatpush1.bf16.msra.mxu1 %v3625_v55 }
0x2078   : > { %3661 = vmatprep.subr.bf16.mxu1 %v7038_v29 }
0x207b   : > { %3662 = vmatpush1.bf16.msra.mxu1 %v3626_v57 }
0x207c   : > { %3663 = vmatprep.subr.bf16.mxu1 %v7038_v29 }
0x207f   : > { %3664 = vmatpush1.bf16.msra.mxu1 %v3627_v63  ;;  %v6174_v63 = vpack.i.bf16 %v8229_v45, %v8232_v44  ;;  %v6443_v45 = vld [vmem:[%s8745_s4] ss:$8 sps:$4 sm:$0xff]   ;;  %v6445_v44 = vld [vmem:[%s8745_s4 + $0x4] ss:$8 sps:$4 sm:$0xff]  }
0x2080   : > { %3665 = vmatprep.subr.bf16.mxu1 %v7038_v29 }
0x2083   : > { %3666 = vmatpush1.bf16.msra.mxu1 %v3628_v2 }
0x2084   : > { %3667 = vmatprep.subr.bf16.mxu1 %v7038_v29 }
0x2087   : > { %3668 = vmatpush1.bf16.msra.mxu1 %v3629_v10  ;;  %v6446_v10 = vld [vmem:[%s8745_s4 + $0x10] ss:$8 sps:$4 sm:$0xff]  }
0x2088   : > { %3669 = vmatprep.subr.bf16.mxu1 %v7038_v29 }
0x208b   : > { %3670 = vmatpush1.bf16.msra.mxu1 %v3630_v5  ;;  %v6451_v5 = vld [vmem:[%s8745_s4 + $0x24] ss:$8 sps:$4 sm:$0xff]  }
0x208c   : > { %3973 = vmatprep.subr.bf16.mxu1 %v7038_v29 }
0x208e   : > { %3676 = vmatmul.mubr.bf16.vlgmr.msra.gmra.mrb[48].mxu1 %v6434_v48  ;;  %v6449_v48 = vld [vmem:[%s8745_s4 + $0x20] ss:$8 sps:$4 sm:$0xff]  }
0x208f   : > { %4858 = vmatprep.mubr.msk.bf16.mxu1 %vm2359_vm5, %v6440_v9  ;;  %vm8747_vm5 = vmmov %vm8746_vm4 }
0x2161   : > { %v3677_v14 = vpop.f32.mrb[48].mxu1 }
0x2162   : > { %v3679_v16 = vpop.f32.mrb[49].mxu1  ;;  %v3684_v18 = vmax.f32 %v3677_v14, 0.0 }
0x2163   : > { %v3680_v17 = vpop.f32.mrb[50].mxu1 }
0x2164   : > { %v3685_v19 = vmax.f32 %v3680_v17, 0.0  ;;  %v3682_v20 = vpop.f32.mrb[51].mxu1 }
0x2166   : > { %v3686_v12 = vpack.c.bf16 %v3685_v19, %v3684_v18 }
0x2168   : > { %5198 = vmatmul.mubr.msk.bf16.vlgmr.msra.gmra.mrb[52].mxu0 %vm2161_vm8, %v3686_v12  ;;  %vm8750_vm8 = vcmask 1022976  }
0x2169   : > { %5215 = vmatprep.mubr.msk.bf16.mxu0 %vm7035_vm3, %v7029_v0  ;;  %vm8751_vm9 = vmmov %vm8750_vm8 }
0x223b   : > { %v3740_v51 = vpop.f32.mrb[52].mxu0 }
0x223c   : > { %3749 = vst.msk [vmem:[#allocation2] sm:$0xff] %vm1594_vm12, %v3740_v51  ;;  %v5199_v11 = vpop.f32.mrb[53].mxu0 }
0x223d   : > { %v3743_v6 = vpop.f32.mrb[54].mxu0 }
0x223e   : > { %3750 = vst.msk [vmem:[#allocation2 + $0x10] sm:$0xff] %vm1594_vm12, %v3743_v6  ;;  %v5200_v42 = vpop.f32.mrb[55].mxu0 }
0x2243   : > { %v3751_v52 = vld [vmem:[#allocation2] sm:$0xff] }
0x2244   : > { %3851 = vst.msk [vmem:[#allocation2] sm:$0xff] %vm1594_vm12, %v7029_v0 }
0x2245   : > { %v3752_v53 = vld [vmem:[#allocation2 + $0x10] sm:$0xff] }
0x2246   : > { %v6144_v21 = vpack.i.bf16 %v3752_v53, %v3751_v52  ;;  %3852 = vst.msk [vmem:[#allocation2 + $0x10] sm:$0xff] %vm1594_vm12, %v7029_v0  ;;  %v3791_v22 = vpack.c.bf16 %v3752_v53, %v3751_v52  ;;  %vm8754_vm12 = vcmask 1006592  }
0x2248   : > { %6145 = vrot.lane.b32.xlu1 %v6144_v21, %s8732_s20  ;;  %6140 = vrot.lane.b32.xlu0 %v6144_v21, %s8728_s1 }
0x2249   : > { %5202 = vmatpush3.bf16.msra.mxu0 %v3791_v22 }
0x224a   : > { %5203 = vmatprep.subr.bf16.mxu0 %v7029_v0 }
0x224c   : > { %6155 = vrot.lane.b32.xlu1 %v6144_v21, %s8729_s16  ;;  %6150 = vrot.lane.b32.xlu0 %v6144_v21, %s8734_s17 }
0x2250   : > { %6165 = vrot.lane.b32.xlu1 %v6144_v21, %s8735_s6  ;;  %6160 = vrot.lane.b32.xlu0 %v6144_v21, %s8730_s7 }
0x22ba   : > { %v6146_v23 = vpop.permute.xlu1 %6145  ;;  %v6141_v24 = vpop.permute.xlu0 %6140 }
0x22bb   : > { %v6143_v25 = vunpack.i.h.bf16 %v6141_v24  ;;  %v6142_v26 = vunpack.i.l.bf16 %v6141_v24  ;;  %v6148_v27 = vunpack.i.h.bf16 %v6146_v23  ;;  %v6147_v28 = vunpack.i.l.bf16 %v6146_v23 }
0x22bd   : > { %v3792_v30 = vpack.c.bf16 %v6143_v25, %v6142_v26  ;;  %v3793_v32 = vpack.c.bf16 %v6148_v27, %v6147_v28 }
0x22be   : > { %v6151_v31 = vpop.permute.xlu0 %6150  ;;  %v6156_v35 = vpop.permute.xlu1 %6155 }
0x22bf   : > { %5204 = vmatpush3.bf16.msra.mxu0 %v3792_v30  ;;  %v6153_v33 = vunpack.i.h.bf16 %v6151_v31  ;;  %v6152_v34 = vunpack.i.l.bf16 %v6151_v31  ;;  %v6158_v36 = vunpack.i.h.bf16 %v6156_v35  ;;  %v6157_v37 = vunpack.i.l.bf16 %v6156_v35 }
0x22c0   : > { %5205 = vmatprep.subr.bf16.mxu0 %v7029_v0 }
0x22c1   : > { %v3794_v38 = vpack.c.bf16 %v6153_v33, %v6152_v34  ;;  %v3795_v40 = vpack.c.bf16 %v6158_v36, %v6157_v37 }
0x22c2   : > { %v6161_v39 = vpop.permute.xlu0 %6160  ;;  %v6166_v47 = vpop.permute.xlu1 %6165 }
0x22c3   : > { %5206 = vmatpush3.bf16.msra.mxu0 %v3793_v32  ;;  %v6163_v41 = vunpack.i.h.bf16 %v6161_v39  ;;  %v6162_v43 = vunpack.i.l.bf16 %v6161_v39  ;;  %v6168_v49 = vunpack.i.h.bf16 %v6166_v47  ;;  %v6167_v50 = vunpack.i.l.bf16 %v6166_v47 }
0x22c4   : > { %5207 = vmatprep.subr.bf16.mxu0 %v7029_v0 }
0x22c5   : > { %v3796_v54 = vpack.c.bf16 %v6163_v41, %v6162_v43  ;;  %v3797_v55 = vpack.c.bf16 %v6168_v49, %v6167_v50 }
0x22c7   : > { %5208 = vmatpush3.bf16.msra.mxu0 %v3794_v38 }
0x22c8   : > { %5209 = vmatprep.subr.bf16.mxu0 %v7029_v0 }
0x22cb   : > { %5210 = vmatpush3.bf16.msra.mxu0 %v3795_v40 }
0x22cc   : > { %5211 = vmatprep.subr.bf16.mxu0 %v7029_v0 }
0x22cf   : > { %5212 = vmatpush3.bf16.msra.mxu0 %v3796_v54 }
0x22d0   : > { %5213 = vmatprep.subr.bf16.mxu0 %v7029_v0 }
0x22d3   : > { %5214 = vmatpush3.bf16.msra.mxu0 %v3797_v55 }
0x22d4   : > { %4068 = vmatprep.subr.bf16.mxu0 %v6445_v44 }
0x22d6   : > { %5216 = vmatmul.mubr.msk.bf16.vlgmr.msra.gmra.mrb[56].mxu0 %vm1660_vm14, %v6439_v56 }
0x22d7   : > { %4100 = vmatprep.mubr.bf16.mxu0 %v7038_v29  ;;  %4069 = vmatpush1.bf16.msra.mxu0 %v6443_v45 }
0x23a9   : > { %v3840_v57 = vpop.f32.mrb[56].mxu0 }
0x23aa   : > { %v3847_v58 = vmax.f32 %v3840_v57, 0.0  ;;  %v5217_v59 = vpop.f32.mrb[57].mxu0 }
0x23ab   : > { %v3843_v60 = vpop.f32.mrb[58].mxu0 }
0x23ac   : > { %v3848_v61 = vmax.f32 %v3843_v60, 0.0  ;;  %3857 = vrot.lane.b32.xlu0 %v3847_v58, %s8737_s11  ;;  %v5218_v62 = vpop.f32.mrb[59].mxu0 }
0x23ae   : > { %3859 = vrot.lane.b32.xlu1 %v3848_v61, %s8737_s11 }
0x23b2   : > { %6175 = vrot.lane.b32.xlu1 %v6174_v63, %s8728_s1 }
0x23b6   : > { %6185 = vrot.lane.b32.xlu1 %v6174_v63, %s8732_s20 }
0x23ba   : > { %6195 = vrot.lane.b32.xlu1 %v6174_v63, %s8734_s17 }
0x23be   : > { %6205 = vrot.lane.b32.xlu1 %v6174_v63, %s8729_s16 }
0x23c2   : > { %6215 = vrot.lane.b32.xlu1 %v6174_v63, %s8730_s7 }
0x23c6   : > { %6225 = vrot.lane.b32.xlu1 %v6174_v63, %s8735_s6 }
0x241e   : > { %v3858_v1 = vpop.permute.xlu0 %3857 }
0x241f   : > { %3863 = vst.msk [vmem:[#allocation2] sm:$0xff] %vm1605_vm13, %v3858_v1  ;;  %v6442_v1 = vld [vmem:[%s8744_s0] ss:$8 sps:$4 sm:$0xff]  }
0x2420   : > { %v3860_v2 = vpop.permute.xlu1 %3859 }
0x2421   : > { %3864 = vst.msk [vmem:[#allocation2 + $0x10] sm:$0xff] %vm1605_vm13, %v3860_v2  ;;  %v6454_v2 = vld [vmem:[%s8745_s4 + $0x34] ss:$8 sps:$4 sm:$0xff]   ;;  %vm8755_vm13 = vmmov %vm8754_vm12 }
0x2424   : > { %v6176_v13 = vpop.permute.xlu1 %6175 }
0x2425   : > { %v6178_v18 = vunpack.i.h.bf16 %v6176_v13  ;;  %v6177_v19 = vunpack.i.l.bf16 %v6176_v13 }
0x2426   : > { %v3867_v3 = vld [vmem:[#allocation2] sm:$0xff] }
0x2427   : > { %4248 = vst [vmem:[#allocation2] sm:$0xff] %v7029_v0  ;;  %v3950_v51 = vpack.c.bf16 %v6178_v18, %v6177_v19 }
0x2428   : > { %v3868_v4 = vld [vmem:[#allocation2 + $0x10] sm:$0xff]  ;;  %v6186_v42 = vpop.permute.xlu1 %6185 }
0x2429   : > { %v6169_v7 = vpack.i.bf16 %v3868_v4, %v3867_v3  ;;  %v3947_v8 = vpack.c.bf16 %v3868_v4, %v3867_v3  ;;  %4250 = vst [vmem:[#allocation2 + $0x10] sm:$0xff] %v7029_v0  ;;  %v6188_v52 = vunpack.i.h.bf16 %v6186_v42  ;;  %v6187_v53 = vunpack.i.l.bf16 %v6186_v42 }
0x242a   : > { %4258 = vst.msk [vmem:[#allocation2 + $0x10] sm:$0xff] %vm1077_vm1, %v7717_v15 }
0x242b   : > { %6170 = vrot.lane.b32.xlu0 %v6169_v7, %s8728_s1  ;;  %3974 = vmatpush1.bf16.msra.mxu1 %v3947_v8  ;;  %v3952_v23 = vpack.c.bf16 %v6188_v52, %v6187_v53 }
0x242c   : > { %3975 = vmatprep.subr.bf16.mxu1 %v7038_v29  ;;  %v6196_v26 = vpop.permute.xlu1 %6195 }
0x242d   : > { %v6198_v27 = vunpack.i.h.bf16 %v6196_v26  ;;  %v6197_v28 = vunpack.i.l.bf16 %v6196_v26 }
0x242f   : > { %6180 = vrot.lane.b32.xlu0 %v6169_v7, %s8732_s20  ;;  %3976 = vmatpush1.bf16.msra.mxu1 %v3948_v46  ;;  %v6448_v46 = vld [vmem:[%s8745_s4 + $0x14] ss:$8 sps:$4 sm:$0xff]   ;;  %v3954_v32 = vpack.c.bf16 %v6198_v27, %v6197_v28 }
0x2430   : > { %3977 = vmatprep.subr.bf16.mxu1 %v7038_v29  ;;  %4070 = vmatprep.subr.bf16.mxu0 %v6448_v46  ;;  %v6206_v35 = vpop.permute.xlu1 %6205 }
0x2431   : > { %4071 = vmatpush1.bf16.msra.mxu0 %v6446_v10  ;;  %v6208_v36 = vunpack.i.h.bf16 %v6206_v35  ;;  %v6207_v37 = vunpack.i.l.bf16 %v6206_v35 }
0x2432   : > { %4072 = vmatprep.subr.bf16.mxu0 %v6451_v5 }
0x2433   : > { %6190 = vrot.lane.b32.xlu0 %v6169_v7, %s8734_s17  ;;  %v3956_v40 = vpack.c.bf16 %v6208_v36, %v6207_v37 }
0x2434   : > { %v6216_v47 = vpop.permute.xlu1 %6215 }
0x2435   : > { %4073 = vmatpush1.bf16.msra.mxu0 %v6449_v48  ;;  %v6218_v49 = vunpack.i.h.bf16 %v6216_v47  ;;  %v6217_v50 = vunpack.i.l.bf16 %v6216_v47 }
0x2436   : > { %4074 = vmatprep.subr.bf16.mxu0 %v6454_v2 }
0x2437   : > { %6200 = vrot.lane.b32.xlu0 %v6169_v7, %s8729_s16  ;;  %v3958_v56 = vpack.c.bf16 %v6218_v49, %v6217_v50 }
0x2438   : > { %v6226_v59 = vpop.permute.xlu1 %6225 }
0x2439   : > { %v6228_v60 = vunpack.i.h.bf16 %v6226_v59  ;;  %v6227_v61 = vunpack.i.l.bf16 %v6226_v59 }
0x243b   : > { %6210 = vrot.lane.b32.xlu0 %v6169_v7, %s8730_s7  ;;  %v3960_v63 = vpack.c.bf16 %v6228_v60, %v6227_v61 }
0x243f   : > { %6220 = vrot.lane.b32.xlu0 %v6169_v7, %s8735_s6 }
0x249d   : > { %v6171_v14 = vpop.permute.xlu0 %6170 }
0x249e   : > { %v6173_v16 = vunpack.i.h.bf16 %v6171_v14  ;;  %v6172_v17 = vunpack.i.l.bf16 %v6171_v14 }
0x24a0   : > { %v3949_v20 = vpack.c.bf16 %v6173_v16, %v6172_v17 }
0x24a1   : > { %v6181_v12 = vpop.permute.xlu0 %6180 }
0x24a2   : > { %3978 = vmatpush1.bf16.msra.mxu1 %v3949_v20  ;;  %v6183_v11 = vunpack.i.h.bf16 %v6181_v12  ;;  %v6182_v6 = vunpack.i.l.bf16 %v6181_v12 }
0x24a3   : > { %3979 = vmatprep.subr.bf16.mxu1 %v7038_v29 }
0x24a4   : > { %v3951_v21 = vpack.c.bf16 %v6183_v11, %v6182_v6 }
0x24a5   : > { %v6191_v22 = vpop.permute.xlu0 %6190 }
0x24a6   : > { %3980 = vmatpush1.bf16.msra.mxu1 %v3950_v51  ;;  %v6193_v24 = vunpack.i.h.bf16 %v6191_v22  ;;  %v6192_v25 = vunpack.i.l.bf16 %v6191_v22 }
0x24a7   : > { %3981 = vmatprep.subr.bf16.mxu1 %v7038_v29 }
0x24a8   : > { %v3953_v30 = vpack.c.bf16 %v6193_v24, %v6192_v25 }
0x24a9   : > { %v6201_v31 = vpop.permute.xlu0 %6200 }
0x24aa   : > { %3982 = vmatpush1.bf16.msra.mxu1 %v3951_v21  ;;  %v6203_v33 = vunpack.i.h.bf16 %v6201_v31  ;;  %v6202_v34 = vunpack.i.l.bf16 %v6201_v31 }
0x24ab   : > { %3983 = vmatprep.subr.bf16.mxu1 %v7038_v29 }
0x24ac   : > { %v3955_v38 = vpack.c.bf16 %v6203_v33, %v6202_v34 }
0x24ad   : > { %v6211_v39 = vpop.permute.xlu0 %6210 }
0x24ae   : > { %3984 = vmatpush1.bf16.msra.mxu1 %v3952_v23  ;;  %v6213_v41 = vunpack.i.h.bf16 %v6211_v39  ;;  %v6212_v43 = vunpack.i.l.bf16 %v6211_v39 }
0x24af   : > { %3985 = vmatprep.subr.bf16.mxu1 %v7038_v29 }
0x24b0   : > { %v3957_v54 = vpack.c.bf16 %v6213_v41, %v6212_v43 }
0x24b1   : > { %v6221_v55 = vpop.permute.xlu0 %6220 }
0x24b2   : > { %3986 = vmatpush1.bf16.msra.mxu1 %v3953_v30  ;;  %v6223_v57 = vunpack.i.h.bf16 %v6221_v55  ;;  %v6222_v58 = vunpack.i.l.bf16 %v6221_v55 }
0x24b3   : > { %3987 = vmatprep.subr.bf16.mxu1 %v7038_v29 }
0x24b4   : > { %v3959_v62 = vpack.c.bf16 %v6223_v57, %v6222_v58 }
0x24b6   : > { %3988 = vmatpush1.bf16.msra.mxu1 %v3954_v32 }
0x24b7   : > { %3989 = vmatprep.subr.bf16.mxu1 %v7038_v29 }
0x24ba   : > { %3990 = vmatpush1.bf16.msra.mxu1 %v3955_v38 }
0x24bb   : > { %3991 = vmatprep.subr.bf16.mxu1 %v7038_v29 }
0x24be   : > { %3992 = vmatpush1.bf16.msra.mxu1 %v3956_v40 }
0x24bf   : > { %3993 = vmatprep.subr.bf16.mxu1 %v7038_v29 }
0x24c2   : > { %3994 = vmatpush1.bf16.msra.mxu1 %v3957_v54 }
0x24c3   : > { %3995 = vmatprep.subr.bf16.mxu1 %v7038_v29 }
0x24c6   : > { %3996 = vmatpush1.bf16.msra.mxu1 %v3958_v56 }
0x24c7   : > { %3997 = vmatprep.subr.bf16.mxu1 %v7038_v29 }
0x24ca   : > { %3998 = vmatpush1.bf16.msra.mxu1 %v3959_v62 }
0x24cb   : > { %3999 = vmatprep.subr.bf16.mxu1 %v7038_v29  ;;  %v6452_v29 = vld [vmem:[%s8745_s4 + $0x30] ss:$8 sps:$4 sm:$0xff]  }
0x24cc   : > { %4075 = vmatpush1.bf16.msra.mxu0 %v6452_v29 }
0x24cd   : > { %5219 = vmatprep.subr.bf16.mxu0 %v7029_v0 }
0x24ce   : > { %4000 = vmatpush1.bf16.msra.mxu1 %v3960_v63 }
0x24cf   : > { %5237 = vmatprep.subr.bf16.mxu1 %v7029_v0 }
0x24d1   : > { %4006 = vmatmul.mubr.bf16.vlgmr.msra.gmra.mrb[52].mxu1 %v6442_v1 }
0x24d2   : > { %5251 = vmatprep.mubr.msk.bf16.mxu1 %vm7035_vm3, %v7029_v0 }
0x25a4   : > { %v4007_v3 = vpop.f32.mrb[52].mxu1 }
0x25a5   : > { %v4009_v4 = vpop.f32.mrb[53].mxu1  ;;  %v4014_v8 = vmax.f32 %v4007_v3, 0.0 }
0x25a6   : > { %v4010_v7 = vpop.f32.mrb[54].mxu1 }
0x25a7   : > { %v4015_v9 = vmax.f32 %v4010_v7, 0.0  ;;  %v4012_v45 = vpop.f32.mrb[55].mxu1 }
0x25a9   : > { %v4016_v44 = vpack.c.bf16 %v4015_v9, %v4014_v8 }
0x25ab   : > { %4867 = vmatmul.mubr.msk.bf16.vlgmr.msra.gmra.mrb[60].mxu0 %vm1852_vm15, %v4016_v44  ;;  %vm8756_vm15 = vcmask 998400  }
0x25ac   : > { %5233 = vmatprep.mubr.msk.bf16.mxu0 %vm7035_vm3, %v7029_v0 }
0x267e   : > { %v4102_v46 = vpop.f32.mrb[60].mxu0 }
0x267f   : > { %v4104_v10 = vpop.f32.mrb[61].mxu0 }
0x2680   : > { %4113 = vst.msk [vmem:[#allocation2 + $0x8] sm:$0xff] %vm1071_vm0, %v4104_v10  ;;  %v4106_v5 = vpop.f32.mrb[62].mxu0 }
0x2681   : > { %v4108_v48 = vpop.f32.mrb[63].mxu0  ;;  %v4196_v13 = vpack.c.bf16 %v4106_v5, %v4102_v46 }
0x2682   : > { %4115 = vst.msk [vmem:[#allocation2 + $0x18] sm:$0xff] %vm1071_vm0, %v4108_v48 }
0x2683   : > { %5220 = vmatpush3.bf16.msra.mxu0 %v4196_v13 }
0x2684   : > { %5221 = vmatprep.subr.bf16.mxu0 %v7029_v0 }
0x2687   : > { %v4118_v14 = vld [vmem:[#allocation2 + $0x8] sm:$0xff] }
0x2688   : > { %v6229_v16 = vpack.i.bf16 %v4118_v14, %v4102_v46  ;;  %4249 = vst.msk [vmem:[#allocation2 + $0x8] sm:$0xff] %vm1071_vm0, %v7029_v0  ;;  %v4111_v46 = vld [vmem:[#allocation24] sm:$0xf] }
0x2689   : > { %v4119_v17 = vld [vmem:[#allocation2 + $0x18] sm:$0xff] }
0x268a   : > { %4251 = vst.msk [vmem:[#allocation2 + $0x18] sm:$0xff] %vm1071_vm0, %v7029_v0  ;;  %6230 = vrot.lane.b32.xlu0 %v6229_v16, %s8728_s1  ;;  %v6259_v18 = vpack.i.bf16 %v4119_v17, %v4106_v5  ;;  %v4261_v17 = vld [vmem:[#allocation2 + $0x10] sm:$0xff] }
0x268b   : > { %4259 = vst.msk [vmem:[#allocation2 + $0x18] sm:$0xff] %vm1079_vm2, %v7717_v15 }
0x268c   : > { %6260 = vrot.lane.b32.xlu1 %v6259_v18, %s8728_s1 }
0x268e   : > { %6235 = vrot.lane.b32.xlu0 %v6229_v16, %s8732_s20 }
0x2690   : > { %6265 = vrot.lane.b32.xlu1 %v6259_v18, %s8732_s20 }
0x2692   : > { %6240 = vrot.lane.b32.xlu0 %v6229_v16, %s8734_s17  ;;  %v4263_v14 = vld [vmem:[#allocation2 + $0x18] sm:$0xff] }
0x2694   : > { %6270 = vrot.lane.b32.xlu1 %v6259_v18, %s8734_s17 }
0x2696   : > { %6245 = vrot.lane.b32.xlu0 %v6229_v16, %s8729_s16 }
0x2698   : > { %6275 = vrot.lane.b32.xlu1 %v6259_v18, %s8729_s16 }
0x269a   : > { %6250 = vrot.lane.b32.xlu0 %v6229_v16, %s8730_s7 }
0x269c   : > { %6280 = vrot.lane.b32.xlu1 %v6259_v18, %s8730_s7 }
0x269e   : > { %6255 = vrot.lane.b32.xlu0 %v6229_v16, %s8735_s6 }
0x26a0   : > { %6285 = vrot.lane.b32.xlu1 %v6259_v18, %s8735_s6  ;;  %v6289_v18 = vpack.i.bf16 %v4263_v14, %v4261_v17  ;;  %v4247_v14 = vld [vmem:[#allocation26] sm:$0xf] }
0x26fc   : > { %v6231_v15 = vpop.permute.xlu0 %6230 }
0x26fd   : > { %v6233_v19 = vunpack.i.h.bf16 %v6231_v15  ;;  %v6232_v20 = vunpack.i.l.bf16 %v6231_v15 }
0x26fe   : > { %v6261_v12 = vpop.permute.xlu1 %6260 }
0x26ff   : > { %v6263_v51 = vunpack.i.h.bf16 %v6261_v12  ;;  %v6262_v11 = vunpack.i.l.bf16 %v6261_v12  ;;  %v4132_v42 = vsel %vm8746_vm4, %v6232_v20, %v6233_v19  ;;  %vm8757_vm4 = vmmov %vm8756_vm15 }
0x2700   : > { %v6236_v6 = vpop.permute.xlu0 %6235 }
0x2701   : > { %v4133_v52 = vsel %vm8747_vm5, %v6262_v11, %v6263_v51  ;;  %v6238_v53 = vunpack.i.h.bf16 %v6236_v6  ;;  %v6237_v21 = vunpack.i.l.bf16 %v6236_v6 }
0x2702   : > { %v4197_v22 = vpack.c.bf16 %v4133_v52, %v4132_v42  ;;  %v6266_v23 = vpop.permute.xlu1 %6265 }
0x2703   : > { %v6268_v24 = vunpack.i.h.bf16 %v6266_v23  ;;  %v6267_v25 = vunpack.i.l.bf16 %v6266_v23  ;;  %v4144_v27 = vsel %vm8748_vm6, %v6237_v21, %v6238_v53 }
0x2704   : > { %v6241_v26 = vpop.permute.xlu0 %6240  ;;  %5222 = vmatpush3.bf16.msra.mxu0 %v4197_v22 }
0x2705   : > { %v4145_v28 = vsel %vm8749_vm7, %v6267_v25, %v6268_v24  ;;  %v6243_v30 = vunpack.i.h.bf16 %v6241_v26  ;;  %v6242_v31 = vunpack.i.l.bf16 %v6241_v26  ;;  %5223 = vmatprep.subr.bf16.mxu0 %v7029_v0  ;;  %vm8762_vm7 = vmmov %vm8750_vm8 }
0x2706   : > { %v4198_v32 = vpack.c.bf16 %v4145_v28, %v4144_v27  ;;  %v6271_v33 = vpop.permute.xlu1 %6270 }
0x2707   : > { %v6273_v34 = vunpack.i.h.bf16 %v6271_v33  ;;  %v6272_v35 = vunpack.i.l.bf16 %v6271_v33  ;;  %v4156_v37 = vsel %vm8750_vm8, %v6242_v31, %v6243_v30  ;;  %vm8763_vm8 = vmmov %vm8762_vm7 }
0x2708   : > { %v6246_v36 = vpop.permute.xlu0 %6245  ;;  %5224 = vmatpush3.bf16.msra.mxu0 %v4198_v32 }
0x2709   : > { %v4157_v38 = vsel %vm8751_vm9, %v6272_v35, %v6273_v34  ;;  %v6248_v39 = vunpack.i.h.bf16 %v6246_v36  ;;  %v6247_v40 = vunpack.i.l.bf16 %v6246_v36  ;;  %5225 = vmatprep.subr.bf16.mxu0 %v7029_v0  ;;  %vm8764_vm9 = vmmov %vm8752_vm10 }
0x270a   : > { %v4199_v41 = vpack.c.bf16 %v4157_v38, %v4156_v37  ;;  %v6276_v43 = vpop.permute.xlu1 %6275 }
0x270b   : > { %v6278_v47 = vunpack.i.h.bf16 %v6276_v43  ;;  %v6277_v49 = vunpack.i.l.bf16 %v6276_v43  ;;  %v4168_v54 = vsel %vm8752_vm10, %v6247_v40, %v6248_v39  ;;  %vm8765_vm10 = vmmov %vm8764_vm9 }
0x270c   : > { %v6251_v50 = vpop.permute.xlu0 %6250  ;;  %5226 = vmatpush3.bf16.msra.mxu0 %v4199_v41 }
0x270d   : > { %v4169_v55 = vsel %vm8753_vm11, %v6277_v49, %v6278_v47  ;;  %v6253_v56 = vunpack.i.h.bf16 %v6251_v50  ;;  %v6252_v57 = vunpack.i.l.bf16 %v6251_v50  ;;  %5227 = vmatprep.subr.bf16.mxu0 %v7029_v0  ;;  %vm8766_vm11 = vmmov %vm8754_vm12 }
0x270e   : > { %v4200_v58 = vpack.c.bf16 %v4169_v55, %v4168_v54  ;;  %v6281_v59 = vpop.permute.xlu1 %6280 }
0x270f   : > { %v6283_v60 = vunpack.i.h.bf16 %v6281_v59  ;;  %v6282_v61 = vunpack.i.l.bf16 %v6281_v59  ;;  %v4180_v63 = vsel %vm8754_vm12, %v6252_v57, %v6253_v56  ;;  %vm8767_vm12 = vmmov %vm8766_vm11 }
0x2710   : > { %v6256_v62 = vpop.permute.xlu0 %6255  ;;  %5228 = vmatpush3.bf16.msra.mxu0 %v4200_v58 }
0x2711   : > { %v4181_v1 = vsel %vm8755_vm13, %v6282_v61, %v6283_v60  ;;  %v6258_v2 = vunpack.i.h.bf16 %v6256_v62  ;;  %v6257_v29 = vunpack.i.l.bf16 %v6256_v62  ;;  %5229 = vmatprep.subr.bf16.mxu0 %v7029_v0  ;;  %vm8768_vm13 = vmmov %vm8757_vm4 }
0x2712   : > { %v4201_v3 = vpack.c.bf16 %v4181_v1, %v4180_v63  ;;  %v6286_v4 = vpop.permute.xlu1 %6285 }
0x2713   : > { %v6288_v7 = vunpack.i.h.bf16 %v6286_v4  ;;  %v6287_v8 = vunpack.i.l.bf16 %v6286_v4  ;;  %v4192_v9 = vsel %vm8756_vm15, %v6257_v29, %v6258_v2  ;;  %vm8769_vm15 = vmmov %vm8757_vm4 }
0x2714   : > { %5230 = vmatpush3.bf16.msra.mxu0 %v4201_v3 }
0x2715   : > { %v4193_v45 = vsel %vm8757_vm4, %v6287_v8, %v6288_v7  ;;  %5231 = vmatprep.subr.bf16.mxu0 %v7029_v0  ;;  %vm8773_vm4 = vmmov %vm8764_vm9 }
0x2716   : > { %v4202_v44 = vpack.c.bf16 %v4193_v45, %v4192_v9 }
0x2718   : > { %5232 = vmatpush3.bf16.msra.mxu0 %v4202_v44 }
0x2719   : > { %5255 = vmatprep.subr.bf16.mxu0 %v7029_v0 }
0x271b   : > { %5234 = vmatmul.mubr.msk.bf16.vlgmr.msra.gmra.mrb[64].mxu0 %vm1660_vm14, %v4111_v46 }
0x271c   : > { %5263 = vmatprep.mubr.msk.bf16.mxu0 %vm7035_vm3, %v7029_v0 }
0x27ee   : > { %v4240_v10 = vpop.f32.mrb[64].mxu0 }
0x27ef   : > { %v4246_v5 = vmax.f32 %v4240_v10, 0.0  ;;  %v5235_v48 = vpop.f32.mrb[65].mxu0 }
0x27f0   : > { %v4243_v13 = vpop.f32.mrb[66].mxu0 }
0x27f1   : > { %4253 = vrot.lane.b32.xlu0 %v4246_v5, %s8737_s11  ;;  %v5236_v16 = vpop.f32.mrb[67].mxu0 }
0x27f5   : > { %6290 = vrot.lane.b32.xlu0 %v6289_v18, %s8728_s1 }
0x27f9   : > { %6295 = vrot.lane.b32.xlu0 %v6289_v18, %s8732_s20 }
0x27fd   : > { %6300 = vrot.lane.b32.xlu0 %v6289_v18, %s8734_s17 }
0x2801   : > { %6305 = vrot.lane.b32.xlu0 %v6289_v18, %s8729_s16 }
0x2805   : > { %6310 = vrot.lane.b32.xlu0 %v6289_v18, %s8730_s7 }
0x2809   : > { %6345 = vrot.lane.b32.xlu0 %v6289_v18, %s8735_s6 }
0x2863   : > { %v4254_v15 = vpop.permute.xlu0 %4253 }
0x2864   : > { %4256 = vst.msk [vmem:[#allocation2] sm:$0xff] %vm1077_vm1, %v4254_v15 }
0x2865   : > { %4257 = vst.msk [vmem:[#allocation2 + $0x8] sm:$0xff] %vm1079_vm2, %v4254_v15 }
0x2867   : > { %v6291_v11 = vpop.permute.xlu0 %6290 }
0x2868   : > { %v6293_v52 = vunpack.i.h.bf16 %v6291_v11  ;;  %v6292_v53 = vunpack.i.l.bf16 %v6291_v11 }
0x286b   : > { %v4260_v19 = vld [vmem:[#allocation2] sm:$0xff]  ;;  %v6296_v6 = vpop.permute.xlu0 %6295 }
0x286c   : > { %v4262_v20 = vld [vmem:[#allocation2 + $0x8] sm:$0xff]  ;;  %4392 = vst [vmem:[#allocation2] sm:$0xff] %v7029_v0  ;;  %v4340_v51 = vpack.c.bf16 %v4261_v17, %v4260_v19  ;;  %v6298_v25 = vunpack.i.h.bf16 %v6296_v6  ;;  %v6297_v26 = vunpack.i.l.bf16 %v6296_v6 }
0x286d   : > { %v6314_v12 = vpack.i.bf16 %v4262_v20, %v4260_v19  ;;  %4393 = vst.msk [vmem:[#allocation2 + $0x8] sm:$0xff] %vm1071_vm0, %v7029_v0  ;;  %vm8758_vm0 = vmmov %vm8747_vm5 }
0x286e   : > { %5238 = vmatpush3.bf16.msra.mxu1 %v4340_v51  ;;  %v4277_v24 = vsel %vm8758_vm0, %v6292_v53, %v6293_v52  ;;  %vm8759_vm3 = vmmov %vm8758_vm0 }
0x286f   : > { %6315 = vrot.lane.b32.xlu1 %v6314_v12, %s8728_s1  ;;  %5239 = vmatprep.subr.bf16.mxu1 %v7029_v0  ;;  %v6301_v42 = vpop.permute.xlu0 %6300  ;;  %vm8760_vm5 = vmmov %vm8748_vm6 }
0x2870   : > { %v4289_v34 = vsel %vm8760_vm5, %v6297_v26, %v6298_v25  ;;  %v6303_v35 = vunpack.i.h.bf16 %v6301_v42  ;;  %v6302_v36 = vunpack.i.l.bf16 %v6301_v42  ;;  %vm8761_vm6 = vmmov %vm8760_vm5 }
0x2872   : > { %v4301_v47 = vsel %vm8762_vm7, %v6302_v36, %v6303_v35 }
0x2873   : > { %6320 = vrot.lane.b32.xlu1 %v6314_v12, %s8732_s20  ;;  %v6306_v28 = vpop.permute.xlu0 %6305 }
0x2874   : > { %v6308_v49 = vunpack.i.h.bf16 %v6306_v28  ;;  %v6307_v50 = vunpack.i.l.bf16 %v6306_v28 }
0x2876   : > { %v4313_v59 = vsel %vm8764_vm9, %v6307_v50, %v6308_v49 }
0x2877   : > { %6325 = vrot.lane.b32.xlu1 %v6314_v12, %s8734_s17  ;;  %v6311_v43 = vpop.permute.xlu0 %6310 }
0x2878   : > { %v6313_v60 = vunpack.i.h.bf16 %v6311_v43  ;;  %v6312_v61 = vunpack.i.l.bf16 %v6311_v43 }
0x287a   : > { %v4325_v4 = vsel %vm8766_vm11, %v6312_v61, %v6313_v60 }
0x287b   : > { %6330 = vrot.lane.b32.xlu1 %v6314_v12, %s8729_s16  ;;  %v6346_v63 = vpop.permute.xlu0 %6345 }
0x287c   : > { %v6348_v7 = vunpack.i.h.bf16 %v6346_v63  ;;  %v6347_v8 = vunpack.i.l.bf16 %v6346_v63 }
0x287e   : > { %v4337_v5 = vsel %vm8768_vm13, %v6347_v8, %v6348_v7 }
0x287f   : > { %6335 = vrot.lane.b32.xlu1 %v6314_v12, %s8730_s7 }
0x2883   : > { %6340 = vrot.lane.b32.xlu1 %v6314_v12, %s8735_s6 }
0x28e1   : > { %v6316_v21 = vpop.permute.xlu1 %6315 }
0x28e2   : > { %v6318_v22 = vunpack.i.h.bf16 %v6316_v21  ;;  %v6317_v23 = vunpack.i.l.bf16 %v6316_v21 }
0x28e4   : > { %v4276_v27 = vsel %vm8759_vm3, %v6317_v23, %v6318_v22  ;;  %vm8775_vm3 = vmmov %vm8766_vm11 }
0x28e5   : > { %v4341_v30 = vpack.c.bf16 %v4277_v24, %v4276_v27  ;;  %v6321_v31 = vpop.permute.xlu1 %6320 }
0x28e6   : > { %v6323_v32 = vunpack.i.h.bf16 %v6321_v31  ;;  %v6322_v33 = vunpack.i.l.bf16 %v6321_v31 }
0x28e7   : > { %5240 = vmatpush3.bf16.msra.mxu1 %v4341_v30 }
0x28e8   : > { %v4288_v37 = vsel %vm8761_vm6, %v6322_v33, %v6323_v32  ;;  %5241 = vmatprep.subr.bf16.mxu1 %v7029_v0  ;;  %vm8777_vm6 = vcmask 457728  }
0x28e9   : > { %v4342_v38 = vpack.c.bf16 %v4289_v34, %v4288_v37  ;;  %v6326_v39 = vpop.permute.xlu1 %6325 }
0x28ea   : > { %v6328_v40 = vunpack.i.h.bf16 %v6326_v39  ;;  %v6327_v41 = vunpack.i.l.bf16 %v6326_v39 }
0x28eb   : > { %5242 = vmatpush3.bf16.msra.mxu1 %v4342_v38 }
0x28ec   : > { %v4300_v54 = vsel %vm8763_vm8, %v6327_v41, %v6328_v40  ;;  %5243 = vmatprep.subr.bf16.mxu1 %v7029_v0 }
0x28ed   : > { %v4343_v55 = vpack.c.bf16 %v4301_v47, %v4300_v54  ;;  %v6331_v56 = vpop.permute.xlu1 %6330 }
0x28ee   : > { %v6333_v57 = vunpack.i.h.bf16 %v6331_v56  ;;  %v6332_v58 = vunpack.i.l.bf16 %v6331_v56  ;;  %v4490_v56 = vlaneseq }
0x28ef   : > { %5244 = vmatpush3.bf16.msra.mxu1 %v4343_v55  ;;  %v4391_v55 = vld [vmem:[#allocation27] sm:$0xf] }
0x28f0   : > { %v4312_v62 = vsel %vm8765_vm10, %v6332_v58, %v6333_v57  ;;  %5245 = vmatprep.subr.bf16.mxu1 %v7029_v0  ;;  %v4491_v57 = vshrl.u32 %v4490_v56, 7 }
0x28f1   : > { %v4344_v1 = vpack.c.bf16 %v4313_v59, %v4312_v62  ;;  %v6336_v2 = vpop.permute.xlu1 %6335 }
0x28f2   : > { %v6338_v29 = vunpack.i.h.bf16 %v6336_v2  ;;  %v6337_v3 = vunpack.i.l.bf16 %v6336_v2 }
0x28f3   : > { %5246 = vmatpush3.bf16.msra.mxu1 %v4344_v1 }
0x28f4   : > { %v4324_v9 = vsel %vm8767_vm12, %v6337_v3, %v6338_v29  ;;  %5247 = vmatprep.subr.bf16.mxu1 %v7029_v0 }
0x28f5   : > { %v4345_v45 = vpack.c.bf16 %v4325_v4, %v4324_v9  ;;  %v6341_v44 = vpop.permute.xlu1 %6340 }
0x28f6   : > { %v6343_v46 = vunpack.i.h.bf16 %v6341_v44  ;;  %v6342_v10 = vunpack.i.l.bf16 %v6341_v44 }
0x28f7   : > { %5248 = vmatpush3.bf16.msra.mxu1 %v4345_v45 }
0x28f8   : > { %v4336_v48 = vsel %vm8769_vm15, %v6342_v10, %v6343_v46  ;;  %5249 = vmatprep.subr.bf16.mxu1 %v7029_v0 }
0x28f9   : > { %v4346_v13 = vpack.c.bf16 %v4337_v5, %v4336_v48 }
0x28fb   : > { %5250 = vmatpush3.bf16.msra.mxu1 %v4346_v13 }
0x28fe   : > { %5252 = vmatmul.mubr.msk.bf16.vlgmr.msra.gmra.mrb[56].mxu1 %vm1660_vm14, %v4247_v14  ;;  %vm8772_vm14 = vmmov %vm8762_vm7  ;;  %vm4492_vm7 = vcmp.lt.s32.totalorder %v4491_v57, 3 }
0x29d1   : > { %v4384_v16 = vpop.f32.mrb[56].mxu1 }
0x29d2   : > { %v4390_v17 = vmax.f32 %v4384_v16, 0.0  ;;  %v5253_v18 = vpop.f32.mrb[57].mxu1 }
0x29d3   : > { %v4387_v15 = vpop.f32.mrb[58].mxu1 }
0x29d4   : > { %4395 = vrot.lane.b32.xlu1 %v4390_v17, %s8737_s11  ;;  %v5254_v19 = vpop.f32.mrb[59].mxu1  ;;  %s8779_s11 = sld [smem:[#allocation68_spill]] }
0x2a46   : > { %v4396_v20 = vpop.permute.xlu1 %4395 }
0x2a47   : > { %4398 = vst.msk [vmem:[#allocation2] sm:$0xff] %vm1077_vm1, %v4396_v20  ;;  %vm8770_vm1 = vmmov %vm8758_vm0 }
0x2a48   : > { %4399 = vst.msk [vmem:[#allocation2 + $0x8] sm:$0xff] %vm1079_vm2, %v4396_v20  ;;  %vm8771_vm2 = vmmov %vm8760_vm5  ;;  %vm8776_vm5 = vcmask 1043456  }
0x2a49   : > { %vm8774_vm0 = vmmov %vm8768_vm13 }
0x2a4e   : > { %v4400_v12 = vld [vmem:[#allocation2] sm:$0xff] }
0x2a4f   : > { %v4401_v51 = vld [vmem:[#allocation2 + $0x8] sm:$0xff] }
0x2a50   : > { %v6354_v11 = vpack.i.bf16 %v4401_v51, %v4400_v12 }
0x2a52   : > { %6355 = vrot.lane.b32.xlu1 %v6354_v11, %s8732_s20  ;;  %6350 = vrot.lane.b32.xlu0 %v6354_v11, %s8728_s1  ;;  %s4872_s1 = sshll.u32 %s7206_s10, 7  ;;  %s7039_s10 = smov [#allocation29]  }
0x2a53   : > { %s8512_s19 = scalar_lea.hbm %s8779_s11, %s4872_s1  ;;  %s6913_s15 = sshll.u32 %s7039_s10, 4  ;;  %s6914_s15 = int_to_ptr.vmem [resolvable:$false] %s6913_s15 }
0x2a54   : > { %s6915_s23 = scalar_lea.vmem %s6914_s15, 256 }
0x2a56   : > { %6365 = vrot.lane.b32.xlu1 %v6354_v11, %s8729_s16  ;;  %6360 = vrot.lane.b32.xlu0 %v6354_v11, %s8734_s17  ;;  %s8778_s16 = sshll.u32 %s7613_s3, 3 }
0x2a5a   : > { %6375 = vrot.lane.b32.xlu1 %v6354_v11, %s8735_s6  ;;  %6370 = vrot.lane.b32.xlu0 %v6354_v11, %s8730_s7  ;;  %s1066_s7 = scalar_lea.vmem [#allocation29], %s8778_s16 }
0x2a5b   : > { %s4526_s20 = sshll.u32 %s1066_s7, 4  ;;  %s8514_s20 = int_to_ptr.vmem [resolvable:$true] %s4526_s20 }
0x2a5c   : > { %s6909_s28 = scalar_lea.vmem %s8514_s20, 128  ;;  %p6916_p11 = scmp.lt.s32.totalorder %s8514_s20, %s6914_s15 }
0x2a5d   : > { %p6910_p2 = scmp.ne.s32.totalorder %s8514_s20, %s6909_s28  ;;  %p6917_p13 = scmp.lt.s32.totalorder %s6915_s23, %s6909_s28 }
0x2a5f   : > { %p6911_p10 = pnand %p6910_p2, %p8780_p8  ;;  %p6918_p5 = por %p6917_p13, %p6916_p11 }
0x2a61   : > { %p6912_p12 = pneg %p6911_p10 }
0x2a63   : > { %p6919_p7 = pnand %p6918_p5, %p6912_p12 }
0x2ac4   : > { %v6356_v6 = vpop.permute.xlu1 %6355  ;;  %v6351_v42 = vpop.permute.xlu0 %6350 }
0x2ac5   : > { %v6353_v52 = vunpack.i.h.bf16 %v6351_v42  ;;  %v6352_v53 = vunpack.i.l.bf16 %v6351_v42  ;;  %v6358_v21 = vunpack.i.h.bf16 %v6356_v6  ;;  %v6357_v22 = vunpack.i.l.bf16 %v6356_v6 }
0x2ac7   : > { %v4408_v23 = vsel %vm8770_vm1, %v6352_v53, %v6353_v52  ;;  %v4414_v30 = vsel %vm8771_vm2, %v6357_v22, %v6358_v21 }
0x2ac8   : > { %v4440_v24 = vpack.c.bf16 %v4408_v23, %v4400_v12  ;;  %v6366_v25 = vpop.permute.xlu1 %6365  ;;  %v6361_v26 = vpop.permute.xlu0 %6360 }
0x2ac9   : > { %v6363_v27 = vunpack.i.h.bf16 %v6361_v26  ;;  %v6362_v28 = vunpack.i.l.bf16 %v6361_v26  ;;  %v6368_v31 = vunpack.i.h.bf16 %v6366_v25  ;;  %v6367_v32 = vunpack.i.l.bf16 %v6366_v25 }
0x2aca   : > { %5256 = vmatpush3.bf16.msra.mxu0 %v4440_v24 }
0x2acb   : > { %v4420_v33 = vsel %vm8772_vm14, %v6362_v28, %v6363_v27  ;;  %5257 = vmatprep.subr.bf16.mxu0 %v7029_v0  ;;  %v4426_v41 = vsel %vm8773_vm4, %v6367_v32, %v6368_v31 }
0x2acc   : > { %v4441_v34 = vpack.c.bf16 %v4420_v33, %v4414_v30  ;;  %v6376_v35 = vpop.permute.xlu1 %6375  ;;  %v6371_v36 = vpop.permute.xlu0 %6370 }
0x2acd   : > { %v6378_v37 = vunpack.i.h.bf16 %v6376_v35  ;;  %v6377_v38 = vunpack.i.l.bf16 %v6376_v35  ;;  %v6373_v39 = vunpack.i.h.bf16 %v6371_v36  ;;  %v6372_v40 = vunpack.i.l.bf16 %v6371_v36 }
0x2ace   : > { %5258 = vmatpush3.bf16.msra.mxu0 %v4441_v34 }
0x2acf   : > { %v4438_v43 = vsel %vm8774_vm0, %v6377_v38, %v6378_v37  ;;  %v4432_v47 = vsel %vm8775_vm3, %v6372_v40, %v6373_v39  ;;  %5259 = vmatprep.subr.bf16.mxu0 %v7029_v0 }
0x2ad0   : > { %v4442_v49 = vpack.c.bf16 %v4432_v47, %v4426_v41  ;;  %v4443_v50 = vpack.c.bf16 %v4438_v43, %v4438_v43 }
0x2ad2   : > { %5260 = vmatpush3.bf16.msra.mxu0 %v4442_v49  ;;  %v4448_v54 = vsel %vm8776_vm5, %v4443_v50, 0 }
0x2ad3   : > { %5261 = vmatprep.subr.bf16.mxu0 %v7029_v0 }
0x2ad6   : > { %5262 = vmatpush3.bf16.msra.mxu0 %v4448_v54 }
0x2ad9   : > { %5264 = vmatmul.mubr.msk.bf16.vlgmr.msra.gmra.mrb[68].mxu0 %vm8777_vm6, %v4391_v55 }
0x2bac   : > { %v4484_v58 = vpop.f32.mrb[68].mxu0 }
0x2bad   : > { %v4493_v59 = vsel %vm4492_vm7, %v4484_v58, -1e+30  ;;  %v5265_v60 = vpop.f32.mrb[69].mxu0 }
0x2bae   : > { %v4494_v61 = vrot.slane %v4493_v59, 4  ;;  %v4487_v62 = vpop.f32.mrb[70].mxu0 }
0x2baf   : > { %v5266_v63 = vpop.f32.mrb[71].mxu0 }
0x2bb0   : > { %v4495_v1 = vmax.f32 %v4493_v59, %v4494_v61 }
0x2bb2   : > { %v4496_v2 = vrot.slane %v4495_v1, 2 }
0x2bb4   : > { %v4497_v0 = vmax.f32 %v4495_v1, %v4496_v2 }
0x2bb6   : > { %v4498_v29 = vrot.slane %v4497_v0, 1 }
0x2bb8   : > { %v4499_v3 = vmax.f32 %v4497_v0, %v4498_v29 }
0x2bba   : > { %v4500_v4 = vsub.f32 %v4493_v59, %v4499_v3 }
0x2bbc   : > { %v4501_v7 = vmul.f32 1.442695, %v4500_v4 }
0x2bbe   : > { %6455 = vpow2.f32 %v4501_v7 }
0x2bc8   : > { %v6456_v8 = vpop.eup %6455 }
0x2bc9   : > { %v4503_v9 = vrot.slane %v6456_v8, 4 }
0x2bcb   : > { %v4504_v45 = vadd.f32 %v6456_v8, %v4503_v9 }
0x2bcd   : > { %v4505_v44 = vrot.slane %v4504_v45, 2 }
0x2bcf   : > { %v4506_v46 = vadd.f32 %v4505_v44, %v4504_v45 }
0x2bd1   : > { %v4507_v10 = vrot.slane %v4506_v46, 1 }
0x2bd3   : > { %v4508_v5 = vadd.f32 %v4507_v10, %v4506_v46 }
0x2bd5   : > { %6457 = vrcp.f32 %v4508_v5 }
0x2bdf   : > { %v6458_v48 = vpop.eup %6457 }
0x2be0   : > { %v4510_v13 = vmul.f32 %v6458_v48, %v6456_v8 }
0x2be2   : > { %4511 = vst [vmem:[%s1066_s7] sm:$0xff] %v4510_v13 }
0x2be3   : > { %6922 = shalt.err (!%p6919_p7)
}
0x2be4   : > { %s6923_s3 = scalar_lea.hbm %s8512_s19, 128  ;;  %s6927_s22 = scalar_lea.hbm %s8779_s11, 256 }
0x2be5   : > { %p6924_p4 = scmp.ne.s32.totalorder %s8512_s19, %s6923_s3  ;;  %p6928_p9 = scmp.lt.u32.totalorder %s8512_s19, %s8779_s11 }
0x2be6   : > { %p6929_p6 = scmp.lt.u32.totalorder %s6927_s22, %s6923_s3  ;;  %p6931_p2 = scmp.lt.u32.totalorder %s6923_s3, %s8512_s19 }
0x2be7   : > { %p6925_p1 = pnand %p6924_p4, %p8780_p8 }
0x2be8   : > { %p6930_p0 = por %p6929_p6, %p6928_p9 }
0x2be9   : > { %p6926_p3 = pneg %p6925_p1 }
0x2bea   : > { %p6932_p10 = por %p6931_p2, %p6930_p0 }
0x2bec   : > { %p6933_p12 = pnand %p6932_p10, %p6926_p3 }
0x2bee   : > { %6936 = shalt.err (!%p6933_p12)
}
0x2bef   : > { %5330 = dma.vmem_to_hbm [thread:$0]  (%p8780_p8), %s8514_s20, 128, %s8512_s19, %s4513_s21  }
0x2bf0 PF: > { %s4538_s1 = sand.u32 1, %s6995_s8   ;;  %p8781_p11 = scmp.ne.s32.totalorder %s8708_s14, 0 }
0x2bf1   : > { %p8782_p13 = scmp.ge.s32.totalorder %s7007_s30, 2  ;;  %s4539_s16 = scalar_lea.sflag [#allocation5], %s4538_s1 }
0x2bf3   : > { %p5383_p5 = pnand %p8782_p13, %p8781_p11 }
0x2bf5   : > { %6990 = dma.done.wait (!%p5383_p5), %s4539_s16, 128  }
0x2bf6   : > { %6992 = vsyncadd (!%p5383_p5), %s4539_s16, 4294967168  ;;  %p49_p7 = scmp.ge.s32.totalorder %s7543_s2, 4   ;;  %s8783_s8 = smov %s6999_s5 }
0x2bf7   : > { %s8784_s5 = smov %s7003_s9  ;;  %s8785_s9 = smov %s7555_s29 }
0x2bf8   : > { %s8786_s30 = smov %s7543_s2  ;;  %51 = sbr.rel (!%p49_p7) target bundleno = 43 (0x2b), region = 237 }
0x2bff   :  { %4544 = vsyncpa [#allocation4], 1 }
0x2c00   :  { %4546 = vsyncpa [#allocation4 + $0x1], 1 }
0x2c01   :  { %4547 = vsyncpa [#allocation7], 1 }
0x2c02   :  { %4548 = vsyncpa [#allocation10], 1 }
0x2c03   :  { %4549 = vsyncpa [#allocation13], 1 }
0x2c04   :  { %4550 = vsyncpa [#allocation16], 1 }
0x2c05   :  { %4551 = vsyncpa [#allocation19], 1 }
0x2c06   :  { %4552 = vsyncpa [#allocation22], 1 }
0x2c07   :  { %4553 = vsyncpa [#allocation25], 1 }
0x2c08   :  { %4554 = vsyncpa [#allocation28], 1 }
0x2c09   :  { %4555 = vsyncpa [#allocation5], 1 }
0x2c0a   :  { %4557 = vsyncpa [#allocation5 + $0x1], 1 }

</bundles_post_ra>
